<compile_context>
chip_gen: v7x
topology: tpu7x:2x2x1
jax: 0.10.0
libtpu: 0.0.40
codegen_flags: <defaults>
</compile_context>

<pallas_src>
import jax
import jax.numpy as jnp
from jax.experimental import pallas as pl
from jax.experimental.pallas import tpu as pltpu

SEQ = 10      # sequence length
DM = 32       # model dim
NH = 4        # heads
HD = 8        # head dim
DFF = 64      # ffn hidden
EPS = 1e-5    # torch LayerNorm default
NEG_BIG = -1e30


def _layernorm(x, gamma, beta):
    mu = jnp.mean(x, axis=-1, keepdims=True)
    var = jnp.mean((x - mu) ** 2, axis=-1, keepdims=True)
    return (x - mu) * jax.lax.rsqrt(var + EPS) * gamma + beta


def encoder_layer_kernel(
    x_ref, mask_ref,
    wqkv_ref, bqkv_ref, wo_ref, bo_ref,
    g_mh_ref, b_mh_ref,
    w1_ref, b1_ref, w2_ref, b2_ref,
    g_fc_ref, b_fc_ref,
    out_ref,
):
    x3 = x_ref[...]                       # (BT, SEQ, DM)
    bt = x3.shape[0]
    rows = bt * SEQ
    x = x3.reshape(rows, DM)              # flat slab for 2D MXU matmuls
    masked = mask_ref[...] != 0.0         # (BT, SEQ, SEQ); computed once, reused per head

    # ---- MultiHead (pre-norm; Q = K = V = x in the encoder layer) ----
    xn = _layernorm(x, g_mh_ref[...], b_mh_ref[...])
    qkv = jnp.dot(xn, wqkv_ref[...], preferred_element_type=jnp.float32) + bqkv_ref[...]
    inv_sqrt_d = HD ** -0.5               # fold 1/sqrt(d) into q: (q*c)@k.T == c*(q@k.T)
    q = (qkv[:, 0 * DM:1 * DM] * inv_sqrt_d).reshape(bt, SEQ, DM)
    k = qkv[:, 1 * DM:2 * DM].reshape(bt, SEQ, DM)
    v = qkv[:, 2 * DM:3 * DM].reshape(bt, SEQ, DM)

    ctx_cols = []
    for h in range(NH):                   # static 4-way head loop, batched over BT
        sl = slice(h * HD, (h + 1) * HD)
        s = jnp.einsum('bqd,bkd->bqk', q[..., sl], k[..., sl],
                       preferred_element_type=jnp.float32)
        # masked_fill_(mask, -inf): finite fill avoids -inf - -inf = NaN on fully
        # masked rows; identical to -inf for any partially masked row.
        s = jnp.where(masked, NEG_BIG, s)
        s = s - jnp.max(s, axis=-1, keepdims=True)
        e = jnp.exp(s)
        p = e * pl.reciprocal(jnp.sum(e, axis=-1, keepdims=True), approx=True)
        ctx_cols.append(jnp.einsum('bqk,bkd->bqd', p, v[..., sl],
                                   preferred_element_type=jnp.float32))
    # lane-axis concat == permute(0,2,1,3).reshape(-1, 10, 32) of the torch code
    ctx = jnp.concatenate(ctx_cols, axis=-1).reshape(rows, DM)

    attn = jnp.dot(ctx, wo_ref[...], preferred_element_type=jnp.float32) + bo_ref[...]
    score = x + attn                      # Dropout(p=0.1) -> identity (eval mode)

    # ---- FullyConnectedOutput ----
    y = _layernorm(score, g_fc_ref[...], b_fc_ref[...])
    h1 = jnp.maximum(
        jnp.dot(y, w1_ref[...], preferred_element_type=jnp.float32) + b1_ref[...], 0.0)
    o = jnp.dot(h1, w2_ref[...], preferred_element_type=jnp.float32) + b2_ref[...]
    # Dropout(p=0.1) -> identity in eval mode.  Single slab write per grid step.
    out_ref[...] = (score + o).reshape(bt, SEQ, DM)


def encoder_layer(x, mask, params, *, block_b=None):
    """x: (B, SEQ, DM) f32; mask: (B, 1, SEQ, SEQ) (nonzero => masked)."""
    B = x.shape[0]
    if block_b is None:
        # Maximise per-step work (per-step overhead dominates this tiny kernel)
        # while keeping >= 2 grid steps so both v7x TensorCores get work.
        block_b = max(1, min(256, pl.cdiv(B, 2)))
    grid_b = pl.cdiv(B, block_b)
    bp = grid_b * block_b

    xin = x.astype(jnp.float32)
    mask2d = mask.reshape(B, SEQ, SEQ).astype(jnp.float32)
    if bp != B:                           # pad batch so blocks tile exactly
        pad = bp - B
        xin = jnp.pad(xin, ((0, pad), (0, 0), (0, 0)))
        mask2d = jnp.pad(mask2d, ((0, pad), (0, 0), (0, 0)))

    # Fuse the three projections into one (DM, 3*DM) matmul.
    w_qkv = jnp.concatenate([params["wq"], params["wk"], params["wv"]], axis=1)
    b_qkv = jnp.concatenate([params["bq"], params["bk"], params["bv"]], axis=1)

    full = lambda shape: pl.BlockSpec(shape, lambda b: (0,) * len(shape))
    in_specs = [
        pl.BlockSpec((block_b, SEQ, DM), lambda b: (b, 0, 0)),
        pl.BlockSpec((block_b, SEQ, SEQ), lambda b: (b, 0, 0)),
        full((DM, 3 * DM)), full((1, 3 * DM)),   # fused wqkv, bqkv
        full((DM, DM)), full((1, DM)),           # wo, bo
        full((1, DM)), full((1, DM)),            # mh layernorm gamma, beta
        full((DM, DFF)), full((1, DFF)),         # w1, b1
        full((DFF, DM)), full((1, DM)),          # w2, b2
        full((1, DM)), full((1, DM)),            # fc layernorm gamma, beta
    ]

    weights = (w_qkv, b_qkv, params["wo"], params["bo"],
               params["g_mh"], params["b_mh"],
               params["w1"], params["b1"], params["w2"], params["b2"],
               params["g_fc"], params["b_fc"])
    weight_bytes = sum(int(w.size) * w.dtype.itemsize for w in weights)
    flops = bp * (2 * SEQ * DM * 3 * DM              # fused qkv projection
                  + 2 * NH * SEQ * SEQ * HD * 2      # scores + context
                  + 2 * SEQ * DM * DM                # out projection
                  + 2 * SEQ * (DM * DFF + DFF * DM)) # ffn
    transcendentals = bp * (NH * SEQ * SEQ + NH * SEQ + 4 * SEQ)
    bytes_accessed = bp * SEQ * (2 * DM + SEQ) * 4 + grid_b * weight_bytes

    fn = pl.pallas_call(
        encoder_layer_kernel,
        out_shape=jax.ShapeDtypeStruct((bp, SEQ, DM), jnp.float32),
        grid=(grid_b,),
        in_specs=in_specs,
        out_specs=pl.BlockSpec((block_b, SEQ, DM), lambda b: (b, 0, 0)),
        compiler_params=pltpu.CompilerParams(dimension_semantics=("parallel",)),
        cost_estimate=pl.CostEstimate(flops=int(flops),
                                      transcendentals=int(transcendentals),
                                      bytes_accessed=int(bytes_accessed)),
    )
    out = fn(xin, mask2d, *weights)
    return out[:B] if bp != B else out


def init_params(key):
    ks = jax.random.split(key, 6)
    def lin(k, fan_in, fan_out):
        w = jax.random.normal(k, (fan_in, fan_out), jnp.float32) * 0.1
        b = jnp.zeros((1, fan_out), jnp.float32)
        return w, b
    wq, bq = lin(ks[0], DM, DM)
    wk, bk = lin(ks[1], DM, DM)
    wv, bv = lin(ks[2], DM, DM)
    wo, bo = lin(ks[3], DM, DM)
    w1, b1 = lin(ks[4], DM, DFF)
    w2, b2 = lin(ks[5], DFF, DM)
    return dict(
        wq=wq, bq=bq, wk=wk, bk=bk, wv=wv, bv=bv, wo=wo, bo=bo,
        g_mh=jnp.ones((1, DM), jnp.float32), b_mh=jnp.zeros((1, DM), jnp.float32),
        w1=w1, b1=b1, w2=w2, b2=b2,
        g_fc=jnp.ones((1, DM), jnp.float32), b_fc=jnp.zeros((1, DM), jnp.float32),
    )


def reference_encoder_layer(x, mask, params):
    """Pure-JAX mirror of the PyTorch EncoderLayer forward (eval mode)."""
    def ln(v, g, b):
        mu = jnp.mean(v, -1, keepdims=True)
        var = jnp.mean((v - mu) ** 2, -1, keepdims=True)
        return (v - mu) / jnp.sqrt(var + EPS) * g + b
    B = x.shape[0]
    xn = ln(x, params["g_mh"], params["b_mh"])
    q = xn @ params["wq"] + params["bq"]
    k = xn @ params["wk"] + params["bk"]
    v = xn @ params["wv"] + params["bv"]
    q = q.reshape(B, SEQ, NH, HD).transpose(0, 2, 1, 3)
    k = k.reshape(B, SEQ, NH, HD).transpose(0, 2, 1, 3)
    v = v.reshape(B, SEQ, NH, HD).transpose(0, 2, 1, 3)
    s = (q @ k.transpose(0, 1, 3, 2)) / (HD ** 0.5)
    s = jnp.where(mask != 0, -jnp.inf, s)
    p = jax.nn.softmax(s, axis=-1)
    ctx = (p @ v).transpose(0, 2, 1, 3).reshape(B, SEQ, DM)
    score = x + (ctx @ params["wo"] + params["bo"])
    y = ln(score, params["g_fc"], params["b_fc"])
    h1 = jnp.maximum(y @ params["w1"] + params["b1"], 0.0)
    return score + (h1 @ params["w2"] + params["b2"])


if __name__ == "__main__":
    key = jax.random.PRNGKey(0)
    kx, kp = jax.random.split(key)
    B = 8                                                # matches original module shapes
    x = jax.random.normal(kx, (B, SEQ, DM), jnp.float32)
    mask = jnp.zeros((B, 1, SEQ, SEQ), jnp.float32)      # all-unmasked, like torch.zeros
    params = init_params(kp)

    out = encoder_layer(x, mask, params)                 # BT=4 -> 2 grid steps
    jax.block_until_ready(out)
    assert out.shape == (B, SEQ, DM)

    ref = reference_encoder_layer(x, mask, params)
    err = float(jnp.max(jnp.abs(out - ref)))
    assert err < 1e-2, f"max abs error vs reference: {err}"
    print("KERNEL_OK")
</pallas_src>

<mosaic_0001>
module attributes {stable_mosaic.version = 11 : i64} {
  func.func @encoder_layer_kernel(%arg0: i32, %arg1: memref<4x10x32xf32, #tpu.memory_space<vmem>>, %arg2: memref<4x10x10xf32, #tpu.memory_space<vmem>>, %arg3: memref<32x96xf32, #tpu.memory_space<vmem>>, %arg4: memref<1x96xf32, #tpu.memory_space<vmem>>, %arg5: memref<32x32xf32, #tpu.memory_space<vmem>>, %arg6: memref<1x32xf32, #tpu.memory_space<vmem>>, %arg7: memref<1x32xf32, #tpu.memory_space<vmem>>, %arg8: memref<1x32xf32, #tpu.memory_space<vmem>>, %arg9: memref<32x64xf32, #tpu.memory_space<vmem>>, %arg10: memref<1x64xf32, #tpu.memory_space<vmem>>, %arg11: memref<64x32xf32, #tpu.memory_space<vmem>>, %arg12: memref<1x32xf32, #tpu.memory_space<vmem>>, %arg13: memref<1x32xf32, #tpu.memory_space<vmem>>, %arg14: memref<1x32xf32, #tpu.memory_space<vmem>>, %arg15: memref<4x10x32xf32, #tpu.memory_space<vmem>>) attributes {dimension_semantics = [#tpu.dimension_semantics<parallel>], iteration_bounds = array<i64: 2>, scalar_prefetch = 0 : i64, scratch_operands = 0 : i64, tpu.core_type = #tpu.core_type<tc>, window_params = [{transform_indices = @transform_0, window_bounds = array<i64: 4, 10, 32>}, {transform_indices = @transform_1, window_bounds = array<i64: 4, 10, 10>}, {pipeline_mode = #tpu.pipeline_mode<synchronous>, transform_indices = @transform_2, window_bounds = array<i64: 32, 96>}, {pipeline_mode = #tpu.pipeline_mode<synchronous>, transform_indices = @transform_3, window_bounds = array<i64: 1, 96>}, {pipeline_mode = #tpu.pipeline_mode<synchronous>, transform_indices = @transform_4, window_bounds = array<i64: 32, 32>}, {pipeline_mode = #tpu.pipeline_mode<synchronous>, transform_indices = @transform_5, window_bounds = array<i64: 1, 32>}, {pipeline_mode = #tpu.pipeline_mode<synchronous>, transform_indices = @transform_6, window_bounds = array<i64: 1, 32>}, {pipeline_mode = #tpu.pipeline_mode<synchronous>, transform_indices = @transform_7, window_bounds = array<i64: 1, 32>}, {pipeline_mode = #tpu.pipeline_mode<synchronous>, transform_indices = @transform_8, window_bounds = array<i64: 32, 64>}, {pipeline_mode = #tpu.pipeline_mode<synchronous>, transform_indices = @transform_9, window_bounds = array<i64: 1, 64>}, {pipeline_mode = #tpu.pipeline_mode<synchronous>, transform_indices = @transform_10, window_bounds = array<i64: 64, 32>}, {pipeline_mode = #tpu.pipeline_mode<synchronous>, transform_indices = @transform_11, window_bounds = array<i64: 1, 32>}, {pipeline_mode = #tpu.pipeline_mode<synchronous>, transform_indices = @transform_12, window_bounds = array<i64: 1, 32>}, {pipeline_mode = #tpu.pipeline_mode<synchronous>, transform_indices = @transform_13, window_bounds = array<i64: 1, 32>}, {transform_indices = @transform_14, window_bounds = array<i64: 4, 10, 32>}]} {
    %c0 = arith.constant 0 : index
    %c0_0 = arith.constant 0 : index
    %c0_1 = arith.constant 0 : index
    %0 = vector.load %arg1[%c0, %c0_0, %c0_1] : memref<4x10x32xf32, #tpu.memory_space<vmem>>, vector<4x10x32xf32>
    %1 = vector.shape_cast %0 : vector<4x10x32xf32> to vector<40x32xf32>
    %c0_2 = arith.constant 0 : index
    %c0_3 = arith.constant 0 : index
    %c0_4 = arith.constant 0 : index
    %2 = vector.load %arg2[%c0_2, %c0_3, %c0_4] : memref<4x10x10xf32, #tpu.memory_space<vmem>>, vector<4x10x10xf32>
    %cst = arith.constant 0.000000e+00 : f32
    %3 = vector.broadcast %cst : f32 to vector<4x10x10xf32>
    %4 = arith.cmpf one, %2, %3 : vector<4x10x10xf32>
    %c0_5 = arith.constant 0 : index
    %c0_6 = arith.constant 0 : index
    %5 = vector.load %arg7[%c0_5, %c0_6] : memref<1x32xf32, #tpu.memory_space<vmem>>, vector<1x32xf32>
    %c0_7 = arith.constant 0 : index
    %c0_8 = arith.constant 0 : index
    %6 = vector.load %arg8[%c0_7, %c0_8] : memref<1x32xf32, #tpu.memory_space<vmem>>, vector<1x32xf32>
    %cst_9 = arith.constant dense<0.000000e+00> : vector<40xf32>
    %7 = vector.multi_reduction <add>, %1, %cst_9 [1] : vector<40x32xf32> to vector<40xf32>
    %8 = vector.shape_cast %7 : vector<40xf32> to vector<40x1xf32>
    %cst_10 = arith.constant 3.200000e+01 : f32
    %9 = vector.broadcast %cst_10 : f32 to vector<40x1xf32>
    %10 = arith.divf %8, %9 : vector<40x1xf32>
    %11 = vector.broadcast %10 : vector<40x1xf32> to vector<40x32xf32>
    %12 = arith.subf %1, %11 : vector<40x32xf32>
    %13 = arith.mulf %12, %12 : vector<40x32xf32>
    %cst_11 = arith.constant dense<0.000000e+00> : vector<40xf32>
    %14 = vector.multi_reduction <add>, %13, %cst_11 [1] : vector<40x32xf32> to vector<40xf32>
    %15 = vector.shape_cast %14 : vector<40xf32> to vector<40x1xf32>
    %cst_12 = arith.constant 3.200000e+01 : f32
    %16 = vector.broadcast %cst_12 : f32 to vector<40x1xf32>
    %17 = arith.divf %15, %16 : vector<40x1xf32>
    %18 = vector.broadcast %10 : vector<40x1xf32> to vector<40x32xf32>
    %19 = arith.subf %1, %18 : vector<40x32xf32>
    %cst_13 = arith.constant 9.99999974E-6 : f32
    %20 = vector.broadcast %cst_13 : f32 to vector<40x1xf32>
    %21 = arith.addf %17, %20 : vector<40x1xf32>
    %22 = math.rsqrt %21 : vector<40x1xf32>
    %23 = vector.broadcast %22 : vector<40x1xf32> to vector<40x32xf32>
    %24 = arith.mulf %19, %23 : vector<40x32xf32>
    %25 = vector.broadcast %5 : vector<1x32xf32> to vector<40x32xf32>
    %26 = arith.mulf %24, %25 : vector<40x32xf32>
    %27 = vector.broadcast %6 : vector<1x32xf32> to vector<40x32xf32>
    %28 = arith.addf %26, %27 : vector<40x32xf32>
    %c0_14 = arith.constant 0 : index
    %c0_15 = arith.constant 0 : index
    %29 = vector.load %arg3[%c0_14, %c0_15] : memref<32x96xf32, #tpu.memory_space<vmem>>, vector<32x96xf32>
    %cst_16 = arith.constant dense<0.000000e+00> : vector<40x96xf32>
    %30 = tpu.matmul %28, %29, %cst_16 {dimension_numbers = #tpu.dot_dimension_numbers<[1], [0], [0], [1], [0, 0, 1, 1], [], []>} : vector<40x32xf32>, vector<32x96xf32>, vector<40x96xf32> -> vector<40x96xf32>
    %c0_17 = arith.constant 0 : index
    %c0_18 = arith.constant 0 : index
    %31 = vector.load %arg4[%c0_17, %c0_18] : memref<1x96xf32, #tpu.memory_space<vmem>>, vector<1x96xf32>
    %32 = vector.broadcast %31 : vector<1x96xf32> to vector<40x96xf32>
    %33 = arith.addf %30, %32 : vector<40x96xf32>
    %34 = vector.extract_strided_slice %33 {offsets = [0, 0], sizes = [40, 32], strides = [1, 1]} : vector<40x96xf32> to vector<40x32xf32>
    %cst_19 = arith.constant 0.353553385 : f32
    %35 = vector.broadcast %cst_19 : f32 to vector<40x32xf32>
    %36 = arith.mulf %34, %35 : vector<40x32xf32>
    %37 = vector.shape_cast %36 : vector<40x32xf32> to vector<4x10x32xf32>
    %38 = vector.extract_strided_slice %33 {offsets = [0, 32], sizes = [40, 32], strides = [1, 1]} : vector<40x96xf32> to vector<40x32xf32>
    %39 = vector.shape_cast %38 : vector<40x32xf32> to vector<4x10x32xf32>
    %40 = vector.extract_strided_slice %33 {offsets = [0, 64], sizes = [40, 32], strides = [1, 1]} : vector<40x96xf32> to vector<40x32xf32>
    %41 = vector.shape_cast %40 : vector<40x32xf32> to vector<4x10x32xf32>
    %42 = vector.extract_strided_slice %37 {offsets = [0, 0, 0], sizes = [4, 10, 8], strides = [1, 1, 1]} : vector<4x10x32xf32> to vector<4x10x8xf32>
    %43 = vector.extract_strided_slice %39 {offsets = [0, 0, 0], sizes = [4, 10, 8], strides = [1, 1, 1]} : vector<4x10x32xf32> to vector<4x10x8xf32>
    "tpu.trace_start"() <{level = 10 : i32, message = "bqd,bkd->bqk"}> : () -> ()
    %cst_20 = arith.constant dense<0.000000e+00> : vector<4x10x10xf32>
    %44 = tpu.matmul %42, %43, %cst_20 {dimension_numbers = #tpu.dot_dimension_numbers<[2], [2], [1], [1], [0, 0, 0, 1, 1, 1], [0], [0]>} : vector<4x10x8xf32>, vector<4x10x8xf32>, vector<4x10x10xf32> -> vector<4x10x10xf32>
    %cst_21 = arith.constant -1.000000e+30 : f32
    "tpu.trace_stop"() : () -> ()
    %45 = vector.broadcast %cst_21 : f32 to vector<4x10x10xf32>
    %46 = arith.select %4, %45, %44 : vector<4x10x10xi1>, vector<4x10x10xf32>
    %cst_22 = arith.constant dense<0xFF800000> : vector<4x10xf32>
    %47 = vector.multi_reduction <maximumf>, %46, %cst_22 [2] : vector<4x10x10xf32> to vector<4x10xf32>
    %48 = vector.shape_cast %47 : vector<4x10xf32> to vector<4x10x1xf32>
    %49 = vector.broadcast %48 : vector<4x10x1xf32> to vector<4x10x10xf32>
    %50 = arith.subf %46, %49 : vector<4x10x10xf32>
    %51 = math.exp %50 : vector<4x10x10xf32>
    %cst_23 = arith.constant dense<0.000000e+00> : vector<4x10xf32>
    %52 = vector.multi_reduction <add>, %51, %cst_23 [2] : vector<4x10x10xf32> to vector<4x10xf32>
    %53 = vector.shape_cast %52 : vector<4x10xf32> to vector<4x10x1xf32>
    %54 = tpu.reciprocal %53 {approx = true} : vector<4x10x1xf32> -> vector<4x10x1xf32>
    %55 = vector.broadcast %54 : vector<4x10x1xf32> to vector<4x10x10xf32>
    %56 = arith.mulf %51, %55 : vector<4x10x10xf32>
    %57 = vector.extract_strided_slice %41 {offsets = [0, 0, 0], sizes = [4, 10, 8], strides = [1, 1, 1]} : vector<4x10x32xf32> to vector<4x10x8xf32>
    "tpu.trace_start"() <{level = 10 : i32, message = "bqk,bkd->bqd"}> : () -> ()
    %cst_24 = arith.constant dense<0.000000e+00> : vector<4x10x8xf32>
    %58 = tpu.matmul %56, %57, %cst_24 {dimension_numbers = #tpu.dot_dimension_numbers<[2], [1], [1], [2], [0, 0, 0, 1, 1, 2], [0], [0]>} : vector<4x10x10xf32>, vector<4x10x8xf32>, vector<4x10x8xf32> -> vector<4x10x8xf32>
    "tpu.trace_stop"() : () -> ()
    %59 = vector.extract_strided_slice %37 {offsets = [0, 0, 8], sizes = [4, 10, 8], strides = [1, 1, 1]} : vector<4x10x32xf32> to vector<4x10x8xf32>
    %60 = vector.extract_strided_slice %39 {offsets = [0, 0, 8], sizes = [4, 10, 8], strides = [1, 1, 1]} : vector<4x10x32xf32> to vector<4x10x8xf32>
    "tpu.trace_start"() <{level = 10 : i32, message = "bqd,bkd->bqk"}> : () -> ()
    %cst_25 = arith.constant dense<0.000000e+00> : vector<4x10x10xf32>
    %61 = tpu.matmul %59, %60, %cst_25 {dimension_numbers = #tpu.dot_dimension_numbers<[2], [2], [1], [1], [0, 0, 0, 1, 1, 1], [0], [0]>} : vector<4x10x8xf32>, vector<4x10x8xf32>, vector<4x10x10xf32> -> vector<4x10x10xf32>
    %cst_26 = arith.constant -1.000000e+30 : f32
    "tpu.trace_stop"() : () -> ()
    %62 = vector.broadcast %cst_26 : f32 to vector<4x10x10xf32>
    %63 = arith.select %4, %62, %61 : vector<4x10x10xi1>, vector<4x10x10xf32>
    %cst_27 = arith.constant dense<0xFF800000> : vector<4x10xf32>
    %64 = vector.multi_reduction <maximumf>, %63, %cst_27 [2] : vector<4x10x10xf32> to vector<4x10xf32>
    %65 = vector.shape_cast %64 : vector<4x10xf32> to vector<4x10x1xf32>
    %66 = vector.broadcast %65 : vector<4x10x1xf32> to vector<4x10x10xf32>
    %67 = arith.subf %63, %66 : vector<4x10x10xf32>
    %68 = math.exp %67 : vector<4x10x10xf32>
    %cst_28 = arith.constant dense<0.000000e+00> : vector<4x10xf32>
    %69 = vector.multi_reduction <add>, %68, %cst_28 [2] : vector<4x10x10xf32> to vector<4x10xf32>
    %70 = vector.shape_cast %69 : vector<4x10xf32> to vector<4x10x1xf32>
    %71 = tpu.reciprocal %70 {approx = true} : vector<4x10x1xf32> -> vector<4x10x1xf32>
    %72 = vector.broadcast %71 : vector<4x10x1xf32> to vector<4x10x10xf32>
    %73 = arith.mulf %68, %72 : vector<4x10x10xf32>
    %74 = vector.extract_strided_slice %41 {offsets = [0, 0, 8], sizes = [4, 10, 8], strides = [1, 1, 1]} : vector<4x10x32xf32> to vector<4x10x8xf32>
    "tpu.trace_start"() <{level = 10 : i32, message = "bqk,bkd->bqd"}> : () -> ()
    %cst_29 = arith.constant dense<0.000000e+00> : vector<4x10x8xf32>
    %75 = tpu.matmul %73, %74, %cst_29 {dimension_numbers = #tpu.dot_dimension_numbers<[2], [1], [1], [2], [0, 0, 0, 1, 1, 2], [0], [0]>} : vector<4x10x10xf32>, vector<4x10x8xf32>, vector<4x10x8xf32> -> vector<4x10x8xf32>
    "tpu.trace_stop"() : () -> ()
    %76 = vector.extract_strided_slice %37 {offsets = [0, 0, 16], sizes = [4, 10, 8], strides = [1, 1, 1]} : vector<4x10x32xf32> to vector<4x10x8xf32>
    %77 = vector.extract_strided_slice %39 {offsets = [0, 0, 16], sizes = [4, 10, 8], strides = [1, 1, 1]} : vector<4x10x32xf32> to vector<4x10x8xf32>
    "tpu.trace_start"() <{level = 10 : i32, message = "bqd,bkd->bqk"}> : () -> ()
    %cst_30 = arith.constant dense<0.000000e+00> : vector<4x10x10xf32>
    %78 = tpu.matmul %76, %77, %cst_30 {dimension_numbers = #tpu.dot_dimension_numbers<[2], [2], [1], [1], [0, 0, 0, 1, 1, 1], [0], [0]>} : vector<4x10x8xf32>, vector<4x10x8xf32>, vector<4x10x10xf32> -> vector<4x10x10xf32>
    %cst_31 = arith.constant -1.000000e+30 : f32
    "tpu.trace_stop"() : () -> ()
    %79 = vector.broadcast %cst_31 : f32 to vector<4x10x10xf32>
    %80 = arith.select %4, %79, %78 : vector<4x10x10xi1>, vector<4x10x10xf32>
    %cst_32 = arith.constant dense<0xFF800000> : vector<4x10xf32>
    %81 = vector.multi_reduction <maximumf>, %80, %cst_32 [2] : vector<4x10x10xf32> to vector<4x10xf32>
    %82 = vector.shape_cast %81 : vector<4x10xf32> to vector<4x10x1xf32>
    %83 = vector.broadcast %82 : vector<4x10x1xf32> to vector<4x10x10xf32>
    %84 = arith.subf %80, %83 : vector<4x10x10xf32>
    %85 = math.exp %84 : vector<4x10x10xf32>
    %cst_33 = arith.constant dense<0.000000e+00> : vector<4x10xf32>
    %86 = vector.multi_reduction <add>, %85, %cst_33 [2] : vector<4x10x10xf32> to vector<4x10xf32>
    %87 = vector.shape_cast %86 : vector<4x10xf32> to vector<4x10x1xf32>
    %88 = tpu.reciprocal %87 {approx = true} : vector<4x10x1xf32> -> vector<4x10x1xf32>
    %89 = vector.broadcast %88 : vector<4x10x1xf32> to vector<4x10x10xf32>
    %90 = arith.mulf %85, %89 : vector<4x10x10xf32>
    %91 = vector.extract_strided_slice %41 {offsets = [0, 0, 16], sizes = [4, 10, 8], strides = [1, 1, 1]} : vector<4x10x32xf32> to vector<4x10x8xf32>
    "tpu.trace_start"() <{level = 10 : i32, message = "bqk,bkd->bqd"}> : () -> ()
    %cst_34 = arith.constant dense<0.000000e+00> : vector<4x10x8xf32>
    %92 = tpu.matmul %90, %91, %cst_34 {dimension_numbers = #tpu.dot_dimension_numbers<[2], [1], [1], [2], [0, 0, 0, 1, 1, 2], [0], [0]>} : vector<4x10x10xf32>, vector<4x10x8xf32>, vector<4x10x8xf32> -> vector<4x10x8xf32>
    "tpu.trace_stop"() : () -> ()
    %93 = vector.extract_strided_slice %37 {offsets = [0, 0, 24], sizes = [4, 10, 8], strides = [1, 1, 1]} : vector<4x10x32xf32> to vector<4x10x8xf32>
    %94 = vector.extract_strided_slice %39 {offsets = [0, 0, 24], sizes = [4, 10, 8], strides = [1, 1, 1]} : vector<4x10x32xf32> to vector<4x10x8xf32>
    "tpu.trace_start"() <{level = 10 : i32, message = "bqd,bkd->bqk"}> : () -> ()
    %cst_35 = arith.constant dense<0.000000e+00> : vector<4x10x10xf32>
    %95 = tpu.matmul %93, %94, %cst_35 {dimension_numbers = #tpu.dot_dimension_numbers<[2], [2], [1], [1], [0, 0, 0, 1, 1, 1], [0], [0]>} : vector<4x10x8xf32>, vector<4x10x8xf32>, vector<4x10x10xf32> -> vector<4x10x10xf32>
    %cst_36 = arith.constant -1.000000e+30 : f32
    "tpu.trace_stop"() : () -> ()
    %96 = vector.broadcast %cst_36 : f32 to vector<4x10x10xf32>
    %97 = arith.select %4, %96, %95 : vector<4x10x10xi1>, vector<4x10x10xf32>
    %cst_37 = arith.constant dense<0xFF800000> : vector<4x10xf32>
    %98 = vector.multi_reduction <maximumf>, %97, %cst_37 [2] : vector<4x10x10xf32> to vector<4x10xf32>
    %99 = vector.shape_cast %98 : vector<4x10xf32> to vector<4x10x1xf32>
    %100 = vector.broadcast %99 : vector<4x10x1xf32> to vector<4x10x10xf32>
    %101 = arith.subf %97, %100 : vector<4x10x10xf32>
    %102 = math.exp %101 : vector<4x10x10xf32>
    %cst_38 = arith.constant dense<0.000000e+00> : vector<4x10xf32>
    %103 = vector.multi_reduction <add>, %102, %cst_38 [2] : vector<4x10x10xf32> to vector<4x10xf32>
    %104 = vector.shape_cast %103 : vector<4x10xf32> to vector<4x10x1xf32>
    %105 = tpu.reciprocal %104 {approx = true} : vector<4x10x1xf32> -> vector<4x10x1xf32>
    %106 = vector.broadcast %105 : vector<4x10x1xf32> to vector<4x10x10xf32>
    %107 = arith.mulf %102, %106 : vector<4x10x10xf32>
    %108 = vector.extract_strided_slice %41 {offsets = [0, 0, 24], sizes = [4, 10, 8], strides = [1, 1, 1]} : vector<4x10x32xf32> to vector<4x10x8xf32>
    "tpu.trace_start"() <{level = 10 : i32, message = "bqk,bkd->bqd"}> : () -> ()
    %cst_39 = arith.constant dense<0.000000e+00> : vector<4x10x8xf32>
    %109 = tpu.matmul %107, %108, %cst_39 {dimension_numbers = #tpu.dot_dimension_numbers<[2], [1], [1], [2], [0, 0, 0, 1, 1, 2], [0], [0]>} : vector<4x10x10xf32>, vector<4x10x8xf32>, vector<4x10x8xf32> -> vector<4x10x8xf32>
    "tpu.trace_stop"() : () -> ()
    %110 = tpu.concatenate %58, %75, %92, %109 in 2 : vector<4x10x8xf32>, vector<4x10x8xf32>, vector<4x10x8xf32>, vector<4x10x8xf32> -> vector<4x10x32xf32>
    %111 = vector.shape_cast %110 : vector<4x10x32xf32> to vector<40x32xf32>
    %c0_40 = arith.constant 0 : index
    %c0_41 = arith.constant 0 : index
    %112 = vector.load %arg5[%c0_40, %c0_41] : memref<32x32xf32, #tpu.memory_space<vmem>>, vector<32x32xf32>
    %cst_42 = arith.constant dense<0.000000e+00> : vector<40x32xf32>
    %113 = tpu.matmul %111, %112, %cst_42 {dimension_numbers = #tpu.dot_dimension_numbers<[1], [0], [0], [1], [0, 0, 1, 1], [], []>} : vector<40x32xf32>, vector<32x32xf32>, vector<40x32xf32> -> vector<40x32xf32>
    %c0_43 = arith.constant 0 : index
    %c0_44 = arith.constant 0 : index
    %114 = vector.load %arg6[%c0_43, %c0_44] : memref<1x32xf32, #tpu.memory_space<vmem>>, vector<1x32xf32>
    %115 = vector.broadcast %114 : vector<1x32xf32> to vector<40x32xf32>
    %116 = arith.addf %113, %115 : vector<40x32xf32>
    %117 = arith.addf %1, %116 : vector<40x32xf32>
    %c0_45 = arith.constant 0 : index
    %c0_46 = arith.constant 0 : index
    %118 = vector.load %arg13[%c0_45, %c0_46] : memref<1x32xf32, #tpu.memory_space<vmem>>, vector<1x32xf32>
    %c0_47 = arith.constant 0 : index
    %c0_48 = arith.constant 0 : index
    %119 = vector.load %arg14[%c0_47, %c0_48] : memref<1x32xf32, #tpu.memory_space<vmem>>, vector<1x32xf32>
    %cst_49 = arith.constant dense<0.000000e+00> : vector<40xf32>
    %120 = vector.multi_reduction <add>, %117, %cst_49 [1] : vector<40x32xf32> to vector<40xf32>
    %121 = vector.shape_cast %120 : vector<40xf32> to vector<40x1xf32>
    %cst_50 = arith.constant 3.200000e+01 : f32
    %122 = vector.broadcast %cst_50 : f32 to vector<40x1xf32>
    %123 = arith.divf %121, %122 : vector<40x1xf32>
    %124 = vector.broadcast %123 : vector<40x1xf32> to vector<40x32xf32>
    %125 = arith.subf %117, %124 : vector<40x32xf32>
    %126 = arith.mulf %125, %125 : vector<40x32xf32>
    %cst_51 = arith.constant dense<0.000000e+00> : vector<40xf32>
    %127 = vector.multi_reduction <add>, %126, %cst_51 [1] : vector<40x32xf32> to vector<40xf32>
    %128 = vector.shape_cast %127 : vector<40xf32> to vector<40x1xf32>
    %cst_52 = arith.constant 3.200000e+01 : f32
    %129 = vector.broadcast %cst_52 : f32 to vector<40x1xf32>
    %130 = arith.divf %128, %129 : vector<40x1xf32>
    %131 = vector.broadcast %123 : vector<40x1xf32> to vector<40x32xf32>
    %132 = arith.subf %117, %131 : vector<40x32xf32>
    %cst_53 = arith.constant 9.99999974E-6 : f32
    %133 = vector.broadcast %cst_53 : f32 to vector<40x1xf32>
    %134 = arith.addf %130, %133 : vector<40x1xf32>
    %135 = math.rsqrt %134 : vector<40x1xf32>
    %136 = vector.broadcast %135 : vector<40x1xf32> to vector<40x32xf32>
    %137 = arith.mulf %132, %136 : vector<40x32xf32>
    %138 = vector.broadcast %118 : vector<1x32xf32> to vector<40x32xf32>
    %139 = arith.mulf %137, %138 : vector<40x32xf32>
    %140 = vector.broadcast %119 : vector<1x32xf32> to vector<40x32xf32>
    %141 = arith.addf %139, %140 : vector<40x32xf32>
    %c0_54 = arith.constant 0 : index
    %c0_55 = arith.constant 0 : index
    %142 = vector.load %arg9[%c0_54, %c0_55] : memref<32x64xf32, #tpu.memory_space<vmem>>, vector<32x64xf32>
    %cst_56 = arith.constant dense<0.000000e+00> : vector<40x64xf32>
    %143 = tpu.matmul %141, %142, %cst_56 {dimension_numbers = #tpu.dot_dimension_numbers<[1], [0], [0], [1], [0, 0, 1, 1], [], []>} : vector<40x32xf32>, vector<32x64xf32>, vector<40x64xf32> -> vector<40x64xf32>
    %c0_57 = arith.constant 0 : index
    %c0_58 = arith.constant 0 : index
    %144 = vector.load %arg10[%c0_57, %c0_58] : memref<1x64xf32, #tpu.memory_space<vmem>>, vector<1x64xf32>
    %145 = vector.broadcast %144 : vector<1x64xf32> to vector<40x64xf32>
    %146 = arith.addf %143, %145 : vector<40x64xf32>
    %cst_59 = arith.constant 0.000000e+00 : f32
    %147 = vector.broadcast %cst_59 : f32 to vector<40x64xf32>
    %148 = arith.maximumf %146, %147 : vector<40x64xf32>
    %c0_60 = arith.constant 0 : index
    %c0_61 = arith.constant 0 : index
    %149 = vector.load %arg11[%c0_60, %c0_61] : memref<64x32xf32, #tpu.memory_space<vmem>>, vector<64x32xf32>
    %cst_62 = arith.constant dense<0.000000e+00> : vector<40x32xf32>
    %150 = tpu.matmul %148, %149, %cst_62 {dimension_numbers = #tpu.dot_dimension_numbers<[1], [0], [0], [1], [0, 0, 1, 1], [], []>} : vector<40x64xf32>, vector<64x32xf32>, vector<40x32xf32> -> vector<40x32xf32>
    %c0_63 = arith.constant 0 : index
    %c0_64 = arith.constant 0 : index
    %151 = vector.load %arg12[%c0_63, %c0_64] : memref<1x32xf32, #tpu.memory_space<vmem>>, vector<1x32xf32>
    %152 = vector.broadcast %151 : vector<1x32xf32> to vector<40x32xf32>
    %153 = arith.addf %150, %152 : vector<40x32xf32>
    %154 = arith.addf %117, %153 : vector<40x32xf32>
    %155 = vector.shape_cast %154 : vector<40x32xf32> to vector<4x10x32xf32>
    %c0_65 = arith.constant 0 : index
    %c0_66 = arith.constant 0 : index
    %c0_67 = arith.constant 0 : index
    %156 = vector.load %arg15[%c0_65, %c0_66, %c0_67] : memref<4x10x32xf32, #tpu.memory_space<vmem>>, vector<4x10x32xf32>
    tpu.vector_store %arg15[%c0_65, %c0_66, %c0_67], %155 {strides = array<i32>} : memref<4x10x32xf32, #tpu.memory_space<vmem>>, vector<4x10x32xf32>,
    return
  }
  func.func @transform_0(%arg0: i32) -> (i32, i32, i32) {
    %c0_i32 = arith.constant 0 : i32
    %c0_i32_0 = arith.constant 0 : i32
    %c0_i32_1 = arith.constant 0 : i32
    return %arg0, %c0_i32, %c0_i32_0 : i32, i32, i32
  }
  func.func @transform_1(%arg0: i32) -> (i32, i32, i32) {
    %c0_i32 = arith.constant 0 : i32
    %c0_i32_0 = arith.constant 0 : i32
    %c0_i32_1 = arith.constant 0 : i32
    return %arg0, %c0_i32, %c0_i32_0 : i32, i32, i32
  }
  func.func @transform_2(%arg0: i32) -> (i32, i32) {
    %c0_i32 = arith.constant 0 : i32
    %c0_i32_0 = arith.constant 0 : i32
    %c0_i32_1 = arith.constant 0 : i32
    return %c0_i32, %c0_i32_0 : i32, i32
  }
  func.func @transform_3(%arg0: i32) -> (i32, i32) {
    %c0_i32 = arith.constant 0 : i32
    %c0_i32_0 = arith.constant 0 : i32
    %c0_i32_1 = arith.constant 0 : i32
    return %c0_i32, %c0_i32_0 : i32, i32
  }
  func.func @transform_4(%arg0: i32) -> (i32, i32) {
    %c0_i32 = arith.constant 0 : i32
    %c0_i32_0 = arith.constant 0 : i32
    %c0_i32_1 = arith.constant 0 : i32
    return %c0_i32, %c0_i32_0 : i32, i32
  }
  func.func @transform_5(%arg0: i32) -> (i32, i32) {
    %c0_i32 = arith.constant 0 : i32
    %c0_i32_0 = arith.constant 0 : i32
    %c0_i32_1 = arith.constant 0 : i32
    return %c0_i32, %c0_i32_0 : i32, i32
  }
  func.func @transform_6(%arg0: i32) -> (i32, i32) {
    %c0_i32 = arith.constant 0 : i32
    %c0_i32_0 = arith.constant 0 : i32
    %c0_i32_1 = arith.constant 0 : i32
    return %c0_i32, %c0_i32_0 : i32, i32
  }
  func.func @transform_7(%arg0: i32) -> (i32, i32) {
    %c0_i32 = arith.constant 0 : i32
    %c0_i32_0 = arith.constant 0 : i32
    %c0_i32_1 = arith.constant 0 : i32
    return %c0_i32, %c0_i32_0 : i32, i32
  }
  func.func @transform_8(%arg0: i32) -> (i32, i32) {
    %c0_i32 = arith.constant 0 : i32
    %c0_i32_0 = arith.constant 0 : i32
    %c0_i32_1 = arith.constant 0 : i32
    return %c0_i32, %c0_i32_0 : i32, i32
  }
  func.func @transform_9(%arg0: i32) -> (i32, i32) {
    %c0_i32 = arith.constant 0 : i32
    %c0_i32_0 = arith.constant 0 : i32
    %c0_i32_1 = arith.constant 0 : i32
    return %c0_i32, %c0_i32_0 : i32, i32
  }
  func.func @transform_10(%arg0: i32) -> (i32, i32) {
    %c0_i32 = arith.constant 0 : i32
    %c0_i32_0 = arith.constant 0 : i32
    %c0_i32_1 = arith.constant 0 : i32
    return %c0_i32, %c0_i32_0 : i32, i32
  }
  func.func @transform_11(%arg0: i32) -> (i32, i32) {
    %c0_i32 = arith.constant 0 : i32
    %c0_i32_0 = arith.constant 0 : i32
    %c0_i32_1 = arith.constant 0 : i32
    return %c0_i32, %c0_i32_0 : i32, i32
  }
  func.func @transform_12(%arg0: i32) -> (i32, i32) {
    %c0_i32 = arith.constant 0 : i32
    %c0_i32_0 = arith.constant 0 : i32
    %c0_i32_1 = arith.constant 0 : i32
    return %c0_i32, %c0_i32_0 : i32, i32
  }
  func.func @transform_13(%arg0: i32) -> (i32, i32) {
    %c0_i32 = arith.constant 0 : i32
    %c0_i32_0 = arith.constant 0 : i32
    %c0_i32_1 = arith.constant 0 : i32
    return %c0_i32, %c0_i32_0 : i32, i32
  }
  func.func @transform_14(%arg0: i32) -> (i32, i32, i32) {
    %c0_i32 = arith.constant 0 : i32
    %c0_i32_0 = arith.constant 0 : i32
    %c0_i32_1 = arith.constant 0 : i32
    return %arg0, %c0_i32, %c0_i32_0 : i32, i32, i32
  }
}

</mosaic_0001>

<bundles_post_ra>
// kernel: tpu_custom_call.1
= control target key start
LH: loop header
LB: loop body
LE: loop exit
PB: predicated region body
PF: predicated region fallthrough
CT: control target
= control target key end

     0   :  { %s8525_s29 = smov 0   ;;  %s10338_s0 = inlined_call_operand.vmem [shape: f32[8,10,32], index: 0, kind: input, shape index: {}]   ;;  %s10339_s1 = inlined_call_operand.vmem [shape: f32[8,10,10], index: 1, kind: input, shape index: {}]   ;;  %s10340_s2 = inlined_call_operand.vmem [shape: f32[32,96], index: 2, kind: input, shape index: {}]   ;;  %s10341_s3 = inlined_call_operand.vmem [shape: f32[1,96], index: 3, kind: input, shape index: {}]   ;;  %s10342_s4 = inlined_call_operand.vmem [shape: f32[32,32], index: 4, kind: input, shape index: {}]   ;;  %s10343_s5 = inlined_call_operand.vmem [shape: f32[1,32], index: 5, kind: input, shape index: {}]   ;;  %s10344_s6 = inlined_call_operand.vmem [shape: f32[1,32], index: 6, kind: input, shape index: {}]   ;;  %s10345_s7 = inlined_call_operand.vmem [shape: f32[1,32], index: 7, kind: input, shape index: {}]   ;;  %s10346_s8 = inlined_call_operand.vmem [shape: f32[32,64], index: 8, kind: input, shape index: {}]   ;;  %s10347_s9 = inlined_call_operand.vmem [shape: f32[1,64], index: 9, kind: input, shape index: {}]   ;;  %s10348_s10 = inlined_call_operand.vmem [shape: f32[64,32], index: 10, kind: input, shape index: {}]   ;;  %s10349_s11 = inlined_call_operand.vmem [shape: f32[1,32], index: 11, kind: input, shape index: {}]   ;;  %s10350_s12 = inlined_call_operand.vmem [shape: f32[1,32], index: 12, kind: input, shape index: {}]   ;;  %s10351_s13 = inlined_call_operand.vmem [shape: f32[1,32], index: 13, kind: input, shape index: {}]   ;;  %s10352_s14 = inlined_call_operand.vmem [shape: f32[8,10,32], index: 14, kind: output, shape index: {}]  }
   0x1 LB: > { %s7195_s30 = sadd.s32 4294967295, %s8425_s29   ;;  %p7199_p0 = scmp.ge.s32.totalorder %s8425_s29, 1  ;;  %s8425_s29 = sphi %s8525_s29, %s24_s29  }
   0x2   : > { %p426_p1 = scmp.lt.s32.totalorder %s8425_s29, 3 }
   0x4   : > { %p427_p2 = pnand %p7199_p0, %p426_p1 }
   0x6   : > { %430 = sbr.rel (%p427_p2) target bundleno = 4414 (0x113e), region = 76 }
   0xd   : > { %s7200_s15 = sshll.u32 %s7195_s30, 2  ;;  %v521_v0 = vlaneseq  ;;  %v8427_v1 = vmov 1983009808   ;;  %vm741_vm0 = vcmask 261120   ;;  %vm8433_vm1 = vmmov 0   ;;  %s8435_s21 = smov 96  }
   0xe   : > { %p481_p3 = scmp.lt.s32.totalorder %s7200_s15, 7  ;;  %v519_v2 = vunpack.c.l.s4 %v8427_v1  ;;  %vm1838_vm2 = vcmask 64512   ;;  %s8436_s22 = smov 64   ;;  %vm2436_vm4 = vcmask 1041408   ;;  %vm8437_vm5 = vmmov 1  }
   0xf   : > { %v8533_v3 = vshrl.u32 %v521_v0, 7  ;;  %v8428_v0 = vmov 269488144   ;;  %vm9054_vm3 = vmpackc.low %vm1838_vm2, %vm1838_vm2  ;;  %vm2339_vm9 = vcmask 74752   ;;  %vm2335_vm10 = vcmask 80896   ;;  %s8438_s26 = smov 88  }
  0x10   : > { %s10450_s15 = smov (!%p481_p3, %s7200_s15), 7  ;;  %v520_v4 = vunpack.c.0.s8 %v519_v2  ;;  %v769_v1 = vunpack.c.l.s4 %v8428_v0  ;;  %v8429_v2 = vmov 842150450   ;;  %vm9081_vm6 = vmpackc.low %vm2436_vm4, %vm8437_vm5  ;;  %s8439_s27 = smov 120   ;;  %vm5327_vm5 = vcmask 195584  }
  0x11   : > { %s8535_s16 = sshll.u32 %s10450_s15, 4  ;;  %s8440_s28 = smov 56  }
  0x12   : > { %v8538_v5 = vsub.s32 %v520_v4, %v8533_v3  ;;  %s8544_s19 = scalar_lea.vmem %s10338_s0, %s8535_s16  ;;  %v776_v4 = vunpack.c.l.s4 %v8429_v2  ;;  %s492_s25 = scalar_lea.vmem %s10339_s1, %s8535_s16 }
  0x13   : > { %v501_v6 = vld [vmem:[%s8544_s19] sm:$0xff]  ;;  %v503_v7 = vld [vmem:[%s8544_s19 + $0x10] sm:$0xff]  ;;  %v8553_v12 = vld.sshfl [vmem:[%s8544_s19 + $0x8] sm:$0x3 pattern:$0x76325410] }
  0x14   : > { %v517_v8 = vcombine.high %v501_v6, %v501_v6  ;;  %v8549_v9 = vrot.slane %v501_v6, %v8538_v5  ;;  %v505_v10 = vld [vmem:[%s8544_s19 + $0x20] sm:$0xff]  ;;  %v541_v11 = vcombine.high %v503_v7, %v503_v7  ;;  %v8556_v13 = vrot.slane %v503_v7, %v8538_v5  ;;  %v507_v14 = vld [vmem:[%s8544_s19 + $0x30] sm:$0xff]  ;;  %v8563_v17 = vld.sshfl [vmem:[%s8544_s19 + $0x28] sm:$0x3 pattern:$0x76325410] }
  0x15   : > { %v565_v15 = vcombine.high %v505_v10, %v505_v10  ;;  %v8560_v16 = vrot.slane %v505_v10, %v8538_v5  ;;  %v8566_v18 = vrot.slane %v507_v14, %v8538_v5  ;;  %v589_v19 = vcombine.high %v507_v14, %v507_v14  ;;  %v8583_v24 = vld.sshfl [vmem:[%s8544_s19 + $0x18] sm:$0x3 pattern:$0x76325410]  ;;  %s8441_s30 = smov 80   ;;  %s8442_s15 = smov 112  }
  0x16   : > { %10387 = vst [vmem:[#allocation2_spill] sm:$0xff] %v8549_v9  ;;  %10388 = vst [vmem:[#allocation3_spill] sm:$0xff] %v8556_v13  ;;  %v8569_v20 = vrot.slane %v517_v8, %v8538_v5  ;;  %v8573_v21 = vcombine.high %v8549_v9, %v8549_v9  ;;  %v8576_v22 = vrot.slane %v541_v11, %v8538_v5  ;;  %v8635_v47 = vld.sshfl [vmem:[%s8544_s19 + $0x38] sm:$0x3 pattern:$0x76325410]  ;;  %v770_v11 = vunpack.c.0.s8 %v769_v1 }
  0x17   : > { %10389 = vst [vmem:[#allocation4_spill] sm:$0xff] %v8560_v16  ;;  %10390 = vst [vmem:[#allocation5_spill] sm:$0xff] %v8566_v18  ;;  %v8580_v23 = vcombine.high %v8556_v13, %v8556_v13  ;;  %v8587_v25 = vcombine.high %v8560_v16, %v8560_v16  ;;  %v668_v26 = vcombine.low %v8553_v12, %v8556_v13  ;;  %v8430_v6 = vmov 1414812756   ;;  %s8443_s17 = smov 48   ;;  %s8444_s18 = smov 72  }
  0x18   : > { %10391 = vst [vmem:[#allocation6_spill] sm:$0xff] %v8569_v20  ;;  %10392 = vst [vmem:[#allocation7_spill] sm:$0xff] %v8573_v21  ;;  %v8592_v27 = vrot.slane %v565_v15, %v8538_v5  ;;  %v703_v28 = vcombine.low %v8563_v17, %v8566_v18  ;;  %v8598_v29 = vcombine.high %v8569_v20, %v8569_v20  ;;  %v783_v7 = vunpack.c.l.s4 %v8430_v6  ;;  %s8445_s20 = smov 104   ;;  %s8448_s23 = smov 8  }
  0x19   : > { %10393 = vst [vmem:[#allocation8_spill] sm:$0xff] %v8576_v22  ;;  %10394 = vst [vmem:[#allocation9_spill] sm:$0xff] %v8580_v23  ;;  %v651_v30 = vcombine.low %v8549_v9, %v8573_v21  ;;  %v8604_v31 = vcombine.high %v8576_v22, %v8576_v22  ;;  %v669_v32 = vcombine.low %v8580_v23, %v8576_v22  ;;  %v8431_v8 = vmov 1987475062  }
  0x1a   : > { %10395 = vst [vmem:[#allocation10_spill] sm:$0xff] %v8587_v25  ;;  %10396 = vst [vmem:[#allocation11_spill] sm:$0xff] %v8592_v27  ;;  %v686_v33 = vcombine.low %v8560_v16, %v8587_v25  ;;  %v676_v34 = vrot.slane %v668_v26, %v8538_v5  ;;  %v8613_v35 = vcombine.high %v8592_v27, %v8592_v27  ;;  %v790_v10 = vunpack.c.l.s4 %v8431_v8 }
  0x1b   : > { %10397 = vst [vmem:[#allocation12_spill] sm:$0xff] %v8598_v29  ;;  %10398 = vst [vmem:[#allocation13_spill] sm:$0xff] %v8604_v31  ;;  %v717_v36 = vrot.slane %v703_v28, %v8538_v5  ;;  %v652_v37 = vcombine.low %v8569_v20, %v8598_v29  ;;  %v659_v38 = vrot.slane %v651_v30, %v8538_v5  ;;  %v777_v14 = vunpack.c.0.s8 %v776_v4 }
  0x1c   : > { %10399 = vst [vmem:[#allocation14_spill] sm:$0xff] %v8613_v35  ;;  %v685_v39 = vcombine.low %v8604_v31, %v8583_v24  ;;  %v683_v40 = vrot.slane %v669_v32, %v8538_v5  ;;  %v700_v41 = vrot.slane %v686_v33, %v8538_v5  ;;  %v702_v42 = vcombine.low %v8592_v27, %v8613_v35 }
  0x1d   : > { %v8626_v43 = vrot.slane %v589_v19, %v8538_v5  ;;  %v8630_v44 = vcombine.high %v8566_v18, %v8566_v18  ;;  %v666_v45 = vrot.slane %v652_v37, %v8538_v5  ;;  %v784_v15 = vunpack.c.0.s8 %v783_v7 }
  0x1e   : > { %v693_v46 = vrot.slane %v685_v39, %v8538_v5  ;;  %v710_v48 = vrot.slane %v702_v42, %v8538_v5  ;;  %v684_v53 = vcombine.low %v676_v34, %v683_v40  ;;  %v791_v19 = vunpack.c.0.s8 %v790_v10 }
  0x1f   : > { %10400 = vst [vmem:[#allocation15_spill] sm:$0xff] %v8626_v43  ;;  %10401 = vst [vmem:[#allocation16_spill] sm:$0xff] %v8630_v44  ;;  %v8640_v49 = vcombine.high %v8626_v43, %v8626_v43  ;;  %v719_v50 = vcombine.low %v8630_v44, %v8626_v43  ;;  %v667_v51 = vcombine.low %v659_v38, %v666_v45 }
  0x20   : > { %v701_v52 = vcombine.low %v693_v46, %v700_v41  ;;  %v718_v54 = vcombine.low %v710_v48, %v717_v36  ;;  %v745_v60 = vsel %vm741_vm0, %v684_v53, 0.0  ;;  %v8654_v26 = vsub.s32 %v770_v11, %v8533_v3 }
  0x21   : > { %10402 = vst [vmem:[#allocation17_spill] sm:$0xff] %v8640_v49  ;;  %v720_v55 = vcombine.low %v8640_v49, %v8635_v47  ;;  %v727_v56 = vrot.slane %v719_v50, %v8538_v5  ;;  %v742_v57 = vsel %vm741_vm0, %v667_v51, 0.0  ;;  %v8657_v28 = vsub.s32 %v777_v14, %v8533_v3 }
  0x22   : > { %v748_v58 = vsel %vm741_vm0, %v701_v52, 0.0  ;;  %743 = vadd.xlane.f32.xlu0 %v742_v57  ;;  %v751_v61 = vsel %vm741_vm0, %v718_v54, 0.0  ;;  %10403 = vst [vmem:[#allocation18_spill] sm:$0xff] %v8654_v26  ;;  %v8660_v30 = vsub.s32 %v784_v15, %v8533_v3  ;;  %v8663_v32 = vsub.s32 %v791_v19, %v8533_v3 }
  0x23   : > { %749 = vadd.xlane.f32.xlu1 %v748_v58  ;;  %v734_v59 = vrot.slane %v720_v55, %v8538_v5  ;;  %10404 = vst [vmem:[#allocation19_spill] sm:$0xff] %v8657_v28 }
  0x24   : > { %10405 = vst [vmem:[#allocation20_spill] sm:$0xff] %v8660_v30  ;;  %10406 = vst [vmem:[#allocation21_spill] sm:$0xff] %v8663_v32 }
  0x25   : > { %v735_v62 = vcombine.low %v727_v56, %v734_v59 }
  0x26   : > { %746 = vadd.xlane.f32.xlu0 %v745_v60 }
  0x27   : > { %752 = vadd.xlane.f32.xlu1 %v751_v61  ;;  %v754_v63 = vsel %vm741_vm0, %v735_v62, 0.0 }
  0x2a   : > { %755 = vadd.xlane.f32.xlu0 %v754_v63 }
  0xaf   : > { %v744_v33 = vpop.xlane.xlu0 %743 }
  0xb0   : > { %v750_v34 = vpop.xlane.xlu1 %749  ;;  %v758_v36 = vmul.f32 0.03125, %v744_v33 }
  0xb1   : > { %v760_v37 = vmul.f32 0.03125, %v750_v34 }
  0xb2   : > { %v774_v38 = vrot.slane %v758_v36, %v8654_v26  ;;  %v781_v39 = vrot.slane %v758_v36, %v8657_v28  ;;  %v788_v40 = vrot.slane %v758_v36, %v8660_v30  ;;  %v795_v41 = vrot.slane %v758_v36, %v8663_v32 }
  0xb3   : > { %v830_v42 = vrot.slane %v760_v37, %v8654_v26  ;;  %v837_v45 = vrot.slane %v760_v37, %v8657_v28  ;;  %v844_v46 = vrot.slane %v760_v37, %v8660_v30  ;;  %v851_v3 = vrot.slane %v760_v37, %v8663_v32  ;;  %v747_v48 = vpop.xlane.xlu0 %746 }
  0xb4   : > { %v753_v50 = vpop.xlane.xlu1 %752  ;;  %v759_v51 = vmul.f32 0.03125, %v747_v48  ;;  %v8674_v53 = vsub.f32 %v8549_v9, %v774_v38  ;;  %v8677_v54 = vsub.f32 %v8573_v21, %v781_v39  ;;  %v8680_v55 = vsub.f32 %v8569_v20, %v788_v40 }
  0xb5   : > { %v761_v52 = vmul.f32 0.03125, %v753_v50  ;;  %v8683_v56 = vsub.f32 %v8598_v29, %v795_v41  ;;  %v8686_v57 = vsub.f32 %v8604_v31, %v830_v42  ;;  %v8689_v58 = vsub.f32 %v8583_v24, %v837_v45 }
  0xb6   : > { %v802_v59 = vrot.slane %v759_v51, %v8654_v26  ;;  %v809_v60 = vrot.slane %v759_v51, %v8657_v28  ;;  %v816_v61 = vrot.slane %v759_v51, %v8660_v30  ;;  %v823_v62 = vrot.slane %v759_v51, %v8663_v32 }
  0xb7   : > { %v858_v63 = vrot.slane %v761_v52, %v8654_v26  ;;  %v865_v0 = vrot.slane %v761_v52, %v8657_v28  ;;  %v872_v1 = vrot.slane %v761_v52, %v8660_v30  ;;  %v879_v2 = vrot.slane %v761_v52, %v8663_v32  ;;  %v756_v4 = vpop.xlane.xlu0 %755 }
  0xb8   : > { %v762_v6 = vmul.f32 0.03125, %v756_v4  ;;  %v948_v24 = vmul.f32 %v8674_v53, %v8674_v53  ;;  %v949_v7 = vmul.f32 %v8677_v54, %v8677_v54  ;;  %v950_v8 = vmul.f32 %v8680_v55, %v8680_v55 }
  0xb9   : > { %v951_v10 = vmul.f32 %v8683_v56, %v8683_v56  ;;  %v8708_v11 = vsub.f32 %v8560_v16, %v844_v46  ;;  %v8711_v14 = vsub.f32 %v8587_v25, %v851_v3  ;;  %v956_v15 = vmul.f32 %v8686_v57, %v8686_v57 }
  0xba   : > { %v886_v19 = vrot.slane %v762_v6, %v8654_v26  ;;  %v893_v33 = vrot.slane %v762_v6, %v8657_v28  ;;  %v900_v34 = vrot.slane %v762_v6, %v8660_v30  ;;  %v907_v36 = vrot.slane %v762_v6, %v8663_v32 }
  0xbb   : > { %v988_v37 = vcombine.low %v948_v24, %v949_v7  ;;  %v989_v38 = vcombine.low %v950_v8, %v951_v10  ;;  %v957_v39 = vmul.f32 %v8689_v58, %v8689_v58  ;;  %v958_v40 = vmul.f32 %v8708_v11, %v8708_v11 }
  0xbc   : > { %v959_v41 = vmul.f32 %v8711_v14, %v8711_v14  ;;  %v8726_v42 = vsub.f32 %v8553_v12, %v802_v59  ;;  %v8729_v45 = vsub.f32 %v8556_v13, %v809_v60  ;;  %v8732_v46 = vsub.f32 %v8580_v23, %v816_v61 }
  0xbd   : > { %v996_v3 = vrot.slane %v988_v37, %v8538_v5  ;;  %v1003_v48 = vrot.slane %v989_v38, %v8538_v5  ;;  %v1022_v50 = vcombine.low %v956_v15, %v957_v39  ;;  %v8737_v51 = vsub.f32 %v8576_v22, %v823_v62 }
  0xbe   : > { %v1023_v52 = vcombine.low %v958_v40, %v959_v41  ;;  %v952_v4 = vmul.f32 %v8726_v42, %v8726_v42  ;;  %v953_v12 = vmul.f32 %v8729_v45, %v8729_v45  ;;  %v954_v59 = vmul.f32 %v8732_v46, %v8732_v46 }
  0xbf   : > { %v1004_v60 = vcombine.low %v996_v3, %v1003_v48  ;;  %v1030_v61 = vrot.slane %v1022_v50, %v8538_v5  ;;  %v955_v6 = vmul.f32 %v8737_v51, %v8737_v51  ;;  %v8749_v24 = vsub.f32 %v8592_v27, %v858_v63 }
  0xc0   : > { %v1037_v62 = vrot.slane %v1023_v52, %v8538_v5  ;;  %v1005_v7 = vcombine.low %v952_v4, %v953_v12  ;;  %v8753_v8 = vsub.f32 %v8613_v35, %v865_v0  ;;  %v8756_v10 = vsub.f32 %v8563_v17, %v872_v1 }
  0xc1   : > { %v1078_v15 = vsel %vm741_vm0, %v1004_v60, 0.0  ;;  %v1006_v37 = vcombine.low %v954_v59, %v955_v6  ;;  %v8760_v38 = vsub.f32 %v8566_v18, %v879_v2  ;;  %v960_v39 = vmul.f32 %v8749_v24, %v8749_v24 }
  0xc2   : > { %1079 = vadd.xlane.f32.xlu1 %v1078_v15  ;;  %v1038_v63 = vcombine.low %v1030_v61, %v1037_v62  ;;  %v1013_v40 = vrot.slane %v1005_v7, %v8538_v5  ;;  %v961_v0 = vmul.f32 %v8753_v8, %v8753_v8  ;;  %v962_v17 = vmul.f32 %v8756_v10, %v8756_v10 }
  0xc3   : > { %v1020_v1 = vrot.slane %v1006_v37, %v8538_v5  ;;  %v963_v41 = vmul.f32 %v8760_v38, %v8760_v38  ;;  %v8773_v2 = vsub.f32 %v8630_v44, %v886_v19  ;;  %v8776_v3 = vsub.f32 %v8626_v43, %v893_v33 }
  0xc4   : > { %v1084_v48 = vsel %vm741_vm0, %v1038_v63, 0.0  ;;  %v1039_v50 = vcombine.low %v960_v39, %v961_v0  ;;  %v8780_v52 = vsub.f32 %v8640_v49, %v900_v34  ;;  %v8783_v4 = vsub.f32 %v8635_v47, %v907_v36  ;;  %v1385_v0 = vld [vmem:[%s10340_s2] sm:$0xff] }
  0xc5   : > { %v1021_v12 = vcombine.low %v1013_v40, %v1020_v1  ;;  %v1040_v59 = vcombine.low %v962_v17, %v963_v41  ;;  %v964_v60 = vmul.f32 %v8773_v2, %v8773_v2  ;;  %v965_v19 = vmul.f32 %v8776_v3, %v8776_v3  ;;  %v1386_v17 = vld [vmem:[%s10340_s2 + $0x8] sm:$0xff]  ;;  %v1387_v1 = vld [vmem:[%s10340_s2 + $0x10] sm:$0xff] }
  0xc6   : > { %1085 = vadd.xlane.f32.xlu1 %v1084_v48  ;;  %v1047_v33 = vrot.slane %v1039_v50, %v8538_v5  ;;  %v966_v61 = vmul.f32 %v8780_v52, %v8780_v52  ;;  %v967_v34 = vmul.f32 %v8783_v4, %v8783_v4  ;;  %v10353_v41 = vmov 0.0|0.0   ;;  %v1388_v50 = vld [vmem:[%s10340_s2 + $0x18] sm:$0xff] }
  0xc7   : > { %v1081_v47 = vsel %vm741_vm0, %v1021_v12, 0.0  ;;  %v1054_v36 = vrot.slane %v1040_v59, %v8538_v5  ;;  %v1056_v6 = vcombine.low %v964_v60, %v965_v19  ;;  %7850 = vmatprep.subr.bf16.mxu0 %v10353_v41  ;;  %v7851_v48 = vpack.c.bf16 %v1386_v17, %v1385_v0 }
  0xc8   : > { %1082 = vadd.xlane.f32.xlu0 %v1081_v47  ;;  %v1057_v62 = vcombine.low %v966_v61, %v967_v34  ;;  %v10355_v12 = vmov 0.0   ;;  %v7854_v59 = vpack.c.bf16 %v1388_v50, %v1387_v1 }
  0xc9   : > { %v1055_v7 = vcombine.low %v1047_v33, %v1054_v36  ;;  %v1064_v15 = vrot.slane %v1056_v6, %v8538_v5  ;;  %7534 = vmatprep.mubr.msk.f32.mxu0 %vm8433_vm1, %v10355_v12  ;;  %7852 = vmatpush3.bf16.msra.mxu0 %v7851_v48  ;;  %v7213_v36 = vld [vmem:[%s10344_s6] ss:$0 sm:$0xff] }
  0xca   : > { %v1071_v37 = vrot.slane %v1057_v62, %v8538_v5  ;;  %7853 = vmatprep.subr.bf16.mxu0 %v10353_v41 }
  0xcb   : > { %v1087_v39 = vsel %vm741_vm0, %v1055_v7, 0.0  ;;  %v7214_v7 = vld [vmem:[%s10345_s7] ss:$0 sm:$0xff] }
  0xcc   : > { %1088 = vadd.xlane.f32.xlu0 %v1087_v39  ;;  %v1072_v63 = vcombine.low %v1064_v15, %v1071_v37  ;;  %v1298_v37 = vcombine.high %v7213_v36, %v7213_v36  ;;  %v1344_v0 = vcombine.high %v7214_v7, %v7214_v7  ;;  %v8829_v48 = vrot.slane %v7214_v7, %v8538_v5 }
  0xcd   : > { %7855 = vmatpush3.bf16.msra.mxu0 %v7854_v59 }
  0xce   : > { %v1090_v40 = vsel %vm741_vm0, %v1072_v63, 0.0  ;;  %v8826_v1 = vrot.slane %v1298_v37, %v8538_v5  ;;  %v8848_v7 = vcombine.high %v8829_v48, %v8829_v48 }
  0xcf   : > { %1091 = vadd.xlane.f32.xlu1 %v1090_v40  ;;  %v8823_v40 = vrot.slane %v7213_v36, %v8538_v5 }
 0x14f   : > { %v1080_v60 = vpop.xlane.xlu1 %1079 }
 0x150   : > { %v1093_v19 = vmul.f32 0.03125, %v1080_v60 }
 0x152   : > { %v1098_v33 = vadd.f32 1e-05, %v1093_v19  ;;  %v8833_v19 = vcombine.high %v8823_v40, %v8823_v40 }
 0x153   : > { %v1086_v61 = vpop.xlane.xlu1 %1085 }
 0x154   : > { %8267 = vrsqrt.f32 %v1098_v33  ;;  %v1095_v34 = vmul.f32 0.03125, %v1086_v61  ;;  %v8836_v33 = vrot.slane %v1344_v0, %v8538_v5 }
 0x155   : > { %v1083_v47 = vpop.xlane.xlu0 %1082 }
 0x156   : > { %v1100_v6 = vadd.f32 1e-05, %v1095_v34  ;;  %v1094_v62 = vmul.f32 0.03125, %v1083_v47 }
 0x158   : > { %8269 = vrsqrt.f32 %v1100_v6  ;;  %v1099_v15 = vadd.f32 1e-05, %v1094_v62  ;;  %v8844_v62 = vcombine.high %v8826_v1, %v8826_v1 }
 0x159   : > { %v1089_v39 = vpop.xlane.xlu0 %1088 }
 0x15a   : > { %8271 = vrsqrt.f32 %v1099_v15  ;;  %v1096_v63 = vmul.f32 0.03125, %v1089_v39 }
 0x15c   : > { %v1092_v17 = vpop.xlane.xlu1 %1091  ;;  %v1101_v59 = vadd.f32 1e-05, %v1096_v63 }
 0x15d   : > { %v1097_v50 = vmul.f32 0.03125, %v1092_v17  ;;  %v8856_v17 = vcombine.high %v8836_v33, %v8836_v33 }
 0x15e   : > { %v8268_v60 = vpop.eup %8267  ;;  %8273 = vrsqrt.f32 %v1101_v59 }
 0x15f   : > { %v1102_v61 = vadd.f32 1e-05, %v1097_v50  ;;  %v1119_v34 = vrot.slane %v8268_v60, %v8654_v26  ;;  %v1126_v47 = vrot.slane %v8268_v60, %v8657_v28  ;;  %v1133_v36 = vrot.slane %v8268_v60, %v8660_v30 }
 0x160   : > { %v1140_v6 = vrot.slane %v8268_v60, %v8663_v32 }
 0x161   : > { %v1273_v15 = vmul.f32 %v1119_v34, %v8674_v53  ;;  %v1274_v37 = vmul.f32 %v1126_v47, %v8677_v54  ;;  %v1275_v39 = vmul.f32 %v1133_v36, %v8680_v55  ;;  %8275 = vrsqrt.f32 %v1102_v61 }
 0x162   : > { %v8270_v63 = vpop.eup %8269  ;;  %v1276_v0 = vmul.f32 %v1140_v6, %v8683_v56 }
 0x163   : > { %v1319_v50 = vmul.f32 %v8823_v40, %v1273_v15  ;;  %v1320_v60 = vmul.f32 %v8833_v19, %v1274_v37  ;;  %v1321_v59 = vmul.f32 %v8826_v1, %v1275_v39  ;;  %v1175_v53 = vrot.slane %v8270_v63, %v8654_v26 }
 0x164   : > { %v8272_v34 = vpop.eup %8271  ;;  %v1322_v54 = vmul.f32 %v8844_v62, %v1276_v0  ;;  %v1182_v55 = vrot.slane %v8270_v63, %v8657_v28  ;;  %v1189_v61 = vrot.slane %v8270_v63, %v8660_v30  ;;  %v1196_v56 = vrot.slane %v8270_v63, %v8663_v32 }
 0x165   : > { %v1365_v47 = vadd.f32 %v8829_v48, %v1319_v50  ;;  %v1366_v36 = vadd.f32 %v8848_v7, %v1320_v60  ;;  %v1367_v6 = vadd.f32 %v8836_v33, %v1321_v59  ;;  %v1147_v15 = vrot.slane %v8272_v34, %v8654_v26 }
 0x166   : > { %v1368_v37 = vadd.f32 %v8856_v17, %v1322_v54  ;;  %v1154_v39 = vrot.slane %v8272_v34, %v8657_v28  ;;  %v1161_v0 = vrot.slane %v8272_v34, %v8660_v30  ;;  %v1168_v41 = vrot.slane %v8272_v34, %v8663_v32 }
 0x167   : > { %v1416_v12 = vcombine.low %v1365_v47, %v1366_v36  ;;  %v1277_v49 = vmul.f32 %v1147_v15, %v8726_v42  ;;  %v1281_v63 = vmul.f32 %v1175_v53, %v8686_v57  ;;  %v1282_v50 = vmul.f32 %v1182_v55, %v8689_v58 }
 0x168   : > { %v1417_v60 = vcombine.low %v1367_v6, %v1368_v37  ;;  %v1278_v59 = vmul.f32 %v1154_v39, %v8729_v45  ;;  %v1279_v43 = vmul.f32 %v1161_v0, %v8732_v46  ;;  %v1280_v54 = vmul.f32 %v1168_v41, %v8737_v51  ;;  %v8274_v53 = vpop.eup %8273 }
 0x169   : > { %v1424_v44 = vrot.slane %v1416_v12, %v8538_v5  ;;  %v1323_v18 = vmul.f32 %v8823_v40, %v1277_v49  ;;  %v1283_v34 = vmul.f32 %v1189_v61, %v8708_v11  ;;  %v1284_v47 = vmul.f32 %v1196_v56, %v8711_v14 }
 0x16a   : > { %v1431_v42 = vrot.slane %v1417_v60, %v8538_v5  ;;  %v1324_v57 = vmul.f32 %v8833_v19, %v1278_v59  ;;  %v1325_v58 = vmul.f32 %v8826_v1, %v1279_v43  ;;  %v1326_v45 = vmul.f32 %v8844_v62, %v1280_v54 }
 0x16b   : > { %v1369_v46 = vadd.f32 %v8829_v48, %v1323_v18  ;;  %v1327_v51 = vmul.f32 %v8823_v40, %v1281_v63  ;;  %v1328_v41 = vmul.f32 %v8833_v19, %v1282_v50  ;;  %v1329_v49 = vmul.f32 %v8826_v1, %v1283_v34  ;;  %v8276_v11 = vpop.eup %8275 }
 0x16c   : > { %v1432_v12 = vcombine.low %v1424_v44, %v1431_v42  ;;  %v1370_v14 = vadd.f32 %v8848_v7, %v1324_v57  ;;  %v1371_v55 = vadd.f32 %v8836_v33, %v1325_v58  ;;  %v1372_v61 = vadd.f32 %v8856_v17, %v1326_v45 }
 0x16d   : > { %v1330_v43 = vmul.f32 %v8844_v62, %v1284_v47  ;;  %v1373_v56 = vadd.f32 %v8829_v48, %v1327_v51  ;;  %v1374_v18 = vadd.f32 %v8848_v7, %v1328_v41  ;;  %v1375_v36 = vadd.f32 %v8836_v33, %v1329_v49 }
 0x16e   : > { %7535 = vmatmul.mubr.msk.f32.vlgmr.msra.gmra.mrb[0].mxu0 %vm741_vm0, %v1432_v12  ;;  %v1433_v6 = vcombine.low %v1369_v46, %v1370_v14  ;;  %v1434_v15 = vcombine.low %v1371_v55, %v1372_v61  ;;  %v1203_v44 = vrot.slane %v8274_v53, %v8654_v26  ;;  %v1210_v37 = vrot.slane %v8274_v53, %v8657_v28 }
 0x16f   : > { %v10407_v39 = vmov 0.0   ;;  %v1376_v0 = vadd.f32 %v8856_v17, %v1330_v43  ;;  %v1450_v63 = vcombine.low %v1373_v56, %v1374_v18  ;;  %v1217_v50 = vrot.slane %v8274_v53, %v8660_v30 }
 0x170   : > { %7537 = vmatprep.mubr.msk.f32.mxu0 %vm8433_vm1, %v10407_v39  ;;  %v1224_v60 = vrot.slane %v8274_v53, %v8663_v32  ;;  %v1441_v59 = vrot.slane %v1433_v6, %v8538_v5  ;;  %v1448_v54 = vrot.slane %v1434_v15, %v8538_v5  ;;  %v1285_v34 = vmul.f32 %v1203_v44, %v8749_v24 }
 0x171   : > { %v1286_v47 = vmul.f32 %v1210_v37, %v8753_v8  ;;  %v1451_v42 = vcombine.low %v1375_v36, %v1376_v0  ;;  %v1458_v57 = vrot.slane %v1450_v63, %v8538_v5  ;;  %v1287_v58 = vmul.f32 %v1217_v50, %v8756_v10 }
 0x172   : > { %v1288_v45 = vmul.f32 %v1224_v60, %v8760_v38  ;;  %v1449_v46 = vcombine.low %v1441_v59, %v1448_v54  ;;  %v1331_v51 = vmul.f32 %v8823_v40, %v1285_v34  ;;  %v1231_v41 = vrot.slane %v8276_v11, %v8654_v26 }
 0x173   : > { %v1332_v53 = vmul.f32 %v8833_v19, %v1286_v47  ;;  %v1465_v49 = vrot.slane %v1451_v42, %v8538_v5  ;;  %v1333_v24 = vmul.f32 %v8826_v1, %v1287_v58  ;;  %v1238_v12 = vrot.slane %v8276_v11, %v8657_v28 }
 0x174   : > { %v1334_v8 = vmul.f32 %v8844_v62, %v1288_v45  ;;  %7538 = vmatmul.mubr.msk.f32.gmra.mrb[2].mxu0 %vm741_vm0, %v1449_v46  ;;  %v1377_v10 = vadd.f32 %v8829_v48, %v1331_v51  ;;  %v1245_v14 = vrot.slane %v8276_v11, %v8660_v30  ;;  %v1252_v55 = vrot.slane %v8276_v11, %v8663_v32 }
 0x175   : > { %v1378_v38 = vadd.f32 %v8848_v7, %v1332_v53  ;;  %7540 = vmatprep.mubr.msk.f32.mxu0 %vm8433_vm1, %v10407_v39  ;;  %v1466_v61 = vcombine.low %v1458_v57, %v1465_v49  ;;  %v1379_v43 = vadd.f32 %v8836_v33, %v1333_v24  ;;  %v1289_v18 = vmul.f32 %v1231_v41, %v8773_v2 }
 0x176   : > { %v1380_v56 = vadd.f32 %v8856_v17, %v1334_v8  ;;  %v1290_v6 = vmul.f32 %v1238_v12, %v8776_v3  ;;  %v1291_v15 = vmul.f32 %v1245_v14, %v8780_v52  ;;  %v1292_v44 = vmul.f32 %v1252_v55, %v8783_v4 }
 0x177   : > { %v1467_v36 = vcombine.low %v1377_v10, %v1378_v38  ;;  %v1335_v11 = vmul.f32 %v8823_v40, %v1289_v18 }
 0x178   : > { %v1468_v37 = vcombine.low %v1379_v43, %v1380_v56  ;;  %7541 = vmatmul.mubr.msk.f32.gmra.mrb[4].mxu0 %vm741_vm0, %v1466_v61  ;;  %v1336_v63 = vmul.f32 %v8833_v19, %v1290_v6  ;;  %v1337_v50 = vmul.f32 %v8826_v1, %v1291_v15  ;;  %v1338_v2 = vmul.f32 %v8844_v62, %v1292_v44 }
 0x179   : > { %v1475_v0 = vrot.slane %v1467_v36, %v8538_v5  ;;  %7543 = vmatprep.mubr.msk.f32.mxu0 %vm8433_vm1, %v10407_v39  ;;  %v1381_v52 = vadd.f32 %v8829_v48, %v1335_v11  ;;  %v8956_v48 = vld [vmem:[%s10341_s3] ss:$0 sm:$0xff] }
 0x17a   : > { %v1482_v3 = vrot.slane %v1468_v37, %v8538_v5  ;;  %v1382_v4 = vadd.f32 %v8848_v7, %v1336_v63  ;;  %v1383_v40 = vadd.f32 %v8836_v33, %v1337_v50  ;;  %v1384_v60 = vadd.f32 %v8856_v17, %v1338_v2 }
 0x17c   : > { %v1483_v59 = vcombine.low %v1475_v0, %v1482_v3  ;;  %v1484_v54 = vcombine.low %v1381_v52, %v1382_v4  ;;  %v1485_v19 = vcombine.low %v1383_v40, %v1384_v60 }
 0x17e   : > { %7544 = vmatmul.mubr.msk.f32.gmra.mrb[6].mxu0 %vm741_vm0, %v1483_v59  ;;  %v1492_v1 = vrot.slane %v1484_v54, %v8538_v5  ;;  %v1499_v62 = vrot.slane %v1485_v19, %v8538_v5 }
 0x17f   : > { %7546 = vmatprep.mubr.msk.f32.mxu0 %vm8433_vm1, %v10407_v39 }
 0x180   : > { %v1500_v34 = vcombine.low %v1492_v1, %v1499_v62 }
 0x182   : > { %7547 = vmatmul.mubr.msk.f32.gmra.mrb[8].mxu0 %vm741_vm0, %v1500_v34 }
 0x241   : > { %v1577_v33 = vpop.f32.mrb[0].mxu0 }
 0x242   : > { %v1578_v7 = vadd.f32 %v8956_v48, %v1577_v33  ;;  %v7536_v17 = vpop.f32.mrb[1].mxu0 }
 0x244   : > { %v1601_v47 = vmul.f32 0.35355338, %v1578_v7  ;;  %v1701_v42 = vcombine.high %v1578_v7, %v1578_v7  ;;  %v1708_v57 = vrot.slane %v1578_v7, %v8538_v5 }
 0x246   : > { %v1611_v58 = vcombine.high %v1601_v47, %v1601_v47  ;;  %v1618_v45 = vrot.slane %v1601_v47, %v8538_v5  ;;  %v1715_v46 = vrot.slane %v1701_v42, %v8538_v5  ;;  %v1716_v51 = vcombine.high %v1708_v57, %v1708_v57 }
 0x247   : > { %v1582_v53 = vpop.f32.mrb[2].mxu0 }
 0x248   : > { %v1625_v41 = vrot.slane %v1611_v58, %v8538_v5  ;;  %v1717_v49 = vcombine.high %v1715_v46, %v1715_v46  ;;  %v1810_v24 = vcombine.low %v1708_v57, %v1716_v51  ;;  %v7539_v8 = vpop.f32.mrb[3].mxu0  ;;  %v1583_v12 = vadd.f32 %v8956_v48, %v1582_v53 }
 0x249   : > { %v1626_v10 = vcombine.high %v1618_v45, %v1618_v45 }
 0x24a   : > { %v1627_v38 = vcombine.high %v1625_v41, %v1625_v41  ;;  %v1811_v14 = vcombine.low %v1715_v46, %v1717_v49  ;;  %v1602_v55 = vmul.f32 0.35355338, %v1583_v12  ;;  %v1718_v61 = vcombine.high %v1583_v12, %v1583_v12 }
 0x24b   : > { %v1725_v43 = vrot.slane %v1583_v12, %v8538_v5  ;;  %v1587_v56 = vpop.f32.mrb[4].mxu0  ;;  %v1818_v18 = vrot.slane %v1810_v24, %v8538_v5  ;;  %v1786_v63 = vcombine.low %v1618_v45, %v1626_v10 }
 0x24c   : > { %v1825_v36 = vrot.slane %v1811_v14, %v8538_v5  ;;  %v1588_v6 = vadd.f32 %v8956_v48, %v1587_v56  ;;  %v7542_v15 = vpop.f32.mrb[5].mxu0  ;;  %v1628_v44 = vcombine.high %v1602_v55, %v1602_v55  ;;  %v8969_v37 = vrot.slane %v1602_v55, %v8538_v5 }
 0x24d   : > { %v1732_v11 = vrot.slane %v1718_v61, %v8538_v5  ;;  %v1733_v0 = vcombine.high %v1725_v43, %v1725_v43  ;;  %v1787_v50 = vcombine.low %v1625_v41, %v1627_v38  ;;  %v1833_v34 = vrot.slane %v1725_v43, %v8538_v5 }
 0x24e   : > { %v1603_v2 = vmul.f32 0.35355338, %v1588_v6  ;;  %v1735_v3 = vcombine.high %v1588_v6, %v1588_v6  ;;  %v1826_v52 = vcombine.low %v1818_v18, %v1825_v36  ;;  %v1642_v4 = vrot.slane %v1628_v44, %v8538_v5 }
 0x24f   : > { %v1643_v40 = vcombine.high %v8969_v37, %v8969_v37  ;;  %v1946_v60 = vcombine.low %v1733_v0, %v1732_v11  ;;  %v1734_v19 = vcombine.high %v1732_v11, %v1732_v11  ;;  %v1742_v1 = vrot.slane %v1588_v6, %v8538_v5 }
 0x250   : > { %v1645_v59 = vcombine.high %v1603_v2, %v1603_v2  ;;  %v8976_v54 = vrot.slane %v1603_v2, %v8538_v5  ;;  %v1644_v33 = vcombine.high %v1642_v4, %v1642_v4  ;;  %v1749_v7 = vrot.slane %v1735_v3, %v8538_v5 }
 0x251   : > { %v1592_v62 = vpop.f32.mrb[6].mxu0  ;;  %v1947_v42 = vcombine.low %v1734_v19, %v1742_v1  ;;  %v1794_v57 = vrot.slane %v1786_v63, %v8538_v5  ;;  %v8987_v51 = vpack.i.bf16 %v1833_v34, %v1826_v52  ;;  %v1922_v53 = vcombine.low %v1643_v40, %v1642_v4 }
 0x252   : > { %v7545_v17 = vpop.f32.mrb[7].mxu0  ;;  %v1659_v47 = vrot.slane %v1645_v59, %v8538_v5  ;;  %v1751_v58 = vcombine.high %v1749_v7, %v1749_v7  ;;  %v8984_v45 = vcombine.low %v1644_v33, %v8976_v54  ;;  %v1593_v46 = vadd.f32 %v8956_v48, %v1592_v62 }
 0x253   : > { %v1954_v41 = vrot.slane %v1946_v60, %v8538_v5  ;;  %v1961_v49 = vrot.slane %v1947_v42, %v8538_v5  ;;  %v1801_v24 = vrot.slane %v1787_v50, %v8538_v5  ;;  %v1750_v8 = vcombine.high %v1742_v1, %v1742_v1  ;;  %8104 = vrot.lane.b32.xlu0 %v8987_v51, %s8435_s21 }
 0x254   : > { %v1604_v12 = vmul.f32 0.35355338, %v1593_v46  ;;  %v1752_v10 = vcombine.high %v1593_v46, %v1593_v46  ;;  %v1759_v38 = vrot.slane %v1593_v46, %v8538_v5  ;;  %v1661_v55 = vcombine.high %v1659_v47, %v1659_v47 }
 0x255   : > { %v1597_v14 = vpop.f32.mrb[8].mxu0  ;;  %v1962_v61 = vcombine.low %v1954_v41, %v1961_v49  ;;  %v8996_v18 = vcombine.low %v1794_v57, %v1801_v24  ;;  %v2081_v36 = vcombine.low %v1749_v7, %v1751_v58  ;;  %v1969_v2 = vrot.slane %v1750_v8, %v8538_v5 }
 0x256   : > { %v1598_v43 = vadd.f32 %v8956_v48, %v1597_v14  ;;  %v7548_v56 = vpop.f32.mrb[9].mxu0  ;;  %v1662_v6 = vcombine.high %v1604_v12, %v1604_v12  ;;  %v1669_v15 = vrot.slane %v1604_v12, %v8538_v5  ;;  %v1766_v44 = vrot.slane %v1752_v10, %v8538_v5 }
 0x257   : > { %v1767_v11 = vcombine.high %v1759_v38, %v1759_v38  ;;  %7553 = vmatprep.mubr.msk.f32.mxu0 %vm1838_vm2, %v8996_v18  ;;  %v2057_v19 = vcombine.low %v1659_v47, %v1661_v55  ;;  %v2089_v1 = vrot.slane %v2081_v36, %v8538_v5  ;;  %8124 = vrot.lane.b32.xlu0 %v8987_v51, %s8436_s22 }
 0x258   : > { %v1605_v0 = vmul.f32 0.35355338, %v1598_v43  ;;  %v1769_v63 = vcombine.high %v1598_v43, %v1598_v43  ;;  %v1776_v50 = vrot.slane %v1598_v43, %v8538_v5  ;;  %v9005_v48 = vrot.slane %v1662_v6, %v8538_v5 }
 0x259   : > { %v1677_v3 = vcombine.high %v1669_v15, %v1669_v15  ;;  %v1768_v52 = vcombine.high %v1766_v44, %v1766_v44  ;;  %v2082_v4 = vcombine.low %v1759_v38, %v1767_v11  ;;  %v2104_v47 = vrot.slane %v1766_v44, %v8538_v5 }
 0x25a   : > { %v1679_v40 = vcombine.high %v1605_v0, %v1605_v0  ;;  %v1686_v60 = vrot.slane %v1605_v0, %v8538_v5  ;;  %v1783_v59 = vrot.slane %v1769_v63, %v8538_v5  ;;  %v1678_v62 = vcombine.high %v9005_v48, %v9005_v48 }
 0x25b   : > { %v1784_v34 = vcombine.high %v1776_v50, %v1776_v50  ;;  %v2096_v33 = vrot.slane %v2082_v4, %v8538_v5  ;;  %v2216_v58 = vcombine.low %v1768_v52, %v1776_v50  ;;  %v2058_v41 = vcombine.low %v1669_v15, %v1677_v3 }
 0x25c   : > { %v9014_v7 = vrot.slane %v1679_v40, %v8538_v5  ;;  %v1694_v17 = vcombine.high %v1686_v60, %v1686_v60  ;;  %v1785_v42 = vcombine.high %v1783_v59, %v1783_v59  ;;  %v2192_v57 = vcombine.low %v1678_v62, %v1686_v60 }
 0x25d   : > { %v2217_v46 = vcombine.low %v1784_v34, %v1783_v59  ;;  %v2097_v49 = vcombine.low %v2089_v1, %v2096_v33  ;;  %v2224_v8 = vrot.slane %v2216_v58, %v8538_v5  ;;  %v9021_v10 = vpack.i.bf16 %v1969_v2, %v1962_v61 }
 0x25e   : > { %v2193_v24 = vcombine.low %v1694_v17, %v9014_v7  ;;  %v1930_v38 = vrot.slane %v1922_v53, %v8538_v5  ;;  %v1937_v14 = vrot.slane %v8984_v45, %v8538_v5  ;;  %v2239_v56 = vrot.slane %v1785_v42, %v8538_v5 }
 0x25f   : > { %v2231_v12 = vrot.slane %v2217_v46, %v8538_v5  ;;  %v9026_v55 = vpack.i.bf16 %v2104_v47, %v2097_v49  ;;  %8109 = vrot.lane.b32.xlu1 %v9021_v10, %s8435_s21  ;;  %v2200_v36 = vrot.slane %v2192_v57, %v8538_v5  ;;  %v2065_v61 = vrot.slane %v2057_v19, %v8538_v5 }
 0x260   : > { %v2207_v6 = vrot.slane %v2193_v24, %v8538_v5  ;;  %v9033_v15 = vcombine.low %v1930_v38, %v1937_v14  ;;  %v2072_v53 = vrot.slane %v2058_v41, %v8538_v5  ;;  %v9064_v52 = vrot.slane %v8969_v37, %v8538_v5 }
 0x261   : > { %v2232_v43 = vcombine.low %v2224_v8, %v2231_v12  ;;  %v1660_v37 = vcombine.high %v8976_v54, %v8976_v54  ;;  %v1695_v8 = vcombine.high %v9014_v7, %v9014_v7 }
 0x262   : > { %v9039_v45 = vcombine.low %v2200_v36, %v2207_v6  ;;  %7560 = vmatprep.mubr.msk.f32.mxu1 %vm1838_vm2, %v9033_v15  ;;  %v9043_v11 = vcombine.low %v2065_v61, %v2072_v53  ;;  %v9101_v36 = vrot.slane %v9005_v48, %v8538_v5 }
 0x263   : > { %v9037_v44 = vpack.i.bf16 %v2239_v56, %v2232_v43  ;;  %8114 = vrot.lane.b32.xlu1 %v9026_v55, %s8435_s21  ;;  %v9079_v49 = vrot.slane %v1660_v37, %v8538_v5  ;;  %v9104_v53 = vrot.slane %v1695_v8, %v8538_v5 }
 0x267   : > { %8119 = vrot.lane.b32.xlu1 %v9037_v44, %s8435_s21  ;;  %s8446_s21 = smov 40  }
 0x26b   : > { %8129 = vrot.lane.b32.xlu1 %v9026_v55, %s8436_s22 }
 0x26f   : > { %8134 = vrot.lane.b32.xlu1 %v9021_v10, %s8436_s22 }
 0x273   : > { %8139 = vrot.lane.b32.xlu1 %v9037_v44, %s8436_s22  ;;  %s8447_s22 = smov 16  }
 0x2c5   : > { %v8105_v0 = vpop.permute.xlu0 %8104 }
 0x2c6   : > { %v8107_v63 = vunpack.i.h.bf16 %v8105_v0  ;;  %v8106_v50 = vunpack.i.l.bf16 %v8105_v0 }
 0x2c8   : > { %v7856_v3 = vpack.c.bf16 %v8107_v63, %v8106_v50  ;;  %v9130_v50 = vld [vmem:[%s492_s25 + $0x8] sm:$0x3] }
 0x2c9   : > { %v8125_v34 = vpop.permute.xlu0 %8124  ;;  %vm642_vm7 = vcmp.ne.f32.partialorder %v9130_v50, 0.0 }
 0x2ca   : > { %7858 = vmatprep.subr.msk.bf16.mxu0 %vm9054_vm3, %v7856_v3  ;;  %v8127_v42 = vunpack.i.h.bf16 %v8125_v34  ;;  %v8126_v57 = vunpack.i.l.bf16 %v8125_v34  ;;  %v9144_v34 = vld [vmem:[%s492_s25 + $0x10] sm:$0xff] }
 0x2cb   : > { %7861 = vmatpush3.bf16.xpose.msk.msra.mxu0 %vm9054_vm3, %v7856_v3  ;;  %v9132_v3 = vld [vmem:[%s492_s25] sm:$0xff]  ;;  %vm643_vm12 = vcmp.ne.f32.partialorder %v9144_v34, 0.0 }
 0x2cc   : > { %v7880_v54 = vpack.c.bf16 %v8127_v42, %v8126_v57  ;;  %vm641_vm8 = vcmp.ne.f32.partialorder %v9132_v3, 0.0 }
 0x2d1   : > { %v8110_v4 = vpop.permute.xlu1 %8109 }
 0x2d2   : > { %v8112_v40 = vunpack.i.h.bf16 %v8110_v4  ;;  %v8111_v60 = vunpack.i.l.bf16 %v8110_v4  ;;  %7554 = vmatmul.mubr.msk.f32.vlgmr.msra.gmra.mrb[10].mxu0 %vm1838_vm2, %v9064_v52 }
 0x2d3   : > { %7574 = vmatprep.mubr.msk.f32.mxu0 %vm1838_vm2, %v9039_v45 }
 0x2d4   : > { %v7862_v59 = vpack.c.bf16 %v8112_v40, %v8111_v60 }
 0x2d5   : > { %v8115_v19 = vpop.permute.xlu1 %8114 }
 0x2d6   : > { %7864 = vmatprep.subr.msk.bf16.mxu1 %vm9054_vm3, %v7862_v59  ;;  %v8117_v1 = vunpack.i.h.bf16 %v8115_v19  ;;  %v8116_v62 = vunpack.i.l.bf16 %v8115_v19 }
 0x2d7   : > { %7867 = vmatpush3.bf16.xpose.msk.msra.mxu1 %vm9054_vm3, %v7862_v59 }
 0x2d8   : > { %v7868_v33 = vpack.c.bf16 %v8117_v1, %v8116_v62  ;;  %v9142_v62 = vld [vmem:[%s492_s25 + $0x18] sm:$0x3] }
 0x2d9   : > { %v8120_v17 = vpop.permute.xlu1 %8119  ;;  %vm644_vm11 = vcmp.ne.f32.partialorder %v9142_v62, 0.0 }
 0x2da   : > { %v8122_v58 = vunpack.i.h.bf16 %v8120_v17  ;;  %v8121_v46 = vunpack.i.l.bf16 %v8120_v17  ;;  %7870 = vmatprep.subr.msk.bf16.mxu1 %vm9054_vm3, %v7868_v33 }
 0x2dc   : > { %v7874_v41 = vpack.c.bf16 %v8122_v58, %v8121_v46  ;;  %v9153_v58 = vld [vmem:[%s492_s25 + $0x28] sm:$0x3]  ;;  %v9155_v46 = vld [vmem:[%s492_s25 + $0x20] sm:$0xff] }
 0x2dd   : > { %v8130_v47 = vpop.permute.xlu1 %8129  ;;  %vm646_vm13 = vcmp.ne.f32.partialorder %v9153_v58, 0.0  ;;  %vm645_vm14 = vcmp.ne.f32.partialorder %v9155_v46, 0.0 }
 0x2de   : > { %7561 = vmatmul.mubr.msk.f32.vlgmr.msra.gmra.mrb[0].mxu1 %vm1838_vm2, %v9079_v49  ;;  %7876 = vmatprep.subr.msk.bf16.mxu0 %vm9054_vm3, %v7874_v41  ;;  %v8132_v38 = vunpack.i.h.bf16 %v8130_v47  ;;  %v8131_v14 = vunpack.i.l.bf16 %v8130_v47 }
 0x2df   : > { %7873 = vmatpush3.bf16.xpose.msk.msra.mxu1 %vm9054_vm3, %v7868_v33  ;;  %7567 = vmatprep.mubr.msk.f32.mxu1 %vm1838_vm2, %v9043_v11 }
 0x2e0   : > { %7882 = vmatprep.subr.msk.bf16.mxu1 %vm9081_vm6, %v7880_v54  ;;  %7879 = vmatpush3.bf16.xpose.msk.msra.mxu0 %vm9054_vm3, %v7874_v41  ;;  %v9106_v0 = vpack.c.bf16 %v8132_v38, %v8131_v14  ;;  %v9157_v41 = vld [vmem:[%s492_s25 + $0x38] sm:$0x3] }
 0x2e1   : > { %v8135_v12 = vpop.permute.xlu1 %8134  ;;  %vm648_vm15 = vcmp.ne.f32.partialorder %v9157_v41, 0.0 }
 0x2e2   : > { %v8137_v43 = vunpack.i.h.bf16 %v8135_v12  ;;  %v8136_v56 = vunpack.i.l.bf16 %v8135_v12 }
 0x2e4   : > { %v7886_v6 = vpack.c.bf16 %v8137_v43, %v8136_v56 }
 0x2e5   : > { %v8140_v61 = vpop.permute.xlu1 %8139 }
 0x2e6   : > { %7568 = vmatmul.mubr.msk.f32.vlgmr.msra.gmra.mrb[2].mxu1 %vm1838_vm2, %v9101_v36  ;;  %v8142_v7 = vunpack.i.h.bf16 %v8140_v61  ;;  %v8141_v63 = vunpack.i.l.bf16 %v8140_v61  ;;  %7888 = vmatprep.subr.msk.bf16.mxu0 %vm9081_vm6, %v7886_v6 }
 0x2e7   : > { %7885 = vmatpush3.bf16.msk.msra.mxu1 %vm9081_vm6, %v7880_v54  ;;  %7575 = vmatmul.mubr.msk.f32.vlgmr.msra.gmra.mrb[12].mxu0 %vm1838_vm2, %v9104_v53  ;;  %v9161_v54 = vld [vmem:[%s492_s25 + $0x30] sm:$0xff] }
 0x2e8   : > { %v9116_v48 = vpack.c.bf16 %v8142_v7, %v8141_v63  ;;  %7894 = vmatprep.subr.msk.bf16.mxu1 %vm9081_vm6, %v9106_v0  ;;  %7891 = vmatpush3.bf16.msk.msra.mxu0 %vm9081_vm6, %v7886_v6  ;;  %vm647_vm4 = vcmp.ne.f32.partialorder %v9161_v54, 0.0 }
 0x2ea   : > { %7900 = vmatprep.subr.msk.bf16.mxu0 %vm9081_vm6, %v9116_v48 }
 0x3a5   : > { %v7555_v4 = vpop.f32.mrb[10].mxu0 }
 0x3a6   : > { %v2328_v40 = vsel %vm642_vm7, -1e+30, %v7555_v4  ;;  %v1913_v60 = vpop.f32.mrb[11].mxu0 }
 0x3a7   : > { %v2327_v59 = vsel %vm641_vm8, -1e+30, %v1913_v60  ;;  %v2340_v19 = vsel %vm2339_vm9, %v2328_v40, -inf }
 0x3a8   : > { %2341 = vmax.xlane.f32.xlu1 %v2340_v19  ;;  %v2336_v1 = vsel %vm2335_vm10, %v2327_v59, -inf }
 0x3a9   : > { %2337 = vmax.xlane.f32.xlu0 %v2336_v1 }
 0x3b1   : > { %v7562_v37 = vpop.f32.mrb[0].mxu1 }
 0x3b2   : > { %v2330_v33 = vsel %vm644_vm11, -1e+30, %v7562_v37  ;;  %v2048_v17 = vpop.f32.mrb[1].mxu1 }
 0x3b3   : > { %v2346_v42 = vsel %vm2339_vm9, %v2330_v33, -inf  ;;  %v2329_v57 = vsel %vm643_vm12, -1e+30, %v2048_v17 }
 0x3b4   : > { %2347 = vmax.xlane.f32.xlu0 %v2346_v42  ;;  %v2343_v47 = vsel %vm2335_vm10, %v2329_v57, -inf }
 0x3b8   : > { %2344 = vmax.xlane.f32.xlu0 %v2343_v47 }
 0x3b9   : > { %v7569_v8 = vpop.f32.mrb[2].mxu1 }
 0x3ba   : > { %v2332_v12 = vsel %vm646_vm13, -1e+30, %v7569_v8  ;;  %v2183_v38 = vpop.f32.mrb[3].mxu1  ;;  %v7576_v14 = vpop.f32.mrb[12].mxu0 }
 0x3bb   : > { %v2331_v43 = vsel %vm645_vm14, -1e+30, %v2183_v38  ;;  %v2352_v56 = vsel %vm2339_vm9, %v2332_v12, -inf  ;;  %v2318_v6 = vpop.f32.mrb[13].mxu0  ;;  %v2334_v61 = vsel %vm648_vm15, -1e+30, %v7576_v14 }
 0x3bc   : > { %2353 = vmax.xlane.f32.xlu1 %v2352_v56  ;;  %v2349_v7 = vsel %vm2335_vm10, %v2331_v43, -inf  ;;  %v2333_v63 = vsel %vm647_vm4, -1e+30, %v2318_v6  ;;  %v2358_v4 = vsel %vm2339_vm9, %v2334_v61, -inf }
 0x3bd   : > { %2350 = vmax.xlane.f32.xlu0 %v2349_v7  ;;  %v2355_v60 = vsel %vm2335_vm10, %v2333_v63, -inf }
 0x3c0   : > { %2359 = vmax.xlane.f32.xlu1 %v2358_v4 }
 0x3c1   : > { %2356 = vmax.xlane.f32.xlu0 %v2355_v60 }
 0x3d1   : > { %8149 = vrot.lane.b32.xlu1 %v9021_v10, %s8438_s26 }
 0x3d7   : > { %8144 = vrot.lane.b32.xlu0 %v8987_v51, %s8438_s26 }
 0x435   : > { %v2342_v19 = vpop.xlane.xlu1 %2341 }
 0x436   : > { %v2362_v1 = vsub.f32 %v2328_v40, %v2342_v19  ;;  %v2338_v37 = vpop.xlane.xlu0 %2337 }
 0x437   : > { %v2361_v17 = vsub.f32 %v2327_v59, %v2338_v37 }
 0x438   : > { %v2371_v42 = vmul.f32 1.442695, %v2362_v1 }
 0x439   : > { %v2369_v47 = vmul.f32 1.442695, %v2361_v17 }
 0x43a   : > { %8277 = vpow2.f32 %v2371_v42 }
 0x43b   : > { %8279 = vpow2.f32 %v2369_v47 }
 0x441   : > { %v2348_v40 = vpop.xlane.xlu0 %2347 }
 0x442   : > { %v2364_v7 = vsub.f32 %v2330_v33, %v2348_v40 }
 0x444   : > { %v9182_v8 = vpop.eup %8277  ;;  %v2375_v19 = vmul.f32 1.442695, %v2364_v7 }
 0x445   : > { %v9184_v38 = vpop.eup %8279  ;;  %v2388_v14 = vsel %vm2339_vm9, %v9182_v8, 0.0  ;;  %v2345_v59 = vpop.xlane.xlu0 %2344 }
 0x446   : > { %2389 = vadd.xlane.f32.xlu1 %v2388_v14  ;;  %v2385_v56 = vsel %vm2335_vm10, %v9184_v38, 0.0  ;;  %v2363_v60 = vsub.f32 %v2329_v57, %v2345_v59  ;;  %8281 = vpow2.f32 %v2375_v19 }
 0x447   : > { %2386 = vadd.xlane.f32.xlu0 %v2385_v56 }
 0x448   : > { %v2373_v37 = vmul.f32 1.442695, %v2363_v60 }
 0x449   : > { %v2354_v6 = vpop.xlane.xlu1 %2353 }
 0x44a   : > { %v2351_v4 = vpop.xlane.xlu0 %2350  ;;  %v2366_v1 = vsub.f32 %v2332_v12, %v2354_v6  ;;  %8283 = vpow2.f32 %v2373_v37 }
 0x44b   : > { %v2365_v17 = vsub.f32 %v2331_v43, %v2351_v4 }
 0x44c   : > { %v2379_v14 = vmul.f32 1.442695, %v2366_v1 }
 0x44d   : > { %v2360_v42 = vpop.xlane.xlu1 %2359  ;;  %v2377_v32 = vmul.f32 1.442695, %v2365_v17 }
 0x44e   : > { %v2357_v47 = vpop.xlane.xlu0 %2356  ;;  %v2368_v56 = vsub.f32 %v2334_v61, %v2360_v42  ;;  %8285 = vpow2.f32 %v2379_v14 }
 0x44f   : > { %v2367_v30 = vsub.f32 %v2333_v63, %v2357_v47  ;;  %8287 = vpow2.f32 %v2377_v32 }
 0x450   : > { %v2383_v28 = vmul.f32 1.442695, %v2368_v56  ;;  %v9194_v33 = vpop.eup %8281 }
 0x451   : > { %v2381_v26 = vmul.f32 1.442695, %v2367_v30  ;;  %v2394_v12 = vsel %vm2339_vm9, %v9194_v33, 0.0  ;;  %v8150_v6 = vpop.permute.xlu1 %8149 }
 0x452   : > { %8289 = vpow2.f32 %v2383_v28  ;;  %v8145_v7 = vpop.permute.xlu0 %8144 }
 0x453   : > { %8291 = vpow2.f32 %v2381_v26  ;;  %v8147_v37 = vunpack.i.h.bf16 %v8145_v7  ;;  %v8146_v17 = vunpack.i.l.bf16 %v8145_v7 }
 0x454   : > { %v9196_v57 = vpop.eup %8283 }
 0x455   : > { %v2391_v61 = vsel %vm2335_vm10, %v9196_v57, 0.0  ;;  %v7904_v14 = vpack.c.bf16 %v8147_v37, %v8146_v17 }
 0x457   : > { %8154 = vrot.lane.b32.xlu1 %v9026_v55, %s8438_s26 }
 0x458   : > { %v9200_v43 = vpop.eup %8285 }
 0x459   : > { %v9204_v63 = vpop.eup %8287  ;;  %v2400_v28 = vsel %vm2339_vm9, %v9200_v43, 0.0 }
 0x45a   : > { %v2397_v30 = vsel %vm2335_vm10, %v9204_v63, 0.0 }
 0x45c   : > { %v9208_v26 = vpop.eup %8289 }
 0x45d   : > { %2778 = vrot.lane.b32.xlu0 %v8996_v18, %s8439_s27  ;;  %v9212_v32 = vpop.eup %8291  ;;  %v2406_v40 = vsel %vm2339_vm9, %v9208_v26, 0.0 }
 0x45e   : > { %v2403_v59 = vsel %vm2335_vm10, %v9212_v32, 0.0 }
 0x47b   : > { %2395 = vadd.xlane.f32.xlu1 %v2394_v12 }
 0x47c   : > { %2392 = vadd.xlane.f32.xlu0 %v2391_v61 }
 0x47f   : > { %2401 = vadd.xlane.f32.xlu1 %v2400_v28 }
 0x480   : > { %2398 = vadd.xlane.f32.xlu0 %v2397_v30 }
 0x483   : > { %2407 = vadd.xlane.f32.xlu1 %v2406_v40 }
 0x484   : > { %2404 = vadd.xlane.f32.xlu0 %v2403_v59 }
 0x494   : > { %2869 = vrot.lane.b32.xlu1 %v9033_v15, %s8439_s27 }
 0x498   : > { %2871 = vrot.lane.b32.xlu1 %v9079_v49, %s8439_s27 }
 0x49a   : > { %2780 = vrot.lane.b32.xlu0 %v9064_v52, %s8439_s27 }
 0x49c   : > { %2962 = vrot.lane.b32.xlu1 %v9101_v36, %s8439_s27 }
 0x49e   : > { %8159 = vrot.lane.b32.xlu0 %v9037_v44, %s8438_s26 }
 0x4a0   : > { %3053 = vrot.lane.b32.xlu1 %v9104_v53, %s8439_s27 }
 0x4a2   : > { %2960 = vrot.lane.b32.xlu0 %v9043_v11, %s8439_s27 }
 0x4a4   : > { %8169 = vrot.lane.b32.xlu1 %v9026_v55, %s8440_s28 }
 0x4a6   : > { %3051 = vrot.lane.b32.xlu0 %v9039_v45, %s8439_s27  ;;  %s10283_s27 = scalar_lea.vmem %s10352_s14, %s8535_s16 }
 0x4a8   : > { %8174 = vrot.lane.b32.xlu1 %v9021_v10, %s8440_s28 }
 0x4aa   : > { %8164 = vrot.lane.b32.xlu0 %v8987_v51, %s8440_s28 }
 0x4ac   : > { %8179 = vrot.lane.b32.xlu1 %v9037_v44, %s8440_s28  ;;  %s8449_s28 = smov 24  }
 0x4d3   : > { %v2390_v4 = vpop.xlane.xlu1 %2389 }
 0x4d4   : > { %8293 = vrcp.f32 %v2390_v4  ;;  %v2387_v60 = vpop.xlane.xlu0 %2386  ;;  %v8151_v4 = vunpack.i.l.bf16 %v8150_v6 }
 0x4d5   : > { %8295 = vrcp.f32 %v2387_v60 }
 0x4d7   : > { %v8155_v56 = vpop.permute.xlu1 %8154 }
 0x4d8   : > { %v2779_v12 = vpop.permute.xlu0 %2778 }
 0x4de   : > { %v8294_v19 = vpop.eup %8293 }
 0x4df   : > { %v8296_v1 = vpop.eup %8295  ;;  %v2418_v47 = vmul.f32 %v8294_v19, %v9182_v8 }
 0x4e0   : > { %v2417_v42 = vmul.f32 %v8296_v1, %v9184_v38 }
 0x4e2   : > { %7581 = vmatprep.mubr.msk.f32.mxu1 %vm2335_vm10, %v2417_v42 }
 0x4e3   : > { %7582 = vmatmul.mubr.msk.f32.vlgmr.msra.gmra.mrb[4].mxu1 %vm2335_vm10, %v2418_v47 }
 0x4e4   : > { %7897 = vmatpush3.bf16.msk.msra.mxu1 %vm9081_vm6, %v9106_v0  ;;  %v8152_v0 = vunpack.i.h.bf16 %v8150_v6 }
 0x4e5   : > { %7906 = vmatprep.subr.msk.bf16.mxu1 %vm9054_vm3, %v7904_v14 }
 0x4e6   : > { %v7910_v47 = vpack.c.bf16 %v8152_v0, %v8151_v4 }
 0x508   : > { %v2396_v61 = vpop.xlane.xlu1 %2395 }
 0x509   : > { %8297 = vrcp.f32 %v2396_v61  ;;  %v2393_v28 = vpop.xlane.xlu0 %2392  ;;  %v8157_v61 = vunpack.i.h.bf16 %v8155_v56 }
 0x50a   : > { %8299 = vrcp.f32 %v2393_v28  ;;  %v8156_v28 = vunpack.i.l.bf16 %v8155_v56 }
 0x50c   : > { %v2402_v38 = vpop.xlane.xlu1 %2401  ;;  %v7916_v56 = vpack.c.bf16 %v8157_v61, %v8156_v28 }
 0x50d   : > { %8301 = vrcp.f32 %v2402_v38  ;;  %v2399_v8 = vpop.xlane.xlu0 %2398 }
 0x50e   : > { %8303 = vrcp.f32 %v2399_v8 }
 0x510   : > { %v2408_v30 = vpop.xlane.xlu1 %2407 }
 0x511   : > { %8305 = vrcp.f32 %v2408_v30  ;;  %v2405_v40 = vpop.xlane.xlu0 %2404 }
 0x512   : > { %8307 = vrcp.f32 %v2405_v40 }
 0x513   : > { %v8298_v59 = vpop.eup %8297 }
 0x514   : > { %v8300_v7 = vpop.eup %8299  ;;  %v2870_v60 = vpop.permute.xlu1 %2869  ;;  %v2420_v37 = vmul.f32 %v8298_v59, %v9194_v33 }
 0x515   : > { %v2781_v19 = vpop.permute.xlu0 %2780  ;;  %v2419_v1 = vmul.f32 %v8300_v7, %v9196_v57 }
 0x517   : > { %v8302_v17 = vpop.eup %8301  ;;  %7588 = vmatprep.mubr.msk.f32.mxu0 %vm2335_vm10, %v2419_v1 }
 0x518   : > { %v8304_v42 = vpop.eup %8303  ;;  %v2872_v38 = vpop.permute.xlu1 %2871  ;;  %7589 = vmatmul.mubr.msk.f32.vlgmr.msra.gmra.mrb[14].mxu0 %vm2335_vm10, %v2420_v37  ;;  %v2422_v33 = vmul.f32 %v8302_v17, %v9200_v43 }
 0x519   : > { %7903 = vmatpush3.bf16.msk.msra.mxu0 %vm9081_vm6, %v9116_v48  ;;  %v8160_v6 = vpop.permute.xlu0 %8159  ;;  %v2421_v8 = vmul.f32 %v8304_v42, %v9204_v63 }
 0x51a   : > { %7912 = vmatprep.subr.msk.bf16.mxu0 %vm9054_vm3, %v7910_v47  ;;  %v8162_v59 = vunpack.i.h.bf16 %v8160_v6  ;;  %v8161_v7 = vunpack.i.l.bf16 %v8160_v6 }
 0x51b   : > { %v8306_v57 = vpop.eup %8305  ;;  %7595 = vmatprep.mubr.msk.f32.mxu1 %vm2335_vm10, %v2421_v8 }
 0x51c   : > { %v8308_v30 = vpop.eup %8307  ;;  %v2963_v40 = vpop.permute.xlu1 %2962  ;;  %7596 = vmatmul.mubr.msk.f32.vlgmr.msra.gmra.mrb[6].mxu1 %vm2335_vm10, %v2422_v33  ;;  %v2424_v43 = vmul.f32 %v8306_v57, %v9208_v26  ;;  %v7922_v4 = vpack.c.bf16 %v8162_v59, %v8161_v7 }
 0x51d   : > { %7909 = vmatpush3.bf16.xpose.msk.msra.mxu1 %vm9054_vm3, %v7904_v14  ;;  %7609 = vmatprep.mubr.msk.f32.mxu1 %vm1838_vm2, %v2779_v12  ;;  %v2961_v48 = vpop.permute.xlu0 %2960  ;;  %v2423_v63 = vmul.f32 %v8308_v30, %v9212_v32 }
 0x51e   : > { %7918 = vmatprep.subr.msk.bf16.mxu1 %vm9054_vm3, %v7916_v56 }
 0x51f   : > { %7602 = vmatprep.mubr.msk.f32.mxu0 %vm2335_vm10, %v2423_v63 }
 0x520   : > { %v3054_v0 = vpop.permute.xlu1 %3053  ;;  %7603 = vmatmul.mubr.msk.f32.vlgmr.msra.gmra.mrb[16].mxu0 %vm2335_vm10, %v2424_v43 }
 0x521   : > { %7616 = vmatprep.mubr.msk.f32.mxu0 %vm1838_vm2, %v2870_v60  ;;  %v3052_v1 = vpop.permute.xlu0 %3051 }
 0x522   : > { %7915 = vmatpush3.bf16.xpose.msk.msra.mxu0 %vm9054_vm3, %v7910_v47 }
 0x523   : > { %7924 = vmatprep.subr.msk.bf16.mxu0 %vm9054_vm3, %v7922_v4 }
 0x524   : > { %7610 = vmatmul.mubr.msk.f32.vlgmr.msra.gmra.mrb[8].mxu1 %vm1838_vm2, %v2781_v19  ;;  %v8170_v32 = vpop.permute.xlu1 %8169 }
 0x525   : > { %7921 = vmatpush3.bf16.xpose.msk.msra.mxu1 %vm9054_vm3, %v7916_v56  ;;  %7623 = vmatprep.mubr.msk.f32.mxu1 %vm1838_vm2, %v2961_v48  ;;  %v8165_v26 = vpop.permute.xlu0 %8164  ;;  %v8172_v37 = vunpack.i.h.bf16 %v8170_v32  ;;  %v8171_v60 = vunpack.i.l.bf16 %v8170_v32 }
 0x526   : > { %v8167_v14 = vunpack.i.h.bf16 %v8165_v26  ;;  %v8166_v12 = vunpack.i.l.bf16 %v8165_v26 }
 0x527   : > { %v9284_v28 = vpack.c.bf16 %v8172_v37, %v8171_v60 }
 0x528   : > { %v7928_v17 = vpack.c.bf16 %v8167_v14, %v8166_v12  ;;  %v8175_v42 = vpop.permute.xlu1 %8174 }
 0x529   : > { %v8177_v61 = vunpack.i.h.bf16 %v8175_v42  ;;  %v8176_v47 = vunpack.i.l.bf16 %v8175_v42  ;;  %7617 = vmatmul.mubr.msk.f32.vlgmr.msra.gmra.mrb[18].mxu0 %vm1838_vm2, %v2872_v38 }
 0x52a   : > { %7927 = vmatpush3.bf16.xpose.msk.msra.mxu0 %vm9054_vm3, %v7922_v4  ;;  %7630 = vmatprep.mubr.msk.f32.mxu0 %vm1838_vm2, %v3052_v1 }
 0x52b   : > { %v7934_v19 = vpack.c.bf16 %v8177_v61, %v8176_v47  ;;  %7930 = vmatprep.subr.msk.bf16.mxu1 %vm9081_vm6, %v7928_v17 }
 0x52c   : > { %7624 = vmatmul.mubr.msk.f32.vlgmr.msra.gmra.mrb[10].mxu1 %vm1838_vm2, %v2963_v40  ;;  %v8180_v6 = vpop.permute.xlu1 %8179 }
 0x52d   : > { %v8182_v8 = vunpack.i.h.bf16 %v8180_v6  ;;  %v8181_v33 = vunpack.i.l.bf16 %v8180_v6  ;;  %7933 = vmatpush3.bf16.msk.msra.mxu1 %vm9081_vm6, %v7928_v17  ;;  %7936 = vmatprep.subr.msk.bf16.mxu0 %vm9081_vm6, %v7934_v19 }
 0x52e   : > { %7942 = vmatprep.subr.msk.bf16.mxu1 %vm9081_vm6, %v9284_v28 }
 0x52f   : > { %v9294_v38 = vpack.c.bf16 %v8182_v8, %v8181_v33 }
 0x531   : > { %7631 = vmatmul.mubr.msk.f32.vlgmr.msra.gmra.mrb[20].mxu0 %vm1838_vm2, %v3054_v0 }
 0x532   : > { %7939 = vmatpush3.bf16.msk.msra.mxu0 %vm9081_vm6, %v7934_v19 }
 0x533   : > { %7948 = vmatprep.subr.msk.bf16.mxu0 %vm9081_vm6, %v9294_v38 }
 0x5b6   : > { %v9302_v57 = vpop.f32.mrb[4].mxu1 }
 0x5b7   : > { %v9304_v30 = vpop.f32.mrb[5].mxu1 }
 0x5eb   : > { %v9306_v56 = vpop.f32.mrb[14].mxu0 }
 0x5ec   : > { %v9308_v40 = vpop.f32.mrb[15].mxu0 }
 0x5ef   : > { %v9310_v59 = vpop.f32.mrb[6].mxu1 }
 0x5f0   : > { %v9312_v7 = vpop.f32.mrb[7].mxu1 }
 0x5f3   : > { %v9314_v48 = vpop.f32.mrb[16].mxu0 }
 0x5f4   : > { %10412 = vst [vmem:[#allocation22_spill] sm:$0xff] %v9314_v48  ;;  %v9316_v63 = vpop.f32.mrb[17].mxu0 }
 0x5f5   : > { %10413 = vst [vmem:[#allocation23_spill] sm:$0xff] %v9316_v63 }
 0x5f7   : > { %v7611_v43 = vpop.f32.mrb[8].mxu1 }
 0x5f8   : > { %v3143_v0 = vsel %vm642_vm7, -1e+30, %v7611_v43  ;;  %v2860_v4 = vpop.f32.mrb[9].mxu1 }
 0x5f9   : > { %v3142_v1 = vsel %vm641_vm8, -1e+30, %v2860_v4  ;;  %v3153_v32 = vsel %vm2339_vm9, %v3143_v0, -inf }
 0x5fa   : > { %3154 = vmax.xlane.f32.xlu1 %v3153_v32  ;;  %v3150_v26 = vsel %vm2335_vm10, %v3142_v1, -inf }
 0x5fb   : > { %3151 = vmax.xlane.f32.xlu0 %v3150_v26 }
 0x5fc   : > { %v7618_v14 = vpop.f32.mrb[18].mxu0 }
 0x5fd   : > { %v3145_v12 = vsel %vm644_vm11, -1e+30, %v7618_v14  ;;  %v2951_v37 = vpop.f32.mrb[19].mxu0 }
 0x5fe   : > { %v3159_v60 = vsel %vm2339_vm9, %v3145_v12, -inf  ;;  %v3144_v17 = vsel %vm643_vm12, -1e+30, %v2951_v37 }
 0x5ff   : > { %3160 = vmax.xlane.f32.xlu0 %v3159_v60  ;;  %v7625_v42 = vpop.f32.mrb[10].mxu1  ;;  %v3156_v6 = vsel %vm2335_vm10, %v3144_v17, -inf }
 0x600   : > { %v3147_v61 = vsel %vm646_vm13, -1e+30, %v7625_v42  ;;  %v3042_v47 = vpop.f32.mrb[11].mxu1 }
 0x601   : > { %v3165_v19 = vsel %vm2339_vm9, %v3147_v61, -inf  ;;  %v3146_v8 = vsel %vm645_vm14, -1e+30, %v3042_v47 }
 0x602   : > { %3166 = vmax.xlane.f32.xlu1 %v3165_v19  ;;  %v3162_v26 = vsel %vm2335_vm10, %v3146_v8, -inf }
 0x603   : > { %3157 = vmax.xlane.f32.xlu0 %v3156_v6 }
 0x604   : > { %v7632_v33 = vpop.f32.mrb[20].mxu0 }
 0x605   : > { %v3149_v43 = vsel %vm648_vm15, -1e+30, %v7632_v33  ;;  %v3133_v4 = vpop.f32.mrb[21].mxu0 }
 0x606   : > { %v3171_v32 = vsel %vm2339_vm9, %v3149_v43, -inf  ;;  %v3148_v14 = vsel %vm647_vm4, -1e+30, %v3133_v4 }
 0x607   : > { %3172 = vmax.xlane.f32.xlu1 %v3171_v32  ;;  %3163 = vmax.xlane.f32.xlu0 %v3162_v26  ;;  %v3168_v37 = vsel %vm2335_vm10, %v3148_v14, -inf }
 0x60b   : > { %3169 = vmax.xlane.f32.xlu0 %v3168_v37 }
 0x618   : > { %8189 = vrot.lane.b32.xlu1 %v9021_v10, %s8441_s30 }
 0x621   : > { %8184 = vrot.lane.b32.xlu0 %v8987_v51, %s8441_s30 }
 0x687   : > { %v3155_v60 = vpop.xlane.xlu1 %3154 }
 0x688   : > { %v3175_v42 = vsub.f32 %v3143_v0, %v3155_v60  ;;  %v3152_v47 = vpop.xlane.xlu0 %3151 }
 0x689   : > { %v3174_v19 = vsub.f32 %v3142_v1, %v3152_v47 }
 0x68a   : > { %v3184_v6 = vmul.f32 1.442695, %v3175_v42 }
 0x68b   : > { %v3182_v33 = vmul.f32 1.442695, %v3174_v19 }
 0x68c   : > { %8309 = vpow2.f32 %v3184_v6  ;;  %v3161_v0 = vpop.xlane.xlu0 %3160 }
 0x68d   : > { %8311 = vpow2.f32 %v3182_v33  ;;  %v3177_v42 = vsub.f32 %v3145_v12, %v3161_v0 }
 0x68f   : > { %v3167_v60 = vpop.xlane.xlu1 %3166  ;;  %v3188_v6 = vmul.f32 1.442695, %v3177_v42 }
 0x690   : > { %v3158_v1 = vpop.xlane.xlu0 %3157  ;;  %v3179_v33 = vsub.f32 %v3147_v61, %v3167_v60 }
 0x691   : > { %v3176_v19 = vsub.f32 %v3144_v17, %v3158_v1  ;;  %8313 = vpow2.f32 %v3188_v6 }
 0x694   : > { %v3164_v47 = vpop.xlane.xlu0 %3163  ;;  %v3173_v35 = vpop.xlane.xlu1 %3172 }
 0x695   : > { %v3178_v27 = vsub.f32 %v3146_v8, %v3164_v47  ;;  %v3181_v16 = vsub.f32 %v3149_v43, %v3173_v35 }
 0x696   : > { %v9346_v4 = vpop.eup %8309 }
 0x697   : > { %v9348_v32 = vpop.eup %8311  ;;  %v3201_v26 = vsel %vm2339_vm9, %v9346_v4, 0.0  ;;  %v3190_v31 = vmul.f32 1.442695, %v3178_v27  ;;  %v3196_v23 = vmul.f32 1.442695, %v3181_v16 }
 0x698   : > { %3202 = vadd.xlane.f32.xlu1 %v3201_v26  ;;  %v3198_v37 = vsel %vm2335_vm10, %v9348_v32, 0.0  ;;  %v3186_v26 = vmul.f32 1.442695, %v3176_v19  ;;  %v3170_v25 = vpop.xlane.xlu0 %3169  ;;  %v8190_v43 = vpop.permute.xlu1 %8189 }
 0x699   : > { %3199 = vadd.xlane.f32.xlu0 %v3198_v37  ;;  %v3192_v37 = vmul.f32 1.442695, %v3179_v33  ;;  %v3180_v22 = vsub.f32 %v3148_v14, %v3170_v25 }
 0x69a   : > { %8315 = vpow2.f32 %v3186_v26 }
 0x69b   : > { %8317 = vpow2.f32 %v3192_v37  ;;  %v3194_v13 = vmul.f32 1.442695, %v3180_v22  ;;  %v9358_v12 = vpop.eup %8313 }
 0x69c   : > { %8319 = vpow2.f32 %v3190_v31  ;;  %v3207_v61 = vsel %vm2339_vm9, %v9358_v12, 0.0  ;;  %v8185_v14 = vpop.permute.xlu0 %8184 }
 0x69d   : > { %8321 = vpow2.f32 %v3196_v23  ;;  %v8187_v47 = vunpack.i.h.bf16 %v8185_v14  ;;  %v8186_v19 = vunpack.i.l.bf16 %v8185_v14 }
 0x69e   : > { %8323 = vpow2.f32 %v3194_v13 }
 0x69f   : > { %v7952_v26 = vpack.c.bf16 %v8187_v47, %v8186_v19 }
 0x6a4   : > { %v9360_v17 = vpop.eup %8315 }
 0x6a5   : > { %v9364_v8 = vpop.eup %8317  ;;  %v3204_v27 = vsel %vm2335_vm10, %v9360_v17, 0.0 }
 0x6a6   : > { %v9368_v25 = vpop.eup %8319  ;;  %v3213_v16 = vsel %vm2339_vm9, %v9364_v8, 0.0 }
 0x6a7   : > { %v9372_v13 = vpop.eup %8321  ;;  %v3210_v22 = vsel %vm2335_vm10, %v9368_v25, 0.0 }
 0x6a8   : > { %v9376_v23 = vpop.eup %8323  ;;  %v3219_v31 = vsel %vm2339_vm9, %v9372_v13, 0.0 }
 0x6a9   : > { %8194 = vrot.lane.b32.xlu1 %v9026_v55, %s8441_s30  ;;  %v3216_v35 = vsel %vm2335_vm10, %v9376_v23, 0.0 }
 0x6af   : > { %3590 = vrot.lane.b32.xlu0 %v8996_v18, %s8442_s15 }
 0x6cd   : > { %3208 = vadd.xlane.f32.xlu1 %v3207_v61 }
 0x6ce   : > { %3205 = vadd.xlane.f32.xlu0 %v3204_v27 }
 0x6d1   : > { %3214 = vadd.xlane.f32.xlu1 %v3213_v16 }
 0x6d2   : > { %3211 = vadd.xlane.f32.xlu0 %v3210_v22 }
 0x6d5   : > { %3220 = vadd.xlane.f32.xlu1 %v3219_v31 }
 0x6d6   : > { %3217 = vadd.xlane.f32.xlu0 %v3216_v35 }
 0x6e6   : > { %3681 = vrot.lane.b32.xlu1 %v9033_v15, %s8442_s15 }
 0x6ea   : > { %3683 = vrot.lane.b32.xlu1 %v9079_v49, %s8442_s15 }
 0x6ec   : > { %3592 = vrot.lane.b32.xlu0 %v9064_v52, %s8442_s15 }
 0x6ee   : > { %3774 = vrot.lane.b32.xlu1 %v9101_v36, %s8442_s15 }
 0x6f0   : > { %8199 = vrot.lane.b32.xlu0 %v9037_v44, %s8441_s30 }
 0x6f2   : > { %3865 = vrot.lane.b32.xlu1 %v9104_v53, %s8442_s15 }
 0x6f4   : > { %3772 = vrot.lane.b32.xlu0 %v9043_v11, %s8442_s15 }
 0x6f6   : > { %8209 = vrot.lane.b32.xlu1 %v9026_v55, %s8443_s17 }
 0x6f8   : > { %3863 = vrot.lane.b32.xlu0 %v9039_v45, %s8442_s15 }
 0x6fa   : > { %8214 = vrot.lane.b32.xlu1 %v9021_v10, %s8443_s17 }
 0x6fc   : > { %8204 = vrot.lane.b32.xlu0 %v8987_v51, %s8443_s17 }
 0x6fe   : > { %8219 = vrot.lane.b32.xlu1 %v9037_v44, %s8443_s17 }
 0x725   : > { %v3203_v0 = vpop.xlane.xlu1 %3202 }
 0x726   : > { %8325 = vrcp.f32 %v3203_v0  ;;  %v3200_v1 = vpop.xlane.xlu0 %3199  ;;  %v8191_v0 = vunpack.i.l.bf16 %v8190_v43 }
 0x727   : > { %8327 = vrcp.f32 %v3200_v1 }
 0x729   : > { %v8195_v37 = vpop.permute.xlu1 %8194 }
 0x72a   : > { %v3591_v61 = vpop.permute.xlu0 %3590 }
 0x730   : > { %v8326_v60 = vpop.eup %8325 }
 0x731   : > { %v8328_v42 = vpop.eup %8327  ;;  %v3231_v33 = vmul.f32 %v8326_v60, %v9346_v4 }
 0x732   : > { %v3230_v6 = vmul.f32 %v8328_v42, %v9348_v32 }
 0x734   : > { %7637 = vmatprep.mubr.msk.f32.mxu1 %vm2335_vm10, %v3230_v6 }
 0x735   : > { %7638 = vmatmul.mubr.msk.f32.vlgmr.msra.gmra.mrb[12].mxu1 %vm2335_vm10, %v3231_v33 }
 0x736   : > { %7945 = vmatpush3.bf16.msk.msra.mxu1 %vm9081_vm6, %v9284_v28  ;;  %v8192_v28 = vunpack.i.h.bf16 %v8190_v43 }
 0x737   : > { %7954 = vmatprep.subr.msk.bf16.mxu1 %vm9054_vm3, %v7952_v26 }
 0x738   : > { %v7958_v33 = vpack.c.bf16 %v8192_v28, %v8191_v0 }
 0x75a   : > { %v3209_v27 = vpop.xlane.xlu1 %3208 }
 0x75b   : > { %8329 = vrcp.f32 %v3209_v27  ;;  %v3206_v16 = vpop.xlane.xlu0 %3205  ;;  %v8197_v27 = vunpack.i.h.bf16 %v8195_v37 }
 0x75c   : > { %8331 = vrcp.f32 %v3206_v16  ;;  %v8196_v16 = vunpack.i.l.bf16 %v8195_v37 }
 0x75e   : > { %v3215_v32 = vpop.xlane.xlu1 %3214  ;;  %v7964_v37 = vpack.c.bf16 %v8197_v27, %v8196_v16 }
 0x75f   : > { %8333 = vrcp.f32 %v3215_v32  ;;  %v3212_v4 = vpop.xlane.xlu0 %3211 }
 0x760   : > { %8335 = vrcp.f32 %v3212_v4 }
 0x762   : > { %v3221_v22 = vpop.xlane.xlu1 %3220 }
 0x763   : > { %8337 = vrcp.f32 %v3221_v22  ;;  %v3218_v31 = vpop.xlane.xlu0 %3217 }
 0x764   : > { %8339 = vrcp.f32 %v3218_v31 }
 0x765   : > { %v8330_v35 = vpop.eup %8329 }
 0x766   : > { %v8332_v14 = vpop.eup %8331  ;;  %v3682_v1 = vpop.permute.xlu1 %3681  ;;  %v3233_v47 = vmul.f32 %v8330_v35, %v9358_v12 }
 0x767   : > { %v3593_v60 = vpop.permute.xlu0 %3592  ;;  %v3232_v42 = vmul.f32 %v8332_v14, %v9360_v17 }
 0x769   : > { %v8334_v19 = vpop.eup %8333  ;;  %7644 = vmatprep.mubr.msk.f32.mxu0 %vm2335_vm10, %v3232_v42 }
 0x76a   : > { %v8336_v6 = vpop.eup %8335  ;;  %v3684_v32 = vpop.permute.xlu1 %3683  ;;  %7645 = vmatmul.mubr.msk.f32.vlgmr.msra.gmra.mrb[22].mxu0 %vm2335_vm10, %v3233_v47  ;;  %v3235_v17 = vmul.f32 %v8334_v19, %v9364_v8 }
 0x76b   : > { %7951 = vmatpush3.bf16.msk.msra.mxu0 %vm9081_vm6, %v9294_v38  ;;  %v8200_v43 = vpop.permute.xlu0 %8199  ;;  %v3234_v4 = vmul.f32 %v8336_v6, %v9368_v25 }
 0x76c   : > { %7960 = vmatprep.subr.msk.bf16.mxu0 %vm9054_vm3, %v7958_v33  ;;  %v8202_v35 = vunpack.i.h.bf16 %v8200_v43  ;;  %v8201_v14 = vunpack.i.l.bf16 %v8200_v43 }
 0x76d   : > { %v8338_v12 = vpop.eup %8337  ;;  %7651 = vmatprep.mubr.msk.f32.mxu1 %vm2335_vm10, %v3234_v4 }
 0x76e   : > { %v8340_v22 = vpop.eup %8339  ;;  %v3775_v31 = vpop.permute.xlu1 %3774  ;;  %7652 = vmatmul.mubr.msk.f32.vlgmr.msra.gmra.mrb[14].mxu1 %vm2335_vm10, %v3235_v17  ;;  %v3237_v25 = vmul.f32 %v8338_v12, %v9372_v13  ;;  %v7970_v0 = vpack.c.bf16 %v8202_v35, %v8201_v14 }
 0x76f   : > { %7957 = vmatpush3.bf16.xpose.msk.msra.mxu1 %vm9054_vm3, %v7952_v26  ;;  %7665 = vmatprep.mubr.msk.f32.mxu1 %vm1838_vm2, %v3591_v61  ;;  %v3773_v38 = vpop.permute.xlu0 %3772  ;;  %v3236_v8 = vmul.f32 %v8340_v22, %v9376_v23 }
 0x770   : > { %7966 = vmatprep.subr.msk.bf16.mxu1 %vm9054_vm3, %v7964_v37 }
 0x771   : > { %7658 = vmatprep.mubr.msk.f32.mxu0 %vm2335_vm10, %v3236_v8 }
 0x772   : > { %v3866_v28 = vpop.permute.xlu1 %3865  ;;  %7659 = vmatmul.mubr.msk.f32.vlgmr.msra.gmra.mrb[24].mxu0 %vm2335_vm10, %v3237_v25 }
 0x773   : > { %7672 = vmatprep.mubr.msk.f32.mxu0 %vm1838_vm2, %v3682_v1  ;;  %v3864_v42 = vpop.permute.xlu0 %3863 }
 0x774   : > { %7963 = vmatpush3.bf16.xpose.msk.msra.mxu0 %vm9054_vm3, %v7958_v33 }
 0x775   : > { %7972 = vmatprep.subr.msk.bf16.mxu0 %vm9054_vm3, %v7970_v0 }
 0x776   : > { %7666 = vmatmul.mubr.msk.f32.vlgmr.msra.gmra.mrb[16].mxu1 %vm1838_vm2, %v3593_v60  ;;  %v8210_v13 = vpop.permute.xlu1 %8209 }
 0x777   : > { %7969 = vmatpush3.bf16.xpose.msk.msra.mxu1 %vm9054_vm3, %v7964_v37  ;;  %7679 = vmatprep.mubr.msk.f32.mxu1 %vm1838_vm2, %v3773_v38  ;;  %v8205_v23 = vpop.permute.xlu0 %8204  ;;  %v8212_v47 = vunpack.i.h.bf16 %v8210_v13  ;;  %v8211_v1 = vunpack.i.l.bf16 %v8210_v13 }
 0x778   : > { %v8207_v26 = vunpack.i.h.bf16 %v8205_v23  ;;  %v8206_v61 = vunpack.i.l.bf16 %v8205_v23 }
 0x779   : > { %v9448_v16 = vpack.c.bf16 %v8212_v47, %v8211_v1 }
 0x77a   : > { %v7976_v19 = vpack.c.bf16 %v8207_v26, %v8206_v61  ;;  %v8215_v6 = vpop.permute.xlu1 %8214 }
 0x77b   : > { %v8217_v27 = vunpack.i.h.bf16 %v8215_v6  ;;  %v8216_v33 = vunpack.i.l.bf16 %v8215_v6  ;;  %7673 = vmatmul.mubr.msk.f32.vlgmr.msra.gmra.mrb[26].mxu0 %vm1838_vm2, %v3684_v32 }
 0x77c   : > { %7975 = vmatpush3.bf16.xpose.msk.msra.mxu0 %vm9054_vm3, %v7970_v0  ;;  %7686 = vmatprep.mubr.msk.f32.mxu0 %vm1838_vm2, %v3864_v42 }
 0x77d   : > { %v7982_v60 = vpack.c.bf16 %v8217_v27, %v8216_v33  ;;  %7978 = vmatprep.subr.msk.bf16.mxu1 %vm9081_vm6, %v7976_v19 }
 0x77e   : > { %7680 = vmatmul.mubr.msk.f32.vlgmr.msra.gmra.mrb[18].mxu1 %vm1838_vm2, %v3775_v31  ;;  %v8220_v43 = vpop.permute.xlu1 %8219 }
 0x77f   : > { %v8222_v4 = vunpack.i.h.bf16 %v8220_v43  ;;  %v8221_v17 = vunpack.i.l.bf16 %v8220_v43  ;;  %7981 = vmatpush3.bf16.msk.msra.mxu1 %vm9081_vm6, %v7976_v19  ;;  %7984 = vmatprep.subr.msk.bf16.mxu0 %vm9081_vm6, %v7982_v60 }
 0x780   : > { %7990 = vmatprep.subr.msk.bf16.mxu1 %vm9081_vm6, %v9448_v16 }
 0x781   : > { %v9458_v32 = vpack.c.bf16 %v8222_v4, %v8221_v17 }
 0x783   : > { %7687 = vmatmul.mubr.msk.f32.vlgmr.msra.gmra.mrb[28].mxu0 %vm1838_vm2, %v3866_v28 }
 0x784   : > { %7987 = vmatpush3.bf16.msk.msra.mxu0 %vm9081_vm6, %v7982_v60 }
 0x785   : > { %7996 = vmatprep.subr.msk.bf16.mxu0 %vm9081_vm6, %v9458_v32 }
 0x808   : > { %v9466_v12 = vpop.f32.mrb[12].mxu1 }
 0x809   : > { %v9468_v22 = vpop.f32.mrb[13].mxu1 }
 0x83d   : > { %v9470_v37 = vpop.f32.mrb[22].mxu0 }
 0x83e   : > { %v9472_v31 = vpop.f32.mrb[23].mxu0 }
 0x841   : > { %v9474_v35 = vpop.f32.mrb[14].mxu1 }
 0x842   : > { %v9476_v14 = vpop.f32.mrb[15].mxu1 }
 0x845   : > { %v9478_v38 = vpop.f32.mrb[24].mxu0 }
 0x846   : > { %v9480_v8 = vpop.f32.mrb[25].mxu0 }
 0x849   : > { %v7667_v25 = vpop.f32.mrb[16].mxu1 }
 0x84a   : > { %v3955_v28 = vsel %vm642_vm7, -1e+30, %v7667_v25  ;;  %v3672_v0 = vpop.f32.mrb[17].mxu1 }
 0x84b   : > { %v3954_v42 = vsel %vm641_vm8, -1e+30, %v3672_v0  ;;  %v3965_v13 = vsel %vm2339_vm9, %v3955_v28, -inf }
 0x84c   : > { %3966 = vmax.xlane.f32.xlu1 %v3965_v13  ;;  %v3962_v23 = vsel %vm2335_vm10, %v3954_v42, -inf }
 0x84d   : > { %3963 = vmax.xlane.f32.xlu0 %v3962_v23 }
 0x84e   : > { %v7674_v26 = vpop.f32.mrb[26].mxu0 }
 0x84f   : > { %v3957_v61 = vsel %vm644_vm11, -1e+30, %v7674_v26  ;;  %v3763_v47 = vpop.f32.mrb[27].mxu0 }
 0x850   : > { %v3971_v1 = vsel %vm2339_vm9, %v3957_v61, -inf  ;;  %v3956_v19 = vsel %vm643_vm12, -1e+30, %v3763_v47 }
 0x851   : > { %3972 = vmax.xlane.f32.xlu0 %v3971_v1  ;;  %v7681_v6 = vpop.f32.mrb[18].mxu1  ;;  %v3968_v43 = vsel %vm2335_vm10, %v3956_v19, -inf }
 0x852   : > { %v3959_v27 = vsel %vm646_vm13, -1e+30, %v7681_v6  ;;  %v3854_v33 = vpop.f32.mrb[19].mxu1 }
 0x853   : > { %v3977_v60 = vsel %vm2339_vm9, %v3959_v27, -inf  ;;  %v3958_v4 = vsel %vm645_vm14, -1e+30, %v3854_v33 }
 0x854   : > { %3978 = vmax.xlane.f32.xlu1 %v3977_v60  ;;  %v3974_v23 = vsel %vm2335_vm10, %v3958_v4, -inf }
 0x855   : > { %3969 = vmax.xlane.f32.xlu0 %v3968_v43 }
 0x856   : > { %v7688_v17 = vpop.f32.mrb[28].mxu0 }
 0x857   : > { %v3961_v25 = vsel %vm648_vm15, -1e+30, %v7688_v17  ;;  %v3945_v0 = vpop.f32.mrb[29].mxu0 }
 0x858   : > { %v3983_v13 = vsel %vm2339_vm9, %v3961_v25, -inf  ;;  %v3960_v26 = vsel %vm647_vm4, -1e+30, %v3945_v0 }
 0x859   : > { %3984 = vmax.xlane.f32.xlu1 %v3983_v13  ;;  %3975 = vmax.xlane.f32.xlu0 %v3974_v23  ;;  %v3980_v47 = vsel %vm2335_vm10, %v3960_v26, -inf }
 0x85d   : > { %3981 = vmax.xlane.f32.xlu0 %v3980_v47 }
 0x86a   : > { %8229 = vrot.lane.b32.xlu1 %v9021_v10, %s8444_s18 }
 0x873   : > { %8224 = vrot.lane.b32.xlu0 %v8987_v51, %s8444_s18 }
 0x8d9   : > { %v3967_v1 = vpop.xlane.xlu1 %3966 }
 0x8da   : > { %v3987_v6 = vsub.f32 %v3955_v28, %v3967_v1  ;;  %v3964_v33 = vpop.xlane.xlu0 %3963 }
 0x8db   : > { %v3986_v60 = vsub.f32 %v3954_v42, %v3964_v33 }
 0x8dc   : > { %v3996_v43 = vmul.f32 1.442695, %v3987_v6 }
 0x8dd   : > { %v3994_v17 = vmul.f32 1.442695, %v3986_v60 }
 0x8de   : > { %8341 = vpow2.f32 %v3996_v43  ;;  %v3973_v28 = vpop.xlane.xlu0 %3972 }
 0x8df   : > { %8343 = vpow2.f32 %v3994_v17  ;;  %v3989_v6 = vsub.f32 %v3957_v61, %v3973_v28 }
 0x8e1   : > { %v3979_v1 = vpop.xlane.xlu1 %3978  ;;  %v4000_v43 = vmul.f32 1.442695, %v3989_v6 }
 0x8e2   : > { %v3970_v42 = vpop.xlane.xlu0 %3969  ;;  %v3991_v17 = vsub.f32 %v3959_v27, %v3979_v1 }
 0x8e3   : > { %v3988_v60 = vsub.f32 %v3956_v19, %v3970_v42  ;;  %8345 = vpow2.f32 %v4000_v43 }
 0x8e6   : > { %v3976_v33 = vpop.xlane.xlu0 %3975  ;;  %v3985_v29 = vpop.xlane.xlu1 %3984 }
 0x8e7   : > { %v3990_v20 = vsub.f32 %v3958_v4, %v3976_v33  ;;  %v3993_v9 = vsub.f32 %v3961_v25, %v3985_v29 }
 0x8e8   : > { %v9510_v0 = vpop.eup %8341 }
 0x8e9   : > { %v9512_v13 = vpop.eup %8343  ;;  %v4013_v23 = vsel %vm2339_vm9, %v9510_v0, 0.0  ;;  %v4008_v63 = vmul.f32 1.442695, %v3993_v9 }
 0x8ea   : > { %4014 = vadd.xlane.f32.xlu1 %v4013_v23  ;;  %v4010_v47 = vsel %vm2335_vm10, %v9512_v13, 0.0  ;;  %v3998_v23 = vmul.f32 1.442695, %v3988_v60  ;;  %v3982_v21 = vpop.xlane.xlu0 %3981 }
 0x8eb   : > { %4011 = vadd.xlane.f32.xlu0 %v4010_v47  ;;  %v4004_v47 = vmul.f32 1.442695, %v3991_v17  ;;  %v3992_v48 = vsub.f32 %v3960_v26, %v3982_v21 }
 0x8ec   : > { %8347 = vpow2.f32 %v3998_v23 }
 0x8ed   : > { %8349 = vpow2.f32 %v4004_v47  ;;  %v9522_v61 = vpop.eup %8345 }
 0x8ee   : > { %v4019_v27 = vsel %vm2339_vm9, %v9522_v61, 0.0  ;;  %v8225_v28 = vpop.permute.xlu0 %8224 }
 0x8ef   : > { %v8227_v33 = vunpack.i.h.bf16 %v8225_v28  ;;  %v8226_v60 = vunpack.i.l.bf16 %v8225_v28 }
 0x8f6   : > { %v8348_v19 = vpop.eup %8347 }
 0x8f7   : > { %v9526_v4 = vpop.eup %8349  ;;  %v4016_v29 = vsel %vm2335_vm10, %v8348_v19, 0.0 }
 0x8f8   : > { %v4025_v9 = vsel %vm2339_vm9, %v9526_v4, 0.0 }
 0x8fb   : > { %4404 = vrot.lane.b32.xlu1 %v9064_v52, %s8445_s20  ;;  %v4002_v52 = vmul.f32 1.442695, %v3990_v20 }
 0x8fd   : > { %8351 = vpow2.f32 %v4002_v52 }
 0x8fe   : > { %8353 = vpow2.f32 %v4008_v63 }
 0x901   : > { %4402 = vrot.lane.b32.xlu0 %v8996_v18, %s8445_s20  ;;  %v4006_v18 = vmul.f32 1.442695, %v3992_v48 }
 0x903   : > { %8355 = vpow2.f32 %v4006_v18 }
 0x907   : > { %v9529_v25 = vpop.eup %8351 }
 0x908   : > { %v9533_v20 = vpop.eup %8353  ;;  %v4022_v21 = vsel %vm2335_vm10, %v9529_v25, 0.0 }
 0x909   : > { %v4031_v63 = vsel %vm2339_vm9, %v9533_v20, 0.0 }
 0x90d   : > { %v9537_v48 = vpop.eup %8355 }
 0x90e   : > { %v4028_v26 = vsel %vm2335_vm10, %v9537_v48, 0.0 }
 0x91f   : > { %4020 = vadd.xlane.f32.xlu1 %v4019_v27 }
 0x920   : > { %4017 = vadd.xlane.f32.xlu0 %v4016_v29 }
 0x923   : > { %4026 = vadd.xlane.f32.xlu1 %v4025_v9 }
 0x924   : > { %4023 = vadd.xlane.f32.xlu0 %v4022_v21 }
 0x927   : > { %4032 = vadd.xlane.f32.xlu1 %v4031_v63 }
 0x928   : > { %4029 = vadd.xlane.f32.xlu0 %v4028_v26 }
 0x938   : > { %4493 = vrot.lane.b32.xlu1 %v9033_v15, %s8445_s20  ;;  %v8230_v15 = vpop.permute.xlu1 %8229 }
 0x939   : > { %v8231_v29 = vunpack.i.l.bf16 %v8230_v15 }
 0x93c   : > { %8239 = vrot.lane.b32.xlu1 %v9037_v44, %s8444_s18 }
 0x93e   : > { %8234 = vrot.lane.b32.xlu0 %v9026_v55, %s8444_s18 }
 0x940   : > { %4586 = vrot.lane.b32.xlu1 %v9101_v36, %s8445_s20 }
 0x942   : > { %4495 = vrot.lane.b32.xlu0 %v9079_v49, %s8445_s20 }
 0x944   : > { %4677 = vrot.lane.b32.xlu1 %v9104_v53, %s8445_s20 }
 0x946   : > { %4584 = vrot.lane.b32.xlu0 %v9043_v11, %s8445_s20  ;;  %v8000_v11 = vpack.c.bf16 %v8227_v33, %v8226_v60 }
 0x94a   : > { %4675 = vrot.lane.b32.xlu0 %v9039_v45, %s8445_s20 }
 0x977   : > { %v4015_v42 = vpop.xlane.xlu1 %4014 }
 0x978   : > { %8357 = vrcp.f32 %v4015_v42  ;;  %v4012_v1 = vpop.xlane.xlu0 %4011 }
 0x979   : > { %8359 = vrcp.f32 %v4012_v1 }
 0x97b   : > { %v4405_v45 = vpop.permute.xlu1 %4404 }
 0x97c   : > { %v4403_v43 = vpop.permute.xlu0 %4402 }
 0x982   : > { %v8358_v6 = vpop.eup %8357 }
 0x983   : > { %v8360_v36 = vpop.eup %8359  ;;  %v4043_v53 = vmul.f32 %v8358_v6, %v9510_v0 }
 0x984   : > { %v4042_v49 = vmul.f32 %v8360_v36, %v9512_v13 }
 0x986   : > { %7693 = vmatprep.mubr.msk.f32.mxu1 %vm2335_vm10, %v4042_v49 }
 0x987   : > { %7694 = vmatmul.mubr.msk.f32.vlgmr.msra.gmra.mrb[20].mxu1 %vm2335_vm10, %v4043_v53 }
 0x988   : > { %7993 = vmatpush3.bf16.msk.msra.mxu1 %vm9081_vm6, %v9448_v16  ;;  %v8232_v16 = vunpack.i.h.bf16 %v8230_v15 }
 0x989   : > { %8002 = vmatprep.subr.msk.bf16.mxu1 %vm9054_vm3, %v8000_v11 }
 0x98a   : > { %v8006_v1 = vpack.c.bf16 %v8232_v16, %v8231_v29 }
 0x9ac   : > { %v4021_v17 = vpop.xlane.xlu1 %4020 }
 0x9ad   : > { %8361 = vrcp.f32 %v4021_v17  ;;  %v4018_v23 = vpop.xlane.xlu0 %4017 }
 0x9ae   : > { %8363 = vrcp.f32 %v4018_v23 }
 0x9b0   : > { %v4027_v13 = vpop.xlane.xlu1 %4026 }
 0x9b1   : > { %8365 = vrcp.f32 %v4027_v13  ;;  %v4024_v0 = vpop.xlane.xlu0 %4023 }
 0x9b2   : > { %8367 = vrcp.f32 %v4024_v0 }
 0x9b4   : > { %v4033_v47 = vpop.xlane.xlu1 %4032 }
 0x9b5   : > { %8369 = vrcp.f32 %v4033_v47  ;;  %v4030_v52 = vpop.xlane.xlu0 %4029 }
 0x9b6   : > { %8371 = vrcp.f32 %v4030_v52 }
 0x9b7   : > { %v8362_v18 = vpop.eup %8361 }
 0x9b8   : > { %v8364_v27 = vpop.eup %8363  ;;  %v4494_v9 = vpop.permute.xlu1 %4493  ;;  %v4045_v26 = vmul.f32 %v8362_v18, %v9522_v61 }
 0x9b9   : > { %v8235_v21 = vpop.permute.xlu0 %8234  ;;  %v4044_v63 = vmul.f32 %v8364_v27, %v8348_v19 }
 0x9ba   : > { %v8237_v6 = vunpack.i.h.bf16 %v8235_v21  ;;  %v8236_v36 = vunpack.i.l.bf16 %v8235_v21 }
 0x9bb   : > { %v8366_v28 = vpop.eup %8365  ;;  %7700 = vmatprep.mubr.msk.f32.mxu0 %vm2335_vm10, %v4044_v63 }
 0x9bc   : > { %v8368_v42 = vpop.eup %8367  ;;  %7701 = vmatmul.mubr.msk.f32.vlgmr.msra.gmra.mrb[30].mxu0 %vm2335_vm10, %v4045_v26  ;;  %v4047_v33 = vmul.f32 %v8366_v28, %v9526_v4  ;;  %v8240_v19 = vpop.permute.xlu1 %8239  ;;  %v8012_v49 = vpack.c.bf16 %v8237_v6, %v8236_v36 }
 0x9bd   : > { %7999 = vmatpush3.bf16.msk.msra.mxu0 %vm9081_vm6, %v9458_v32  ;;  %v4046_v15 = vmul.f32 %v8368_v42, %v9529_v25  ;;  %v8242_v53 = vunpack.i.h.bf16 %v8240_v19  ;;  %v8241_v17 = vunpack.i.l.bf16 %v8240_v19  ;;  %v4496_v23 = vpop.permute.xlu0 %4495 }
 0x9be   : > { %8008 = vmatprep.subr.msk.bf16.mxu0 %vm9054_vm3, %v8006_v1 }
 0x9bf   : > { %v8370_v61 = vpop.eup %8369  ;;  %7707 = vmatprep.mubr.msk.f32.mxu1 %vm2335_vm10, %v4046_v15  ;;  %v8018_v25 = vpack.c.bf16 %v8242_v53, %v8241_v17 }
 0x9c0   : > { %v8372_v60 = vpop.eup %8371  ;;  %7708 = vmatmul.mubr.msk.f32.vlgmr.msra.gmra.mrb[22].mxu1 %vm2335_vm10, %v4047_v33  ;;  %v4049_v4 = vmul.f32 %v8370_v61, %v9533_v20 }
 0x9c1   : > { %8005 = vmatpush3.bf16.xpose.msk.msra.mxu1 %vm9054_vm3, %v8000_v11  ;;  %7721 = vmatprep.mubr.msk.f32.mxu1 %vm1838_vm2, %v4403_v43  ;;  %v4048_v32 = vmul.f32 %v8372_v60, %v9537_v48  ;;  %v4585_v11 = vpop.permute.xlu0 %4584  ;;  %v4587_v48 = vpop.permute.xlu1 %4586 }
 0x9c2   : > { %8014 = vmatprep.subr.msk.bf16.mxu1 %vm9054_vm3, %v8012_v49 }
 0x9c3   : > { %7714 = vmatprep.mubr.msk.f32.mxu0 %vm2335_vm10, %v4048_v32 }
 0x9c4   : > { %7715 = vmatmul.mubr.msk.f32.vlgmr.msra.gmra.mrb[32].mxu0 %vm2335_vm10, %v4049_v4 }
 0x9c5   : > { %7728 = vmatprep.mubr.msk.f32.mxu0 %vm1838_vm2, %v4494_v9  ;;  %v4676_v20 = vpop.permute.xlu0 %4675  ;;  %v4678_v43 = vpop.permute.xlu1 %4677 }
 0x9c6   : > { %8011 = vmatpush3.bf16.xpose.msk.msra.mxu0 %vm9054_vm3, %v8006_v1 }
 0x9c7   : > { %8020 = vmatprep.subr.msk.bf16.mxu0 %vm9054_vm3, %v8018_v25 }
 0x9c8   : > { %7722 = vmatmul.mubr.msk.f32.vlgmr.msra.gmra.mrb[24].mxu1 %vm1838_vm2, %v4405_v45 }
 0x9c9   : > { %8017 = vmatpush3.bf16.xpose.msk.msra.mxu1 %vm9054_vm3, %v8012_v49  ;;  %7735 = vmatprep.mubr.msk.f32.mxu1 %vm1838_vm2, %v4585_v11 }
 0x9cd   : > { %7729 = vmatmul.mubr.msk.f32.vlgmr.msra.gmra.mrb[34].mxu0 %vm1838_vm2, %v4496_v23 }
 0x9ce   : > { %8023 = vmatpush3.bf16.xpose.msk.msra.mxu0 %vm9054_vm3, %v8018_v25  ;;  %7742 = vmatprep.mubr.msk.f32.mxu0 %vm1838_vm2, %v4676_v20  ;;  %vm5318_vm3 = vcmask 130048  }
 0x9d0   : > { %7736 = vmatmul.mubr.msk.f32.vlgmr.msra.gmra.mrb[26].mxu1 %vm1838_vm2, %v4587_v48 }
 0x9d5   : > { %7743 = vmatmul.mubr.msk.f32.vlgmr.msra.gmra.mrb[36].mxu0 %vm1838_vm2, %v4678_v43 }
 0xa5a   : > { %v9604_v45 = vpop.f32.mrb[20].mxu1 }
 0xa5b   : > { %v9606_v13 = vpop.f32.mrb[21].mxu1 }
 0xa8f   : > { %v9608_v0 = vpop.f32.mrb[30].mxu0 }
 0xa90   : > { %v9610_v47 = vpop.f32.mrb[31].mxu0 }
 0xa93   : > { %v9612_v52 = vpop.f32.mrb[22].mxu1 }
 0xa94   : > { %v9614_v18 = vpop.f32.mrb[23].mxu1 }
 0xa97   : > { %v9616_v2 = vpop.f32.mrb[32].mxu0 }
 0xa98   : > { %v9618_v27 = vpop.f32.mrb[33].mxu0 }
 0xa9b   : > { %v7723_v16 = vpop.f32.mrb[24].mxu1 }
 0xa9c   : > { %v4767_v29 = vsel %vm642_vm7, -1e+30, %v7723_v16  ;;  %v4484_v9 = vpop.f32.mrb[25].mxu1 }
 0xa9d   : > { %v4777_v21 = vsel %vm2339_vm9, %v4767_v29, -inf  ;;  %v4766_v63 = vsel %vm641_vm8, -1e+30, %v4484_v9 }
 0xa9e   : > { %v4774_v26 = vsel %vm2335_vm10, %v4766_v63, -inf  ;;  %4778 = vmax.xlane.f32.xlu1 %v4777_v21 }
 0xa9f   : > { %4775 = vmax.xlane.f32.xlu0 %v4774_v26 }
 0xaa0   : > { %v7730_v28 = vpop.f32.mrb[34].mxu0 }
 0xaa1   : > { %v4769_v42 = vsel %vm644_vm11, -1e+30, %v7730_v28  ;;  %v4575_v1 = vpop.f32.mrb[35].mxu0 }
 0xaa2   : > { %v4783_v6 = vsel %vm2339_vm9, %v4769_v42, -inf  ;;  %v4768_v50 = vsel %vm643_vm12, -1e+30, %v4575_v1 }
 0xaa3   : > { %4784 = vmax.xlane.f32.xlu0 %v4783_v6  ;;  %v7737_v36 = vpop.f32.mrb[26].mxu1  ;;  %v4780_v19 = vsel %vm2335_vm10, %v4768_v50, -inf }
 0xaa4   : > { %v4771_v3 = vsel %vm646_vm13, -1e+30, %v7737_v36  ;;  %v4666_v15 = vpop.f32.mrb[27].mxu1 }
 0xaa5   : > { %v4789_v33 = vsel %vm2339_vm9, %v4771_v3, -inf  ;;  %v4770_v62 = vsel %vm645_vm14, -1e+30, %v4666_v15 }
 0xaa6   : > { %4790 = vmax.xlane.f32.xlu1 %v4789_v33  ;;  %v4786_v49 = vsel %vm2335_vm10, %v4770_v62, -inf }
 0xaa7   : > { %4781 = vmax.xlane.f32.xlu0 %v4780_v19 }
 0xaa8   : > { %v7744_v61 = vpop.f32.mrb[36].mxu0 }
 0xaa9   : > { %v4773_v34 = vsel %vm648_vm15, -1e+30, %v7744_v61  ;;  %v4757_v60 = vpop.f32.mrb[37].mxu0 }
 0xaaa   : > { %v4795_v58 = vsel %vm2339_vm9, %v4773_v34, -inf  ;;  %v4772_v53 = vsel %vm647_vm4, -1e+30, %v4757_v60 }
 0xaab   : > { %4796 = vmax.xlane.f32.xlu1 %v4795_v58  ;;  %4787 = vmax.xlane.f32.xlu0 %v4786_v49  ;;  %v4792_v17 = vsel %vm2335_vm10, %v4772_v53, -inf }
 0xaaf   : > { %4793 = vmax.xlane.f32.xlu0 %v4792_v17 }
 0xb2b   : > { %v4779_v46 = vpop.xlane.xlu1 %4778 }
 0xb2c   : > { %v4799_v23 = vsub.f32 %v4767_v29, %v4779_v46  ;;  %v4776_v32 = vpop.xlane.xlu0 %4775 }
 0xb2d   : > { %v4798_v4 = vsub.f32 %v4766_v63, %v4776_v32 }
 0xb2e   : > { %v4808_v25 = vmul.f32 1.442695, %v4799_v23 }
 0xb2f   : > { %v4806_v41 = vmul.f32 1.442695, %v4798_v4 }
 0xb30   : > { %8373 = vpow2.f32 %v4808_v25  ;;  %v4785_v11 = vpop.xlane.xlu0 %4784 }
 0xb31   : > { %8375 = vpow2.f32 %v4806_v41  ;;  %v4801_v20 = vsub.f32 %v4769_v42, %v4785_v11 }
 0xb33   : > { %v4812_v48 = vmul.f32 1.442695, %v4801_v20  ;;  %v4791_v43 = vpop.xlane.xlu1 %4790 }
 0xb34   : > { %v4803_v16 = vsub.f32 %v4771_v3, %v4791_v43  ;;  %v4782_v54 = vpop.xlane.xlu0 %4781 }
 0xb35   : > { %8377 = vpow2.f32 %v4812_v48  ;;  %v4800_v9 = vsub.f32 %v4768_v50, %v4782_v54 }
 0xb36   : > { %v4816_v21 = vmul.f32 1.442695, %v4803_v16 }
 0xb37   : > { %v4810_v26 = vmul.f32 1.442695, %v4800_v9 }
 0xb38   : > { %8379 = vpow2.f32 %v4816_v21  ;;  %v4797_v28 = vpop.xlane.xlu1 %4796  ;;  %v4788_v1 = vpop.xlane.xlu0 %4787 }
 0xb39   : > { %8381 = vpow2.f32 %v4810_v26  ;;  %v4805_v29 = vsub.f32 %v4773_v34, %v4797_v28  ;;  %v4802_v63 = vsub.f32 %v4770_v62, %v4788_v1 }
 0xb3a   : > { %v9644_v6 = vpop.eup %8373 }
 0xb3b   : > { %v8376_v36 = vpop.eup %8375  ;;  %v4820_v15 = vmul.f32 1.442695, %v4805_v29  ;;  %v4814_v33 = vmul.f32 1.442695, %v4802_v63  ;;  %v4825_v42 = vsel %vm2339_vm9, %v9644_v6, 0.0 }
 0xb3c   : > { %4826 = vadd.xlane.f32.xlu1 %v4825_v42  ;;  %v4794_v3 = vpop.xlane.xlu0 %4793  ;;  %v4822_v50 = vsel %vm2335_vm10, %v8376_v36, 0.0 }
 0xb3d   : > { %8383 = vpow2.f32 %v4820_v15  ;;  %v4804_v19 = vsub.f32 %v4772_v53, %v4794_v3  ;;  %4823 = vadd.xlane.f32.xlu0 %v4822_v50 }
 0xb3e   : > { %8385 = vpow2.f32 %v4814_v33 }
 0xb3f   : > { %v9649_v61 = vpop.eup %8377  ;;  %v4818_v34 = vmul.f32 1.442695, %v4804_v19 }
 0xb40   : > { %v4831_v62 = vsel %vm2339_vm9, %v9649_v61, 0.0 }
 0xb41   : > { %8387 = vpow2.f32 %v4818_v34  ;;  %4832 = vadd.xlane.f32.xlu1 %v4831_v62  ;;  %v10414_v34 = vmov 0.0|0.0  }
 0xb42   : > { %v9653_v60 = vpop.eup %8379 }
 0xb43   : > { %v8382_v49 = vpop.eup %8381  ;;  %v4837_v58 = vsel %vm2339_vm9, %v9653_v60, 0.0 }
 0xb44   : > { %v4828_v17 = vsel %vm2335_vm10, %v8382_v49, 0.0 }
 0xb45   : > { %4838 = vadd.xlane.f32.xlu1 %v4837_v58  ;;  %4829 = vadd.xlane.f32.xlu0 %v4828_v17  ;;  %v5441_v58 = vld [vmem:[%s10342_s4 + $0x8] sm:$0xff] }
 0xb47   : > { %v9658_v53 = vpop.eup %8383 }
 0xb48   : > { %v9660_v46 = vpop.eup %8385  ;;  %v4843_v23 = vsel %vm2339_vm9, %v9658_v53, 0.0 }
 0xb49   : > { %4844 = vadd.xlane.f32.xlu1 %v4843_v23  ;;  %v4834_v32 = vsel %vm2335_vm10, %v9660_v46, 0.0 }
 0xb4a   : > { %4835 = vadd.xlane.f32.xlu0 %v4834_v32 }
 0xb4b   : > { %v9666_v4 = vpop.eup %8387 }
 0xb4c   : > { %v4840_v25 = vsel %vm2335_vm10, %v9666_v4, 0.0 }
 0xb4e   : > { %4841 = vadd.xlane.f32.xlu0 %v4840_v25  ;;  %v5443_v25 = vld [vmem:[%s10342_s4 + $0x18] sm:$0xff] }
 0xb5a   : > { %8249 = vrot.lane.b32.xlu1 %v9021_v10, %s8446_s21 }
 0xb5e   : > { %8254 = vrot.lane.b32.xlu1 %v9026_v55, %s8446_s21 }
 0xb62   : > { %8259 = vrot.lane.b32.xlu1 %v9037_v44, %s8446_s21 }
 0xb64   : > { %8244 = vrot.lane.b32.xlu0 %v8987_v51, %s8446_s21 }
 0xb66   : > { %5254 = vrot.lane.b32.xlu1 %v9606_v13, %s8447_s22 }
 0xb68   : > { %5222 = vrot.lane.b32.xlu0 %v9468_v22, %s8448_s23 }
 0xb6a   : > { %5226 = vrot.lane.b32.xlu1 %v9472_v31, %s8448_s23 }
 0xb6c   : > { %5258 = vrot.lane.b32.xlu0 %v9610_v47, %s8447_s22 }
 0xb6e   : > { %5224 = vrot.lane.b32.xlu1 %v9466_v12, %s8448_s23 }
 0xb70   : > { %5230 = vrot.lane.b32.xlu0 %v9476_v14, %s8448_s23 }
 0xb72   : > { %5256 = vrot.lane.b32.xlu1 %v9604_v45, %s8447_s22 }
 0xb74   : > { %5262 = vrot.lane.b32.xlu0 %v9614_v18, %s8447_s22 }
 0xb76   : > { %5228 = vrot.lane.b32.xlu1 %v9470_v37, %s8448_s23 }
 0xb78   : > { %5234 = vrot.lane.b32.xlu0 %v9480_v8, %s8448_s23 }
 0xb7a   : > { %5260 = vrot.lane.b32.xlu1 %v9608_v0, %s8447_s22 }
 0xb7e   : > { %5232 = vrot.lane.b32.xlu1 %v9474_v35, %s8448_s23 }
 0xb82   : > { %5264 = vrot.lane.b32.xlu1 %v9612_v52, %s8447_s22 }
 0xbc9   : > { %v4827_v51 = vpop.xlane.xlu1 %4826 }
 0xbca   : > { %v4824_v10 = vpop.xlane.xlu0 %4823 }
 0xbcb   : > { %8389 = vrcp.f32 %v4824_v10 }
 0xbce   : > { %v4833_v55 = vpop.xlane.xlu1 %4832 }
 0xbcf   : > { %8391 = vrcp.f32 %v4833_v55 }
 0xbd2   : > { %v4839_v44 = vpop.xlane.xlu1 %4838  ;;  %v4830_v12 = vpop.xlane.xlu0 %4829 }
 0xbd3   : > { %8393 = vrcp.f32 %v4830_v12 }
 0xbd4   : > { %8395 = vrcp.f32 %v4827_v51 }
 0xbd5   : > { %v8390_v22 = vpop.eup %8389 }
 0xbd6   : > { %v4845_v37 = vpop.xlane.xlu1 %4844  ;;  %v4854_v31 = vmul.f32 %v8390_v22, %v8376_v36 }
 0xbd7   : > { %v4836_v14 = vpop.xlane.xlu0 %4835 }
 0xbd8   : > { %7749 = vmatprep.mubr.msk.f32.mxu1 %vm2335_vm10, %v4854_v31  ;;  %8397 = vrcp.f32 %v4836_v14 }
 0xbd9   : > { %8399 = vrcp.f32 %v4845_v37  ;;  %v8392_v0 = vpop.eup %8391 }
 0xbda   : > { %v8250_v35 = vpop.permute.xlu1 %8249  ;;  %v4857_v54 = vmul.f32 %v8392_v0, %v9649_v61 }
 0xbdb   : > { %v8252_v8 = vunpack.i.h.bf16 %v8250_v35  ;;  %v8251_v45 = vunpack.i.l.bf16 %v8250_v35  ;;  %v4842_v13 = vpop.xlane.xlu0 %4841 }
 0xbdc   : > { %8401 = vrcp.f32 %v4842_v13 }
 0xbdd   : > { %8403 = vrcp.f32 %v4839_v44  ;;  %v8030_v47 = vpack.c.bf16 %v8252_v8, %v8251_v45  ;;  %v8394_v52 = vpop.eup %8393 }
 0xbde   : > { %v8255_v18 = vpop.permute.xlu1 %8254  ;;  %v4856_v11 = vmul.f32 %v8394_v52, %v8382_v49  ;;  %v8396_v26 = vpop.eup %8395 }
 0xbdf   : > { %v8245_v41 = vpop.permute.xlu0 %8244  ;;  %8032 = vmatprep.subr.msk.bf16.mxu0 %vm9081_vm6, %v8030_v47  ;;  %v8257_v20 = vunpack.i.h.bf16 %v8255_v18  ;;  %v8256_v48 = vunpack.i.l.bf16 %v8255_v18  ;;  %v4855_v42 = vmul.f32 %v8396_v26, %v9644_v6 }
 0xbe0   : > { %v8247_v43 = vunpack.i.h.bf16 %v8245_v41  ;;  %v8246_v16 = vunpack.i.l.bf16 %v8245_v41  ;;  %8035 = vmatpush3.bf16.msk.msra.mxu0 %vm9081_vm6, %v8030_v47  ;;  %7756 = vmatprep.mubr.msk.f32.mxu0 %vm2335_vm10, %v4856_v11 }
 0xbe1   : > { %v8036_v63 = vpack.c.bf16 %v8257_v20, %v8256_v48 }
 0xbe2   : > { %v8024_v9 = vpack.c.bf16 %v8247_v43, %v8246_v16  ;;  %v8260_v21 = vpop.permute.xlu1 %8259  ;;  %v8398_v29 = vpop.eup %8397 }
 0xbe3   : > { %v8262_v28 = vunpack.i.h.bf16 %v8260_v21  ;;  %v8261_v1 = vunpack.i.l.bf16 %v8260_v21  ;;  %7757 = vmatmul.mubr.msk.f32.vlgmr.msra.gmra.mrb[38].mxu0 %vm2335_vm10, %v4857_v54  ;;  %v8400_v36 = vpop.eup %8399  ;;  %v4858_v50 = vmul.f32 %v8398_v29, %v9660_v46  ;;  %v5223_v22 = vpop.permute.xlu0 %5222 }
 0xbe4   : > { %8026 = vmatprep.subr.msk.bf16.mxu1 %vm9081_vm6, %v8024_v9  ;;  %v4861_v61 = vmul.f32 %v8400_v36, %v9658_v53 }
 0xbe5   : > { %v8042_v15 = vpack.c.bf16 %v8262_v28, %v8261_v1  ;;  %8029 = vmatpush3.bf16.msk.msra.mxu1 %vm9081_vm6, %v8024_v9 }
 0xbe6   : > { %v8402_v33 = vpop.eup %8401  ;;  %8038 = vmatprep.subr.msk.bf16.mxu1 %vm9081_vm6, %v8036_v63  ;;  %v5255_v55 = vpop.permute.xlu1 %5254 }
 0xbe7   : > { %v8404_v3 = vpop.eup %8403  ;;  %8044 = vmatprep.subr.msk.bf16.mxu0 %vm9081_vm6, %v8042_v15  ;;  %v4860_v19 = vmul.f32 %v8402_v33, %v9666_v4  ;;  %v5442_v4 = vld [vmem:[%s10342_s4 + $0x10] sm:$0xff]  ;;  %v5259_v31 = vpop.permute.xlu0 %5258 }
 0xbe8   : > { %7750 = vmatmul.mubr.msk.f32.vlgmr.msra.gmra.mrb[28].mxu1 %vm2335_vm10, %v4855_v42  ;;  %8047 = vmatpush3.bf16.msk.msra.mxu0 %vm9081_vm6, %v8042_v15  ;;  %v4859_v6 = vmul.f32 %v8404_v3, %v9653_v60  ;;  %v5440_v60 = vld [vmem:[%s10342_s4] sm:$0xff]  ;;  %v8052_v10 = vpack.c.bf16 %v5443_v25, %v5442_v4 }
 0xbe9   : > { %8041 = vmatpush3.bf16.msk.msra.mxu1 %vm9081_vm6, %v8036_v63  ;;  %7763 = vmatprep.mubr.msk.f32.mxu1 %vm2335_vm10, %v4858_v50  ;;  %v8049_v53 = vpack.c.bf16 %v5441_v58, %v5440_v60 }
 0xbea   : > { %7770 = vmatprep.mubr.msk.f32.mxu0 %vm2335_vm10, %v4860_v19  ;;  %8048 = vmatprep.subr.bf16.mxu1 %v10414_v34  ;;  %v5227_v44 = vpop.permute.xlu1 %5226 }
 0xbeb   : > { %7771 = vmatmul.mubr.msk.f32.vlgmr.msra.gmra.mrb[40].mxu0 %vm2335_vm10, %v4861_v61  ;;  %8054 = vmatprep.subr.bf16.mxu0 %v10414_v34  ;;  %v5231_v35 = vpop.permute.xlu0 %5230 }
 0xbec   : > { %7764 = vmatmul.mubr.msk.f32.vlgmr.msra.gmra.mrb[30].mxu1 %vm2335_vm10, %v4859_v6  ;;  %7804 = vmatprep.mubr.msk.f32.mxu0 %vm8433_vm1, %v10407_v39  ;;  %v5314_v63 = vsel %vm1838_vm2, %v9312_v7, %v5231_v35 }
 0xbed   : > { %7781 = vmatprep.mubr.msk.f32.mxu1 %vm8433_vm1, %v10407_v39  ;;  %8050 = vmatpush3.bf16.msra.mxu1 %v8049_v53 }
 0xbee   : > { %8051 = vmatprep.subr.bf16.mxu1 %v10414_v34  ;;  %v5225_v12 = vpop.permute.xlu1 %5224 }
 0xbef   : > { %v5311_v20 = vsel %vm1838_vm2, %v9302_v57, %v5225_v12 }
 0xbf1   : > { %8053 = vmatpush3.bf16.msra.mxu1 %v8052_v10 }
 0xbf2   : > { %8060 = vmatprep.subr.bf16.mxu1 %v10414_v34  ;;  %v5257_v37 = vpop.permute.xlu1 %5256 }
 0xbf3   : > { %v5320_v54 = vsel %vm5318_vm3, %v5311_v20, %v5257_v37 }
 0xbf6   : > { %v5229_v14 = vpop.permute.xlu1 %5228 }
 0xbf7   : > { %v5313_v28 = vsel %vm1838_vm2, %v9306_v56, %v5229_v14 }
 0xbfa   : > { %v5261_v8 = vpop.permute.xlu1 %5260 }
 0xbfb   : > { %v5322_v36 = vsel %vm5318_vm3, %v5313_v28, %v5261_v8 }
 0xbfe   : > { %v5233_v45 = vpop.permute.xlu1 %5232 }
 0xc02   : > { %v5265_v0 = vpop.permute.xlu1 %5264 }
 0xcb6   : > { %v7758_v24 = vpop.f32.mrb[38].mxu0 }
 0xcb7   : > { %v5029_v62 = vpop.f32.mrb[39].mxu0 }
 0xcbb   : > { %v7751_v49 = vpop.f32.mrb[28].mxu1 }
 0xcbc   : > { %5288 = vrot.lane.b32.xlu1 %v7751_v49, %s8449_s28  ;;  %v4941_v17 = vpop.f32.mrb[29].mxu1 }
 0xcbd   : > { %5286 = vrot.lane.b32.xlu0 %v4941_v17, %s8449_s28 }
 0xcbe   : > { %v7772_v46 = vpop.f32.mrb[40].mxu0 }
 0xcbf   : > { %v7765_v23 = vpop.f32.mrb[30].mxu1  ;;  %v5205_v32 = vpop.f32.mrb[41].mxu0 }
 0xcc0   : > { %5296 = vrot.lane.b32.xlu1 %v7765_v23, %s8449_s28  ;;  %v5117_v51 = vpop.f32.mrb[31].mxu1 }
 0xcc1   : > { %5292 = vrot.lane.b32.xlu0 %v7758_v24, %s8449_s28 }
 0xcc4   : > { %5236 = vrot.lane.b32.xlu1 %v9478_v38, %s8448_s23  ;;  %v5263_v38 = vpop.permute.xlu0 %5262 }
 0xcc5   : > { %5290 = vrot.lane.b32.xlu0 %v5029_v62, %s8449_s28  ;;  %v5323_v50 = vsel %vm5318_vm3, %v5314_v63, %v5263_v38 }
 0xcc8   : > { %5300 = vrot.lane.b32.xlu1 %v7772_v46, %s8449_s28  ;;  %v5235_v13 = vpop.permute.xlu0 %5234 }
 0xcc9   : > { %5294 = vrot.lane.b32.xlu0 %v5117_v51, %s8449_s28 }
 0xccd   : > { %5266 = vrot.lane.b32.xlu0 %v9618_v27, %s8447_s22  ;;  %v5310_v27 = vsel %vm1838_vm2, %v9304_v30, %v5223_v22  ;;  %v5312_v30 = vsel %vm1838_vm2, %v9308_v40, %v5227_v44 }
 0xcce   : > { %v5321_v29 = vsel %vm5318_vm3, %v5312_v30, %v5259_v31  ;;  %v10415_v31 = vld [vmem:[#allocation23_spill] sm:$0xff] }
 0xccf   : > { %v5316_v14 = vsel %vm1838_vm2, %v10415_v31, %v5235_v13  ;;  %v8415_v31 = vld.sshfl [vmem:[%s8544_s19 + $0x8] sm:$0x3 pattern:$0x76325410] }
 0xcd1   : > { %5298 = vrot.lane.b32.xlu0 %v5205_v32, %s8449_s28 }
 0xcd5   : > { %5268 = vrot.lane.b32.xlu0 %v9616_v2, %s8447_s22  ;;  %v5319_v2 = vsel %vm5318_vm3, %v5310_v27, %v5255_v55  ;;  %v5315_v55 = vsel %vm1838_vm2, %v9310_v59, %v5233_v45 }
 0xcd6   : > { %v5324_v12 = vsel %vm5318_vm3, %v5315_v55, %v5265_v0 }
 0xd2e   : > { %v5289_v11 = vpop.permute.xlu1 %5288 }
 0xd2f   : > { %v5287_v47 = vpop.permute.xlu0 %5286  ;;  %v5329_v9 = vsel %vm5327_vm5, %v5320_v54, %v5289_v11  ;;  %v10416_v11 = vld [vmem:[#allocation22_spill] sm:$0xff] }
 0xd30   : > { %v5328_v52 = vsel %vm5327_vm5, %v5319_v2, %v5287_v47  ;;  %v5367_v40 = vrot.slane %v5329_v9, %v8538_v5 }
 0xd31   : > { %v5344_v18 = vcombine.high %v5328_v52, %v5328_v52  ;;  %v5351_v41 = vrot.slane %v5328_v52, %v8538_v5 }
 0xd32   : > { %v5297_v49 = vpop.permute.xlu1 %5296 }
 0xd33   : > { %v5358_v48 = vrot.slane %v5344_v18, %v8538_v5  ;;  %v5359_v43 = vcombine.high %v5351_v41, %v5351_v41  ;;  %v5293_v16 = vpop.permute.xlu0 %5292  ;;  %v5333_v35 = vsel %vm5327_vm5, %v5324_v12, %v5297_v49  ;;  %v10417_v49 = vld [vmem:[#allocation2_spill] sm:$0xff] }
 0xd34   : > { %v5331_v19 = vsel %vm5327_vm5, %v5322_v36, %v5293_v16  ;;  %v5415_v13 = vrot.slane %v5333_v35, %v8538_v5 }
 0xd35   : > { %v5360_v21 = vcombine.high %v5358_v48, %v5358_v48  ;;  %v5451_v26 = vcombine.low %v5351_v41, %v5359_v43  ;;  %v5391_v58 = vrot.slane %v5331_v19, %v8538_v5 }
 0xd36   : > { %v5237_v8 = vpop.permute.xlu1 %5236 }
 0xd37   : > { %v5452_v1 = vcombine.low %v5358_v48, %v5360_v21  ;;  %v5291_v57 = vpop.permute.xlu0 %5290  ;;  %v5459_v33 = vrot.slane %v5451_v26, %v8538_v5  ;;  %v5317_v20 = vsel %vm1838_vm2, %v10416_v11, %v5237_v8  ;;  %vm6756_vm2 = vcmask 523264  }
 0xd38   : > { %v5330_v15 = vsel %vm5327_vm5, %v5321_v29, %v5291_v57 }
 0xd39   : > { %v5466_v42 = vrot.slane %v5452_v1, %v8538_v5  ;;  %v5368_v3 = vcombine.high %v5330_v15, %v5330_v15  ;;  %v5375_v56 = vrot.slane %v5330_v15, %v8538_v5 }
 0xd3a   : > { %v5301_v54 = vpop.permute.xlu1 %5300 }
 0xd3b   : > { %v5467_v61 = vcombine.low %v5459_v33, %v5466_v42  ;;  %v5382_v7 = vrot.slane %v5368_v3, %v8538_v5  ;;  %v5383_v6 = vcombine.high %v5375_v56, %v5375_v56  ;;  %v5468_v24 = vcombine.low %v5367_v40, %v5375_v56  ;;  %v5295_v62 = vpop.permute.xlu0 %5294  ;;  %v7333_v42 = vld [vmem:[%s10343_s5] ss:$0 sm:$0xff] }
 0xd3c   : > { %v5332_v60 = vsel %vm5327_vm5, %v5323_v50, %v5295_v62 }
 0xd3d   : > { %v5384_v17 = vcombine.high %v5382_v7, %v5382_v7  ;;  %v5469_v53 = vcombine.low %v5383_v6, %v5382_v7  ;;  %v5392_v46 = vcombine.high %v5332_v60, %v5332_v60  ;;  %7782 = vmatmul.mubr.msk.f32.vlgmr.msra.gmra.mrb[32].mxu1 %vm741_vm0, %v5467_v61  ;;  %v5399_v23 = vrot.slane %v5332_v60, %v8538_v5 }
 0xd3e   : > { %7784 = vmatprep.mubr.msk.f32.mxu1 %vm8433_vm1, %v10407_v39  ;;  %v5476_v32 = vrot.slane %v5468_v24, %v8538_v5 }
 0xd3f   : > { %v5483_v4 = vrot.slane %v5469_v53, %v8538_v5  ;;  %v5485_v25 = vcombine.low %v5384_v17, %v5391_v58  ;;  %v5406_v51 = vrot.slane %v5392_v46, %v8538_v5  ;;  %v5267_v10 = vpop.permute.xlu0 %5266  ;;  %v5407_v44 = vcombine.high %v5399_v23, %v5399_v23  ;;  %v10418_v58 = vld [vmem:[#allocation7_spill] sm:$0xff] }
 0xd40   : > { %v5325_v27 = vsel %vm5318_vm3, %v5316_v14, %v5267_v10 }
 0xd41   : > { %v5408_v22 = vcombine.high %v5406_v51, %v5406_v51  ;;  %v5484_v37 = vcombine.low %v5476_v32, %v5483_v4  ;;  %v5486_v38 = vcombine.low %v5399_v23, %v5407_v44  ;;  %v5493_v45 = vrot.slane %v5485_v25, %v8538_v5  ;;  %v10419_v23 = vld [vmem:[#allocation6_spill] sm:$0xff]  ;;  %v10420_v4 = vld [vmem:[#allocation12_spill] sm:$0xff] }
 0xd43   : > { %7785 = vmatmul.mubr.msk.f32.gmra.mrb[34].mxu1 %vm741_vm0, %v5484_v37  ;;  %v5299_v2 = vpop.permute.xlu0 %5298  ;;  %v5500_v47 = vrot.slane %v5486_v38, %v8538_v5  ;;  %v5502_v0 = vcombine.low %v5406_v51, %v5408_v22 }
 0xd44   : > { %v5334_v59 = vsel %vm5327_vm5, %v5325_v27, %v5299_v2  ;;  %7787 = vmatprep.mubr.msk.f32.mxu1 %vm8433_vm1, %v10407_v39  ;;  %v10421_v27 = vld [vmem:[#allocation3_spill] sm:$0xff] }
 0xd45   : > { %v5416_v52 = vcombine.high %v5334_v59, %v5334_v59  ;;  %v5423_v18 = vrot.slane %v5334_v59, %v8538_v5  ;;  %v5501_v41 = vcombine.low %v5493_v45, %v5500_v47  ;;  %v5510_v21 = vrot.slane %v5502_v0, %v8538_v5  ;;  %v10422_v0 = vld [vmem:[#allocation9_spill] sm:$0xff] }
 0xd47   : > { %v5430_v48 = vrot.slane %v5416_v52, %v8538_v5  ;;  %v5431_v43 = vcombine.high %v5423_v18, %v5423_v18  ;;  %v5503_v16 = vcombine.low %v5415_v13, %v5423_v18  ;;  %v5269_v30 = vpop.permute.xlu0 %5268  ;;  %7788 = vmatmul.mubr.msk.f32.gmra.mrb[36].mxu1 %vm741_vm0, %v5501_v41  ;;  %v10423_v18 = vld [vmem:[#allocation8_spill] sm:$0xff] }
 0xd48   : > { %v5326_v9 = vsel %vm5318_vm3, %v5317_v20, %v5269_v30  ;;  %7790 = vmatprep.mubr.msk.f32.mxu1 %vm8433_vm1, %v10407_v39 }
 0xd49   : > { %v5432_v26 = vcombine.high %v5430_v48, %v5430_v48  ;;  %v5517_v28 = vrot.slane %v5503_v16, %v8538_v5  ;;  %v5335_v1 = vsel %vm5327_vm5, %v5326_v9, %v5301_v54  ;;  %v5519_v29 = vcombine.low %v5431_v43, %v5430_v48 }
 0xd4a   : > { %v5439_v57 = vrot.slane %v5335_v1, %v8538_v5 }
 0xd4b   : > { %v5518_v63 = vcombine.low %v5510_v21, %v5517_v28  ;;  %v5527_v40 = vrot.slane %v5519_v29, %v8538_v5  ;;  %v10424_v28 = vld [vmem:[#allocation13_spill] sm:$0xff] }
 0xd4c   : > { %v5520_v36 = vcombine.low %v5432_v26, %v5439_v57  ;;  %v8416_v29 = vld.sshfl [vmem:[%s8544_s19 + $0x18] sm:$0x3 pattern:$0x76325410] }
 0xd4d   : > { %7791 = vmatmul.mubr.msk.f32.gmra.mrb[38].mxu1 %vm741_vm0, %v5518_v63 }
 0xd4e   : > { %v5534_v15 = vrot.slane %v5520_v36, %v8538_v5  ;;  %7793 = vmatprep.mubr.msk.f32.mxu1 %vm8433_vm1, %v10407_v39 }
 0xd50   : > { %v5535_v33 = vcombine.low %v5527_v40, %v5534_v15 }
 0xd52   : > { %7794 = vmatmul.mubr.msk.f32.gmra.mrb[40].mxu1 %vm741_vm0, %v5535_v33  ;;  %v10425_v33 = vld [vmem:[#allocation4_spill] sm:$0xff] }
 0xd53   : > { %7835 = vmatprep.mubr.msk.f32.mxu1 %vm8433_vm1, %v10407_v39 }
 0xe10   : > { %v5612_v3 = vpop.f32.mrb[32].mxu1 }
 0xe11   : > { %v5613_v56 = vadd.f32 %v7333_v42, %v5612_v3  ;;  %v7783_v50 = vpop.f32.mrb[33].mxu1 }
 0xe13   : > { %v5641_v19 = vcombine.high %v5613_v56, %v5613_v56  ;;  %v5648_v61 = vrot.slane %v5613_v56, %v8538_v5  ;;  %v10426_v56 = vld [vmem:[#allocation10_spill] sm:$0xff] }
 0xe15   : > { %v5655_v7 = vrot.slane %v5641_v19, %v8538_v5  ;;  %v5656_v6 = vcombine.high %v5648_v61, %v5648_v61  ;;  %v9831_v60 = vadd.f32 %v5648_v61, %v10417_v49 }
 0xe16   : > { %v5617_v24 = vpop.f32.mrb[34].mxu1 }
 0xe17   : > { %v5657_v62 = vcombine.high %v5655_v7, %v5655_v7  ;;  %v9834_v17 = vadd.f32 %v5656_v6, %v10418_v58  ;;  %v5618_v53 = vadd.f32 %v7333_v42, %v5617_v24  ;;  %v7786_v46 = vpop.f32.mrb[35].mxu1  ;;  %v9837_v32 = vadd.f32 %v5655_v7, %v10419_v23 }
 0xe18   : > { %v10427_v46 = vld [vmem:[#allocation11_spill] sm:$0xff] }
 0xe19   : > { %v9840_v25 = vadd.f32 %v5657_v62, %v10420_v4  ;;  %v5658_v51 = vcombine.high %v5618_v53, %v5618_v53  ;;  %v5665_v10 = vrot.slane %v5618_v53, %v8538_v5  ;;  %v5788_v55 = vcombine.low %v9831_v60, %v9834_v17  ;;  %v10428_v4 = vld [vmem:[#allocation14_spill] sm:$0xff] }
 0xe1a   : > { %v5622_v22 = vpop.f32.mrb[36].mxu1 }
 0xe1b   : > { %v5672_v44 = vrot.slane %v5658_v51, %v8538_v5  ;;  %v5673_v12 = vcombine.high %v5665_v10, %v5665_v10  ;;  %v5789_v37 = vcombine.low %v9837_v32, %v9840_v25  ;;  %v9849_v14 = vadd.f32 %v8415_v31, %v5665_v10  ;;  %v7789_v8 = vpop.f32.mrb[37].mxu1  ;;  %v10430_v31 = vld [vmem:[#allocation5_spill] sm:$0xff] }
 0xe1c   : > { %v5623_v35 = vadd.f32 %v7333_v42, %v5622_v22  ;;  %v5796_v47 = vrot.slane %v5788_v55, %v8538_v5  ;;  %v8417_v22 = vld.sshfl [vmem:[%s8544_s19 + $0x28] sm:$0x3 pattern:$0x76325410] }
 0xe1d   : > { %v5674_v38 = vcombine.high %v5672_v44, %v5672_v44  ;;  %v9852_v2 = vadd.f32 %v5673_v12, %v10421_v27  ;;  %v5803_v59 = vrot.slane %v5789_v37, %v8538_v5  ;;  %v9858_v52 = vadd.f32 %v5672_v44, %v10422_v0 }
 0xe1e   : > { %v5675_v45 = vcombine.high %v5623_v35, %v5623_v35  ;;  %v5682_v13 = vrot.slane %v5623_v35, %v8538_v5 }
 0xe1f   : > { %v9861_v41 = vadd.f32 %v5674_v38, %v10423_v18  ;;  %v5804_v11 = vcombine.low %v5796_v47, %v5803_v59  ;;  %v5805_v20 = vcombine.low %v9849_v14, %v9852_v2  ;;  %v10434_v18 = vld [vmem:[#allocation15_spill] sm:$0xff] }
 0xe20   : > { %v5689_v48 = vrot.slane %v5675_v45, %v8538_v5  ;;  %v5690_v43 = vcombine.high %v5682_v13, %v5682_v13  ;;  %v5627_v16 = vpop.f32.mrb[38].mxu1  ;;  %v9870_v1 = vadd.f32 %v5682_v13, %v10424_v28  ;;  %v10432_v13 = vld [vmem:[#allocation16_spill] sm:$0xff] }
 0xe21   : > { %v5628_v30 = vadd.f32 %v7333_v42, %v5627_v16  ;;  %v7792_v54 = vpop.f32.mrb[39].mxu1  ;;  %v5878_v9 = vsel %vm741_vm0, %v5804_v11, 0.0  ;;  %v5806_v21 = vcombine.low %v9858_v52, %v9861_v41  ;;  %v5813_v40 = vrot.slane %v5805_v20, %v8538_v5  ;;  %v10436_v16 = vld [vmem:[#allocation17_spill] sm:$0xff] }
 0xe22   : > { %v5691_v26 = vcombine.high %v5689_v48, %v5689_v48  ;;  %v9873_v57 = vadd.f32 %v8416_v29, %v5690_v43  ;;  %5879 = vadd.xlane.f32.xlu0 %v5878_v9  ;;  %v9879_v3 = vadd.f32 %v5689_v48, %v10425_v33  ;;  %v8418_v54 = vld.sshfl [vmem:[%s8544_s19 + $0x38] sm:$0x3 pattern:$0x76325410] }
 0xe23   : > { %v5692_v63 = vcombine.high %v5628_v30, %v5628_v30  ;;  %v5699_v36 = vrot.slane %v5628_v30, %v8538_v5  ;;  %v5820_v15 = vrot.slane %v5806_v21, %v8538_v5 }
 0xe24   : > { %v9882_v50 = vadd.f32 %v5691_v26, %v10426_v56  ;;  %v5822_v19 = vcombine.low %v9870_v1, %v9873_v57 }
 0xe25   : > { %v5706_v61 = vrot.slane %v5692_v63, %v8538_v5  ;;  %v5707_v7 = vcombine.high %v5699_v36, %v5699_v36  ;;  %v5632_v6 = vpop.f32.mrb[40].mxu1  ;;  %v5821_v24 = vcombine.low %v5813_v40, %v5820_v15  ;;  %v9890_v23 = vadd.f32 %v5699_v36, %v10427_v46 }
 0xe26   : > { %v5633_v62 = vadd.f32 %v7333_v42, %v5632_v6  ;;  %v7795_v49 = vpop.f32.mrb[41].mxu1  ;;  %v5823_v58 = vcombine.low %v9879_v3, %v9882_v50  ;;  %v5830_v12 = vrot.slane %v5822_v19, %v8538_v5  ;;  %v10439_v19 = vld [vmem:[#allocation18_spill] sm:$0xff] }
 0xe27   : > { %v5708_v53 = vcombine.high %v5706_v61, %v5706_v61  ;;  %v9893_v51 = vadd.f32 %v5707_v7, %v10428_v4  ;;  %v5881_v10 = vsel %vm741_vm0, %v5821_v24, 0.0  ;;  %v9900_v37 = vadd.f32 %v8417_v22, %v5706_v61  ;;  %v10440_v7 = vld [vmem:[#allocation19_spill] sm:$0xff]  ;;  %v10441_v24 = vld [vmem:[#allocation20_spill] sm:$0xff]  ;;  %v10442_v49 = vld [vmem:[#allocation21_spill] sm:$0xff] }
 0xe28   : > { %v5709_v55 = vcombine.high %v5633_v62, %v5633_v62  ;;  %v5716_v44 = vrot.slane %v5633_v62, %v8538_v5  ;;  %5882 = vadd.xlane.f32.xlu1 %v5881_v10  ;;  %v5837_v42 = vrot.slane %v5823_v58, %v8538_v5 }
 0xe29   : > { %10429 = vst [vmem:[#allocation23_spill] sm:$0xff] %v9900_v37  ;;  %v9903_v35 = vadd.f32 %v5708_v53, %v10430_v31  ;;  %v5839_v8 = vcombine.low %v9890_v23, %v9893_v51 }
 0xe2a   : > { %v5723_v38 = vrot.slane %v5709_v55, %v8538_v5  ;;  %v5724_v27 = vcombine.high %v5716_v44, %v5716_v44  ;;  %v5838_v47 = vcombine.low %v5830_v12, %v5837_v42  ;;  %v9911_v0 = vadd.f32 %v5716_v44, %v10432_v13 }
 0xe2b   : > { %10431 = vst [vmem:[#allocation22_spill] sm:$0xff] %v9903_v35  ;;  %v5840_v59 = vcombine.low %v9900_v37, %v9903_v35  ;;  %v5847_v48 = vrot.slane %v5839_v8, %v8538_v5 }
 0xe2c   : > { %v5725_v45 = vcombine.high %v5723_v38, %v5723_v38  ;;  %10433 = vst [vmem:[#allocation2_spill] sm:$0xff] %v9911_v0  ;;  %v9914_v11 = vadd.f32 %v5724_v27, %v10434_v18  ;;  %v5884_v20 = vsel %vm741_vm0, %v5838_v47, 0.0  ;;  %v9920_v30 = vadd.f32 %v5723_v38, %v10436_v16 }
 0xe2d   : > { %5885 = vadd.xlane.f32.xlu0 %v5884_v20  ;;  %v5854_v43 = vrot.slane %v5840_v59, %v8538_v5 }
 0xe2e   : > { %10435 = vst [vmem:[#allocation7_spill] sm:$0xff] %v9914_v11  ;;  %10437 = vst [vmem:[#allocation6_spill] sm:$0xff] %v9920_v30  ;;  %v9923_v9 = vadd.f32 %v8418_v54, %v5725_v45  ;;  %v5856_v21 = vcombine.low %v9911_v0, %v9914_v11 }
 0xe2f   : > { %v5855_v26 = vcombine.low %v5847_v48, %v5854_v43 }
 0xe30   : > { %10438 = vst [vmem:[#allocation12_spill] sm:$0xff] %v9923_v9  ;;  %v5857_v28 = vcombine.low %v9920_v30, %v9923_v9  ;;  %v5864_v63 = vrot.slane %v5856_v21, %v8538_v5 }
 0xe31   : > { %v5887_v29 = vsel %vm741_vm0, %v5855_v26, 0.0 }
 0xe32   : > { %5888 = vadd.xlane.f32.xlu0 %v5887_v29  ;;  %v5871_v36 = vrot.slane %v5857_v28, %v8538_v5 }
 0xe34   : > { %v5872_v40 = vcombine.low %v5864_v63, %v5871_v36 }
 0xe36   : > { %v5890_v15 = vsel %vm741_vm0, %v5872_v40, 0.0 }
 0xe37   : > { %5891 = vadd.xlane.f32.xlu0 %v5890_v15 }
 0xeaf   : > { %v5880_v33 = vpop.xlane.xlu0 %5879 }
 0xeb0   : > { %v5893_v56 = vmul.f32 0.03125, %v5880_v33 }
 0xeb2   : > { %v5909_v61 = vrot.slane %v5893_v56, %v10439_v19  ;;  %v5916_v6 = vrot.slane %v5893_v56, %v10440_v7  ;;  %v5923_v62 = vrot.slane %v5893_v56, %v10441_v24  ;;  %v5930_v58 = vrot.slane %v5893_v56, %v10442_v49 }
 0xeb4   : > { %v9938_v53 = vsub.f32 %v9831_v60, %v5909_v61  ;;  %v9941_v46 = vsub.f32 %v9834_v17, %v5916_v6  ;;  %v9944_v4 = vsub.f32 %v9837_v32, %v5923_v62  ;;  %v9947_v10 = vsub.f32 %v9840_v25, %v5930_v58 }
 0xeb5   : > { %v5883_v55 = vpop.xlane.xlu1 %5882 }
 0xeb6   : > { %v5894_v44 = vmul.f32 0.03125, %v5883_v55  ;;  %v6083_v12 = vmul.f32 %v9938_v53, %v9938_v53  ;;  %v6084_v42 = vmul.f32 %v9941_v46, %v9941_v46  ;;  %v6085_v22 = vmul.f32 %v9944_v4, %v9944_v4 }
 0xeb7   : > { %v6086_v31 = vmul.f32 %v9947_v10, %v9947_v10 }
 0xeb8   : > { %v5937_v8 = vrot.slane %v5894_v44, %v10439_v19  ;;  %v5944_v38 = vrot.slane %v5894_v44, %v10440_v7  ;;  %v5951_v27 = vrot.slane %v5894_v44, %v10441_v24  ;;  %v5958_v47 = vrot.slane %v5894_v44, %v10442_v49 }
 0xeb9   : > { %v6123_v59 = vcombine.low %v6083_v12, %v6084_v42  ;;  %v6124_v45 = vcombine.low %v6085_v22, %v6086_v31 }
 0xeba   : > { %v9962_v13 = vsub.f32 %v9849_v14, %v5937_v8  ;;  %v9965_v18 = vsub.f32 %v9852_v2, %v5944_v38  ;;  %v9968_v20 = vsub.f32 %v9858_v52, %v5951_v27  ;;  %v9971_v48 = vsub.f32 %v9861_v41, %v5958_v47  ;;  %v5886_v43 = vpop.xlane.xlu0 %5885 }
 0xebb   : > { %v5895_v16 = vmul.f32 0.03125, %v5886_v43  ;;  %v6131_v54 = vrot.slane %v6123_v59, %v8538_v5  ;;  %v6138_v21 = vrot.slane %v6124_v45, %v8538_v5 }
 0xebc   : > { %v6087_v26 = vmul.f32 %v9962_v13, %v9962_v13  ;;  %v6088_v28 = vmul.f32 %v9965_v18, %v9965_v18  ;;  %v6089_v29 = vmul.f32 %v9968_v20, %v9968_v20  ;;  %v6090_v63 = vmul.f32 %v9971_v48, %v9971_v48 }
 0xebd   : > { %v5965_v36 = vrot.slane %v5895_v16, %v10439_v19  ;;  %v5972_v40 = vrot.slane %v5895_v16, %v10440_v7  ;;  %v5979_v15 = vrot.slane %v5895_v16, %v10441_v24  ;;  %v5986_v33 = vrot.slane %v5895_v16, %v10442_v49 }
 0xebe   : > { %v6139_v56 = vcombine.low %v6131_v54, %v6138_v21  ;;  %v6140_v61 = vcombine.low %v6087_v26, %v6088_v28  ;;  %v6141_v6 = vcombine.low %v6089_v29, %v6090_v63 }
 0xebf   : > { %v9988_v62 = vsub.f32 %v9870_v1, %v5965_v36  ;;  %v9991_v58 = vsub.f32 %v9873_v57, %v5972_v40  ;;  %v9994_v55 = vsub.f32 %v9879_v3, %v5979_v15  ;;  %v9997_v44 = vsub.f32 %v9882_v50, %v5986_v33  ;;  %v5889_v12 = vpop.xlane.xlu0 %5888 }
 0xec0   : > { %v6213_v42 = vsel %vm741_vm0, %v6139_v56, 0.0  ;;  %v5896_v22 = vmul.f32 0.03125, %v5889_v12  ;;  %v6148_v31 = vrot.slane %v6140_v61, %v8538_v5  ;;  %v6155_v8 = vrot.slane %v6141_v6, %v8538_v5 }
 0xec1   : > { %6214 = vadd.xlane.f32.xlu1 %v6213_v42  ;;  %v6091_v38 = vmul.f32 %v9988_v62, %v9988_v62  ;;  %v6092_v27 = vmul.f32 %v9991_v58, %v9991_v58  ;;  %v6093_v47 = vmul.f32 %v9994_v55, %v9994_v55  ;;  %v6094_v59 = vmul.f32 %v9997_v44, %v9997_v44 }
 0xec2   : > { %v5993_v45 = vrot.slane %v5896_v22, %v10439_v19  ;;  %v6000_v43 = vrot.slane %v5896_v22, %v10440_v7  ;;  %v6007_v16 = vrot.slane %v5896_v22, %v10441_v24  ;;  %v6014_v54 = vrot.slane %v5896_v22, %v10442_v49 }
 0xec3   : > { %v6156_v21 = vcombine.low %v6148_v31, %v6155_v8  ;;  %v6157_v26 = vcombine.low %v6091_v38, %v6092_v27  ;;  %v6158_v28 = vcombine.low %v6093_v47, %v6094_v59 }
 0xec4   : > { %v10015_v29 = vsub.f32 %v9890_v23, %v5993_v45  ;;  %v10018_v63 = vsub.f32 %v9893_v51, %v6000_v43  ;;  %v10021_v36 = vsub.f32 %v9900_v37, %v6007_v16  ;;  %v10024_v40 = vsub.f32 %v9903_v35, %v6014_v54  ;;  %v5892_v15 = vpop.xlane.xlu0 %5891 }
 0xec5   : > { %v5897_v33 = vmul.f32 0.03125, %v5892_v15  ;;  %v6216_v56 = vsel %vm741_vm0, %v6156_v21, 0.0  ;;  %v6165_v61 = vrot.slane %v6157_v26, %v8538_v5  ;;  %v6172_v6 = vrot.slane %v6158_v28, %v8538_v5 }
 0xec6   : > { %6217 = vadd.xlane.f32.xlu0 %v6216_v56  ;;  %v6095_v12 = vmul.f32 %v10015_v29, %v10015_v29  ;;  %v6096_v42 = vmul.f32 %v10018_v63, %v10018_v63  ;;  %v6097_v22 = vmul.f32 %v10021_v36, %v10021_v36  ;;  %v6098_v31 = vmul.f32 %v10024_v40, %v10024_v40 }
 0xec7   : > { %v6021_v8 = vrot.slane %v5897_v33, %v10439_v19  ;;  %v6028_v38 = vrot.slane %v5897_v33, %v10440_v7  ;;  %v6035_v27 = vrot.slane %v5897_v33, %v10441_v24  ;;  %v6042_v47 = vrot.slane %v5897_v33, %v10442_v49 }
 0xec8   : > { %v6173_v59 = vcombine.low %v6165_v61, %v6172_v6  ;;  %v6174_v45 = vcombine.low %v6095_v12, %v6096_v42  ;;  %v6175_v43 = vcombine.low %v6097_v22, %v6098_v31 }
 0xec9   : > { %v10042_v16 = vsub.f32 %v9911_v0, %v6021_v8  ;;  %v10045_v54 = vsub.f32 %v9914_v11, %v6028_v38  ;;  %v10048_v21 = vsub.f32 %v9920_v30, %v6035_v27  ;;  %v10051_v26 = vsub.f32 %v9923_v9, %v6042_v47 }
 0xeca   : > { %v6219_v28 = vsel %vm741_vm0, %v6173_v59, 0.0  ;;  %v6182_v15 = vrot.slane %v6174_v45, %v8538_v5  ;;  %v6189_v33 = vrot.slane %v6175_v43, %v8538_v5  ;;  %v6520_v45 = vld [vmem:[%s10346_s8] sm:$0xff]  ;;  %v6521_v43 = vld [vmem:[%s10346_s8 + $0x8] sm:$0xff] }
 0xecb   : > { %6220 = vadd.xlane.f32.xlu1 %v6219_v28  ;;  %v6099_v56 = vmul.f32 %v10042_v16, %v10042_v16  ;;  %v6100_v61 = vmul.f32 %v10045_v54, %v10045_v54  ;;  %v6101_v6 = vmul.f32 %v10048_v21, %v10048_v21  ;;  %v6102_v12 = vmul.f32 %v10051_v26, %v10051_v26  ;;  %v6522_v28 = vld [vmem:[%s10346_s8 + $0x10] sm:$0xff] }
 0xecc   : > { %v6190_v42 = vcombine.low %v6182_v15, %v6189_v33  ;;  %v8055_v15 = vpack.c.bf16 %v6521_v43, %v6520_v45  ;;  %v6523_v33 = vld [vmem:[%s10346_s8 + $0x18] sm:$0xff] }
 0xecd   : > { %v6191_v22 = vcombine.low %v6099_v56, %v6100_v61  ;;  %v6192_v31 = vcombine.low %v6101_v6, %v6102_v12  ;;  %v8058_v56 = vpack.c.bf16 %v6523_v33, %v6522_v28  ;;  %v6741_v61 = vld [vmem:[%s10348_s10] sm:$0xff]  ;;  %v6742_v6 = vld [vmem:[%s10348_s10 + $0x8] sm:$0xff]  ;;  %v6743_v12 = vld [vmem:[%s10348_s10 + $0x10] sm:$0xff] }
 0xece   : > { %v6222_v8 = vsel %vm741_vm0, %v6190_v42, 0.0  ;;  %8056 = vmatpush3.bf16.msra.mxu0 %v8055_v15  ;;  %v8061_v42 = vpack.c.bf16 %v6742_v6, %v6741_v61  ;;  %v7339_v15 = vld [vmem:[%s10350_s12] ss:$0 sm:$0xff] }
 0xecf   : > { %6223 = vadd.xlane.f32.xlu0 %v6222_v8  ;;  %v6199_v38 = vrot.slane %v6191_v22, %v8538_v5  ;;  %v6206_v27 = vrot.slane %v6192_v31, %v8538_v5  ;;  %8057 = vmatprep.subr.bf16.mxu0 %v10414_v34  ;;  %v6744_v22 = vld [vmem:[%s10348_s10 + $0x18] sm:$0xff]  ;;  %v6745_v8 = vld [vmem:[%s10348_s10 + $0x20] sm:$0xff]  ;;  %v6433_v61 = vcombine.high %v7339_v15, %v7339_v15 }
 0xed0   : > { %8062 = vmatpush3.bf16.msra.mxu1 %v8061_v42  ;;  %v8064_v31 = vpack.c.bf16 %v6744_v22, %v6743_v12 }
 0xed1   : > { %v6207_v47 = vcombine.low %v6199_v38, %v6206_v27  ;;  %8063 = vmatprep.subr.bf16.mxu1 %v10414_v34  ;;  %v6746_v38 = vld [vmem:[%s10348_s10 + $0x28] sm:$0xff] }
 0xed2   : > { %8059 = vmatpush3.bf16.msra.mxu0 %v8058_v56  ;;  %v8067_v27 = vpack.c.bf16 %v6746_v38, %v6745_v8  ;;  %v7340_v56 = vld [vmem:[%s10351_s13] ss:$0 sm:$0xff] }
 0xed3   : > { %v6225_v59 = vsel %vm741_vm0, %v6207_v47, 0.0  ;;  %v6479_v42 = vcombine.high %v7340_v56, %v7340_v56  ;;  %v10115_v8 = vrot.slane %v7340_v56, %v8538_v5 }
 0xed4   : > { %6226 = vadd.xlane.f32.xlu1 %v6225_v59  ;;  %8065 = vmatpush3.bf16.msra.mxu1 %v8064_v31  ;;  %v10112_v31 = vrot.slane %v6433_v61, %v8538_v5 }
 0xed5   : > { %8066 = vmatprep.subr.bf16.mxu1 %v10414_v34 }
 0xed6   : > { %v10130_v61 = vcombine.high %v10112_v31, %v10112_v31 }
 0xed8   : > { %8068 = vmatpush3.bf16.msra.mxu1 %v8067_v27 }
 0xed9   : > { %8069 = vmatprep.subr.bf16.mxu1 %v10414_v34  ;;  %v10109_v34 = vrot.slane %v7339_v15, %v8538_v5 }
 0xf4e   : > { %v6215_v47 = vpop.xlane.xlu1 %6214 }
 0xf4f   : > { %v6228_v59 = vmul.f32 0.03125, %v6215_v47 }
 0xf51   : > { %v6233_v45 = vadd.f32 1e-05, %v6228_v59  ;;  %v10119_v59 = vcombine.high %v10109_v34, %v10109_v34 }
 0xf53   : > { %8405 = vrsqrt.f32 %v6233_v45  ;;  %v6218_v43 = vpop.xlane.xlu0 %6217  ;;  %v10122_v45 = vrot.slane %v6479_v42, %v8538_v5 }
 0xf54   : > { %v6229_v28 = vmul.f32 0.03125, %v6218_v43 }
 0xf56   : > { %v6234_v33 = vadd.f32 1e-05, %v6229_v28 }
 0xf58   : > { %8407 = vrsqrt.f32 %v6234_v33  ;;  %v6221_v6 = vpop.xlane.xlu1 %6220 }
 0xf59   : > { %v6230_v12 = vmul.f32 0.03125, %v6221_v6  ;;  %v10134_v6 = vcombine.high %v10115_v8, %v10115_v8 }
 0xf5b   : > { %v6235_v22 = vadd.f32 1e-05, %v6230_v12 }
 0xf5c   : > { %v6224_v38 = vpop.xlane.xlu0 %6223 }
 0xf5d   : > { %v8406_v27 = vpop.eup %8405  ;;  %8409 = vrsqrt.f32 %v6235_v22  ;;  %v6231_v47 = vmul.f32 0.03125, %v6224_v38 }
 0xf5e   : > { %v6254_v43 = vrot.slane %v8406_v27, %v10439_v19  ;;  %v6261_v28 = vrot.slane %v8406_v27, %v10440_v7  ;;  %v6268_v15 = vrot.slane %v8406_v27, %v10441_v24  ;;  %v6275_v33 = vrot.slane %v8406_v27, %v10442_v49 }
 0xf5f   : > { %v6236_v56 = vadd.f32 1e-05, %v6231_v47  ;;  %v10142_v27 = vcombine.high %v10122_v45, %v10122_v45 }
 0xf60   : > { %v6408_v12 = vmul.f32 %v6254_v43, %v9938_v53  ;;  %v6409_v42 = vmul.f32 %v6261_v28, %v9941_v46  ;;  %v6410_v22 = vmul.f32 %v6268_v15, %v9944_v4  ;;  %v6411_v38 = vmul.f32 %v6275_v33, %v9947_v10 }
 0xf61   : > { %8411 = vrsqrt.f32 %v6236_v56  ;;  %v6227_v9 = vpop.xlane.xlu1 %6226 }
 0xf62   : > { %v8408_v47 = vpop.eup %8407  ;;  %v6232_v30 = vmul.f32 0.03125, %v6227_v9  ;;  %v6454_v11 = vmul.f32 %v10109_v34, %v6408_v12  ;;  %v6455_v0 = vmul.f32 %v10119_v59, %v6409_v42  ;;  %v6456_v53 = vmul.f32 %v10112_v31, %v6410_v22 }
 0xf63   : > { %v6457_v46 = vmul.f32 %v10130_v61, %v6411_v38  ;;  %v6282_v4 = vrot.slane %v8408_v47, %v10439_v19  ;;  %v6289_v10 = vrot.slane %v8408_v47, %v10440_v7  ;;  %v6296_v43 = vrot.slane %v8408_v47, %v10441_v24 }
 0xf64   : > { %v6237_v28 = vadd.f32 1e-05, %v6232_v30  ;;  %v6500_v15 = vadd.f32 %v10115_v8, %v6454_v11  ;;  %v6501_v33 = vadd.f32 %v10134_v6, %v6455_v0  ;;  %v6502_v9 = vadd.f32 %v10122_v45, %v6456_v53 }
 0xf65   : > { %v6503_v56 = vadd.f32 %v10142_v27, %v6457_v46  ;;  %v6303_v12 = vrot.slane %v8408_v47, %v10442_v49  ;;  %v6412_v42 = vmul.f32 %v6282_v4, %v9962_v13  ;;  %v6413_v22 = vmul.f32 %v6289_v10, %v9965_v18 }
 0xf66   : > { %8413 = vrsqrt.f32 %v6237_v28  ;;  %v6551_v38 = vcombine.low %v6500_v15, %v6501_v33  ;;  %v6414_v35 = vmul.f32 %v6296_v43, %v9968_v20 }
 0xf67   : > { %v8410_v37 = vpop.eup %8409  ;;  %v6552_v30 = vcombine.low %v6502_v9, %v6503_v56  ;;  %v6415_v11 = vmul.f32 %v6303_v12, %v9971_v48  ;;  %v6458_v0 = vmul.f32 %v10109_v34, %v6412_v42  ;;  %v6459_v53 = vmul.f32 %v10119_v59, %v6413_v22 }
 0xf68   : > { %v6559_v46 = vrot.slane %v6551_v38, %v8538_v5  ;;  %v6460_v47 = vmul.f32 %v10112_v31, %v6414_v35  ;;  %v6310_v13 = vrot.slane %v8410_v37, %v10439_v19  ;;  %v6317_v18 = vrot.slane %v8410_v37, %v10440_v7 }
 0xf69   : > { %v6566_v4 = vrot.slane %v6552_v30, %v8538_v5  ;;  %v6461_v20 = vmul.f32 %v10130_v61, %v6415_v11  ;;  %v6504_v10 = vadd.f32 %v10115_v8, %v6458_v0  ;;  %v6505_v48 = vadd.f32 %v10134_v6, %v6459_v53 }
 0xf6a   : > { %v6506_v43 = vadd.f32 %v10122_v45, %v6460_v47  ;;  %v6324_v28 = vrot.slane %v8410_v37, %v10441_v24  ;;  %v6331_v15 = vrot.slane %v8410_v37, %v10442_v49  ;;  %v6416_v35 = vmul.f32 %v6310_v13, %v9988_v62 }
 0xf6b   : > { %v8412_v33 = vpop.eup %8411  ;;  %v6567_v9 = vcombine.low %v6559_v46, %v6566_v4  ;;  %v6507_v56 = vadd.f32 %v10142_v27, %v6461_v20  ;;  %v6568_v12 = vcombine.low %v6504_v10, %v6505_v48  ;;  %v6417_v42 = vmul.f32 %v6317_v18, %v9991_v58 }
 0xf6c   : > { %v6418_v22 = vmul.f32 %v6324_v28, %v9994_v55  ;;  %v6419_v38 = vmul.f32 %v6331_v15, %v9997_v44  ;;  %v6462_v30 = vmul.f32 %v10109_v34, %v6416_v35  ;;  %v6338_v11 = vrot.slane %v8412_v33, %v10439_v19 }
 0xf6d   : > { %7805 = vmatmul.mubr.msk.f32.vlgmr.msra.gmra.mrb[42].mxu0 %vm741_vm0, %v6567_v9  ;;  %v6569_v37 = vcombine.low %v6506_v43, %v6507_v56  ;;  %v6576_v62 = vrot.slane %v6568_v12, %v8538_v5  ;;  %v6463_v0 = vmul.f32 %v10119_v59, %v6417_v42  ;;  %v6345_v53 = vrot.slane %v8412_v33, %v10440_v7 }
 0xf6e   : > { %7807 = vmatprep.mubr.msk.f32.mxu0 %vm8433_vm1, %v10407_v39  ;;  %v6464_v58 = vmul.f32 %v10112_v31, %v6418_v22  ;;  %v6465_v55 = vmul.f32 %v10130_v61, %v6419_v38  ;;  %v6508_v44 = vadd.f32 %v10115_v8, %v6462_v30  ;;  %v6352_v46 = vrot.slane %v8412_v33, %v10441_v24 }
 0xf6f   : > { %v6583_v47 = vrot.slane %v6569_v37, %v8538_v5  ;;  %v6509_v13 = vadd.f32 %v10134_v6, %v6463_v0  ;;  %v6359_v18 = vrot.slane %v8412_v33, %v10442_v49  ;;  %v6420_v4 = vmul.f32 %v6338_v11, %v10015_v29 }
 0xf70   : > { %v8414_v20 = vpop.eup %8413  ;;  %v6510_v10 = vadd.f32 %v10122_v45, %v6464_v58  ;;  %v6511_v48 = vadd.f32 %v10142_v27, %v6465_v55  ;;  %v6421_v43 = vmul.f32 %v6345_v53, %v10018_v63  ;;  %v6422_v28 = vmul.f32 %v6352_v46, %v10021_v36 }
 0xf71   : > { %v6584_v15 = vcombine.low %v6576_v62, %v6583_v47  ;;  %v6585_v35 = vcombine.low %v6508_v44, %v6509_v13  ;;  %v6423_v9 = vmul.f32 %v6359_v18, %v10024_v40  ;;  %v6466_v56 = vmul.f32 %v10109_v34, %v6420_v4 }
 0xf72   : > { %v6586_v12 = vcombine.low %v6510_v10, %v6511_v48  ;;  %v6467_v33 = vmul.f32 %v10119_v59, %v6421_v43  ;;  %v6468_v29 = vmul.f32 %v10112_v31, %v6422_v28  ;;  %v6366_v42 = vrot.slane %v8414_v20, %v10439_v19 }
 0xf73   : > { %7808 = vmatmul.mubr.msk.f32.gmra.mrb[44].mxu0 %vm741_vm0, %v6584_v15  ;;  %v6593_v22 = vrot.slane %v6585_v35, %v8538_v5  ;;  %v6469_v63 = vmul.f32 %v10130_v61, %v6423_v9  ;;  %v6512_v36 = vadd.f32 %v10115_v8, %v6466_v56  ;;  %v6373_v38 = vrot.slane %v8414_v20, %v10440_v7 }
 0xf74   : > { %7810 = vmatprep.mubr.msk.f32.mxu0 %vm8433_vm1, %v10407_v39  ;;  %v6600_v40 = vrot.slane %v6586_v12, %v8538_v5  ;;  %v6513_v30 = vadd.f32 %v10134_v6, %v6467_v33  ;;  %v6514_v11 = vadd.f32 %v10122_v45, %v6468_v29  ;;  %v6380_v19 = vrot.slane %v8414_v20, %v10441_v24 }
 0xf75   : > { %v6515_v37 = vadd.f32 %v10142_v27, %v6469_v63  ;;  %v6387_v62 = vrot.slane %v8414_v20, %v10442_v49  ;;  %v6424_v0 = vmul.f32 %v6366_v42, %v10042_v16  ;;  %v6425_v53 = vmul.f32 %v6373_v38, %v10045_v54 }
 0xf76   : > { %v6601_v7 = vcombine.low %v6593_v22, %v6600_v40  ;;  %v6602_v58 = vcombine.low %v6512_v36, %v6513_v30  ;;  %v6426_v55 = vmul.f32 %v6380_v19, %v10048_v21 }
 0xf77   : > { %v6603_v44 = vcombine.low %v6514_v11, %v6515_v37  ;;  %v6427_v46 = vmul.f32 %v6387_v62, %v10051_v26  ;;  %v6470_v47 = vmul.f32 %v10109_v34, %v6424_v0  ;;  %v6471_v13 = vmul.f32 %v10119_v59, %v6425_v53  ;;  %v10264_v62 = vld [vmem:[%s10349_s11] ss:$0 sm:$0xff] }
 0xf78   : > { %7811 = vmatmul.mubr.msk.f32.gmra.mrb[46].mxu0 %vm741_vm0, %v6601_v7  ;;  %v6610_v24 = vrot.slane %v6602_v58, %v8538_v5  ;;  %v6472_v49 = vmul.f32 %v10112_v31, %v6426_v55 }
 0xf79   : > { %7813 = vmatprep.mubr.msk.f32.mxu0 %vm8433_vm1, %v10407_v39  ;;  %v6617_v16 = vrot.slane %v6603_v44, %v8538_v5  ;;  %v6473_v54 = vmul.f32 %v10130_v61, %v6427_v46  ;;  %v6516_v21 = vadd.f32 %v10115_v8, %v6470_v47  ;;  %v6517_v26 = vadd.f32 %v10134_v6, %v6471_v13  ;;  %v6747_v8 = vld [vmem:[%s10348_s10 + $0x30] sm:$0xff] }
 0xf7a   : > { %v6518_v34 = vadd.f32 %v10122_v45, %v6472_v49  ;;  %v6748_v45 = vld [vmem:[%s10348_s10 + $0x38] sm:$0xff] }
 0xf7b   : > { %v6618_v59 = vcombine.low %v6610_v24, %v6617_v16  ;;  %v6519_v18 = vadd.f32 %v10142_v27, %v6473_v54  ;;  %v6619_v4 = vcombine.low %v6516_v21, %v6517_v26  ;;  %v8070_v6 = vpack.c.bf16 %v6748_v45, %v6747_v8  ;;  %v7341_v27 = vld [vmem:[%s10347_s9] ss:$0 sm:$0xff] }
 0xf7d   : > { %7814 = vmatmul.mubr.msk.f32.gmra.mrb[48].mxu0 %vm741_vm0, %v6618_v59  ;;  %v6620_v31 = vcombine.low %v6518_v34, %v6519_v18  ;;  %v6627_v20 = vrot.slane %v6619_v4, %v8538_v5  ;;  %8071 = vmatpush3.bf16.msra.mxu1 %v8070_v6 }
 0xf7e   : > { %7816 = vmatprep.mubr.msk.f32.mxu0 %vm8433_vm1, %v10407_v39 }
 0xf7f   : > { %v6634_v61 = vrot.slane %v6620_v31, %v8538_v5 }
 0xf81   : > { %v6635_v10 = vcombine.low %v6627_v20, %v6634_v61 }
 0xf83   : > { %7817 = vmatmul.mubr.msk.f32.gmra.mrb[50].mxu0 %vm741_vm0, %v6635_v10 }
0x1040   : > { %v6712_v48 = vpop.f32.mrb[42].mxu0 }
0x1041   : > { %v6713_v43 = vadd.f32 %v7341_v27, %v6712_v48  ;;  %v7806_v28 = vpop.f32.mrb[43].mxu0 }
0x1043   : > { %v6736_v15 = vmax.f32 %v6713_v43, 0.0 }
0x1045   : > { %7836 = vmatmul.mubr.msk.f32.vlgmr.msra.gmra.mrb[42].mxu1 %vm6756_vm2, %v6736_v15 }
0x1046   : > { %v6717_v35 = vpop.f32.mrb[44].mxu0  ;;  %7838 = vmatprep.mubr.msk.f32.mxu1 %vm8433_vm1, %v10407_v39 }
0x1047   : > { %v6718_v9 = vadd.f32 %v7341_v27, %v6717_v35  ;;  %v7809_v56 = vpop.f32.mrb[45].mxu0 }
0x1049   : > { %v6737_v12 = vmax.f32 %v6718_v9, 0.0 }
0x104b   : > { %v6722_v33 = vpop.f32.mrb[46].mxu0  ;;  %7839 = vmatmul.mubr.msk.f32.gmra.mrb[44].mxu1 %vm6756_vm2, %v6737_v12 }
0x104c   : > { %v6723_v29 = vadd.f32 %v7341_v27, %v6722_v33  ;;  %v7812_v42 = vpop.f32.mrb[47].mxu0  ;;  %7841 = vmatprep.mubr.msk.f32.mxu1 %vm8433_vm1, %v10407_v39 }
0x104e   : > { %v6738_v22 = vmax.f32 %v6723_v29, 0.0 }
0x1050   : > { %7842 = vmatmul.mubr.msk.f32.gmra.mrb[46].mxu1 %vm6756_vm2, %v6738_v22  ;;  %v6727_v63 = vpop.f32.mrb[48].mxu0 }
0x1051   : > { %v6728_v36 = vadd.f32 %v7341_v27, %v6727_v63  ;;  %v7815_v38 = vpop.f32.mrb[49].mxu0  ;;  %7844 = vmatprep.mubr.msk.f32.mxu1 %vm8433_vm1, %v10407_v39 }
0x1053   : > { %v6739_v40 = vmax.f32 %v6728_v36, 0.0 }
0x1055   : > { %7845 = vmatmul.mubr.msk.f32.gmra.mrb[48].mxu1 %vm6756_vm2, %v6739_v40 }
0x1056   : > { %v6732_v30 = vpop.f32.mrb[50].mxu0  ;;  %7847 = vmatprep.mubr.msk.f32.mxu1 %vm8433_vm1, %v10407_v39  ;;  %vm7117_vm1 = vcmask 254976  }
0x1057   : > { %v6733_v11 = vadd.f32 %v7341_v27, %v6732_v30  ;;  %v7818_v19 = vpop.f32.mrb[51].mxu0 }
0x1059   : > { %v6740_v37 = vmax.f32 %v6733_v11, 0.0 }
0x105b   : > { %7848 = vmatmul.mubr.msk.f32.gmra.mrb[50].mxu1 %vm6756_vm2, %v6740_v37 }
0x1118   : > { %v6838_v0 = vpop.f32.mrb[42].mxu1 }
0x1119   : > { %v6839_v53 = vadd.f32 %v10264_v62, %v6838_v0  ;;  %v7837_v7 = vpop.f32.mrb[43].mxu1 }
0x111b   : > { %v6867_v58 = vcombine.high %v6839_v53, %v6839_v53  ;;  %v6874_v55 = vrot.slane %v6839_v53, %v8538_v5  ;;  %v10443_v53 = vld [vmem:[#allocation23_spill] sm:$0xff] }
0x111d   : > { %v6881_v44 = vrot.slane %v6867_v58, %v8538_v5  ;;  %v6882_v39 = vcombine.high %v6874_v55, %v6874_v55  ;;  %v6972_v13 = vadd.f32 %v6874_v55, %v9831_v60 }
0x111e   : > { %v6843_v46 = vpop.f32.mrb[44].mxu1 }
0x111f   : > { %v6883_v47 = vcombine.high %v6881_v44, %v6881_v44  ;;  %v6973_v24 = vadd.f32 %v6882_v39, %v9834_v17  ;;  %v6844_v49 = vadd.f32 %v10264_v62, %v6843_v46  ;;  %v7840_v16 = vpop.f32.mrb[45].mxu1  ;;  %v6974_v54 = vadd.f32 %v6881_v44, %v9837_v32 }
0x1121   : > { %v6975_v21 = vadd.f32 %v6883_v47, %v9840_v25  ;;  %v7012_v26 = vcombine.low %v6972_v13, %v6973_v24  ;;  %v6884_v34 = vcombine.high %v6844_v49, %v6844_v49  ;;  %v6891_v59 = vrot.slane %v6844_v49, %v8538_v5  ;;  %v10444_v47 = vld [vmem:[#allocation22_spill] sm:$0xff] }
0x1122   : > { %v10445_v49 = vld [vmem:[#allocation2_spill] sm:$0xff] }
0x1123   : > { %v7013_v18 = vcombine.low %v6974_v54, %v6975_v21  ;;  %v6898_v4 = vrot.slane %v6884_v34, %v8538_v5  ;;  %v6899_v31 = vcombine.high %v6891_v59, %v6891_v59  ;;  %v6848_v20 = vpop.f32.mrb[46].mxu1  ;;  %v7020_v60 = vrot.slane %v7012_v26, %v8538_v5  ;;  %v10446_v26 = vld [vmem:[#allocation7_spill] sm:$0xff] }
0x1124   : > { %v6976_v17 = vadd.f32 %v6891_v59, %v9849_v14  ;;  %v6849_v61 = vadd.f32 %v10264_v62, %v6848_v20  ;;  %v7843_v10 = vpop.f32.mrb[47].mxu1  ;;  %v10447_v59 = vld [vmem:[#allocation6_spill] sm:$0xff] }
0x1125   : > { %v7027_v32 = vrot.slane %v7013_v18, %v8538_v5  ;;  %v6900_v25 = vcombine.high %v6898_v4, %v6898_v4  ;;  %v6977_v8 = vadd.f32 %v6899_v31, %v9852_v2  ;;  %v6978_v45 = vadd.f32 %v6898_v4, %v9858_v52  ;;  %v10448_v31 = vld [vmem:[#allocation12_spill] sm:$0xff] }
0x1126   : > { %v7035_v14 = vrot.slane %v6976_v17, %v8538_v5  ;;  %v6901_v6 = vcombine.high %v6849_v61, %v6849_v61  ;;  %v6908_v27 = vrot.slane %v6849_v61, %v8538_v5 }
0x1127   : > { %v7028_v48 = vcombine.low %v7020_v60, %v7027_v32  ;;  %v7036_v43 = vcombine.low %v6977_v8, %v6978_v45  ;;  %v6979_v28 = vadd.f32 %v6900_v25, %v9861_v41 }
0x1128   : > { %7118 = vst.msk [vmem:[%s10283_s27 + $0x8] sm:$0x3] %vm7117_vm1, %v7035_v14  ;;  %v6915_v15 = vrot.slane %v6901_v6, %v8538_v5  ;;  %v6916_v35 = vcombine.high %v6908_v27, %v6908_v27  ;;  %v6980_v9 = vadd.f32 %v6908_v27, %v9870_v1  ;;  %v6853_v56 = vpop.f32.mrb[48].mxu1 }
0x1129   : > { %7116 = vst.msk [vmem:[%s10283_s27] sm:$0xff] %vm741_vm0, %v7028_v48  ;;  %v6854_v2 = vadd.f32 %v10264_v62, %v6853_v56  ;;  %v7846_v52 = vpop.f32.mrb[49].mxu1  ;;  %v7044_v41 = vrot.slane %v7036_v43, %v8538_v5 }
0x112a   : > { %v6917_v12 = vcombine.high %v6915_v15, %v6915_v15  ;;  %v6981_v33 = vadd.f32 %v6916_v35, %v9873_v57  ;;  %v7037_v29 = vcombine.low %v6979_v28, %v6980_v9  ;;  %v6982_v63 = vadd.f32 %v6915_v15, %v9879_v3 }
0x112b   : > { %v6918_v42 = vcombine.high %v6854_v2, %v6854_v2  ;;  %v6925_v22 = vrot.slane %v6854_v2, %v8538_v5 }
0x112c   : > { %v6983_v1 = vadd.f32 %v6917_v12, %v9882_v50  ;;  %v7051_v36 = vrot.slane %v7037_v29, %v8538_v5  ;;  %v7059_v38 = vrot.slane %v6981_v33, %v8538_v5 }
0x112d   : > { %v6932_v40 = vrot.slane %v6918_v42, %v8538_v5  ;;  %v6933_v30 = vcombine.high %v6925_v22, %v6925_v22  ;;  %v6984_v19 = vadd.f32 %v6925_v22, %v9890_v23 }
0x112e   : > { %v7052_v11 = vcombine.low %v7044_v41, %v7051_v36  ;;  %v7060_v57 = vcombine.low %v6982_v63, %v6983_v1  ;;  %7120 = vst.msk [vmem:[%s10283_s27 + $0x18] sm:$0x3] %vm7117_vm1, %v7059_v38  ;;  %v6858_v37 = vpop.f32.mrb[50].mxu1 }
0x112f   : > { %v6934_v0 = vcombine.high %v6932_v40, %v6932_v40  ;;  %v6985_v3 = vadd.f32 %v6933_v30, %v9893_v51  ;;  %v6986_v50 = vadd.f32 %v6932_v40, %v10443_v53  ;;  %v6859_v7 = vadd.f32 %v10264_v62, %v6858_v37  ;;  %v7849_v58 = vpop.f32.mrb[51].mxu1 }
0x1130   : > { %7119 = vst.msk [vmem:[%s10283_s27 + $0x10] sm:$0xff] %vm741_vm0, %v7052_v11  ;;  %v7068_v23 = vrot.slane %v7060_v57, %v8538_v5 }
0x1131   : > { %v7061_v55 = vcombine.low %v6984_v19, %v6985_v3  ;;  %v7083_v44 = vrot.slane %v6986_v50, %v8538_v5  ;;  %v6935_v39 = vcombine.high %v6859_v7, %v6859_v7  ;;  %v6942_v46 = vrot.slane %v6859_v7, %v8538_v5 }
0x1132   : > { %v6987_v13 = vadd.f32 %v6934_v0, %v10444_v47 }
0x1133   : > { %v7075_v51 = vrot.slane %v7061_v55, %v8538_v5  ;;  %7122 = vst.msk [vmem:[%s10283_s27 + $0x28] sm:$0x3] %vm7117_vm1, %v7083_v44  ;;  %v6949_v62 = vrot.slane %v6935_v39, %v8538_v5  ;;  %v6950_v24 = vcombine.high %v6942_v46, %v6942_v46  ;;  %v6988_v16 = vadd.f32 %v6942_v46, %v10445_v49 }
0x1135   : > { %v7076_v54 = vcombine.low %v7068_v23, %v7075_v51  ;;  %v6951_v21 = vcombine.high %v6949_v62, %v6949_v62  ;;  %v6989_v34 = vadd.f32 %v6950_v24, %v10446_v26  ;;  %v6990_v18 = vadd.f32 %v6949_v62, %v10447_v59 }
0x1136   : > { %v7084_v4 = vcombine.low %v6987_v13, %v6988_v16 }
0x1137   : > { %7121 = vst.msk [vmem:[%s10283_s27 + $0x20] sm:$0xff] %vm741_vm0, %v7076_v54  ;;  %v6991_v20 = vadd.f32 %v6951_v21, %v10448_v31  ;;  %v7085_v60 = vcombine.low %v6989_v34, %v6990_v18 }
0x1138   : > { %v7092_v17 = vrot.slane %v7084_v4, %v8538_v5 }
0x1139   : > { %v7099_v61 = vrot.slane %v7085_v60, %v8538_v5  ;;  %v7107_v10 = vrot.slane %v6991_v20, %v8538_v5 }
0x113b   : > { %v7100_v32 = vcombine.low %v7092_v17, %v7099_v61  ;;  %7124 = vst.msk [vmem:[%s10283_s27 + $0x38] sm:$0x3] %vm7117_vm1, %v7107_v10 }
0x113d   : > { %7123 = vst.msk [vmem:[%s10283_s27 + $0x30] sm:$0xff] %vm741_vm0, %v7100_v32 }
0x113e PF: > { %s24_s29 = sadd.s32 1, %s8425_s29  }
0x113f   : > { %p21_p4 = scmp.ge.s32.totalorder %s24_s29, 4  }
0x1141   :  { %23 = sbr.rel (!%p21_p4) target bundleno = 1 (0x1), region = 109 }

</bundles_post_ra>
